<compile_context>
chip_gen: v6e
topology: v6e:2x2x1
jax: 0.10.0
libtpu: 0.0.40
codegen_flags: <defaults>
</compile_context>

<pallas_src>
from functools import partial

import numpy as np

import jax
import jax.numpy as jnp
from jax import lax
from jax.experimental import pallas as pl
from jax.experimental.pallas import tpu as pltpu

KERNEL_SIZES = (1, 3, 5)
BN_EPS = 1e-5
_W_NAMES = {1: "w1", 3: "w3", 5: "w5"}

# Nonzero offsets of the parity-folded depthwise kernels:
#   oy = (parity + dy - k//2) // 2 maps the k taps onto offsets in {-1, 0, 1};
#   the folded footprint is 1x1 (k=1), 2x2 (k=3), 3x3 (k=5).
_FOLD_OFFSETS = {
    1: {0: (0,), 1: (0,)},
    3: {0: (-1, 0), 1: (0, 1)},
    5: {0: (-1, 0, 1), 1: (-1, 0, 1)},
}


def efub_kernel(xm_ref, x0_ref, xp_ref, wf_ref, gamma_ref, beta_ref, proj_ref,
                wblk_ref, bias_ref, out_ref, conv_sc, prod_sc, *, inv_n):
    """Fused EFUB forward in the lane-fused (W*C on lanes) layout.

    xm/x0/xp : (B, H+2, W*C)   lane-aligned x-shifted 1-px-padded copies (ox=-1,0,+1)
    wf_ref   : (3*4*9, W*C)    parity-folded depthwise weights, tiled across W;
                               row = (branch*4 + parity)*9 + (oy+1)*3 + (ox+1)
    gamma/beta: (3, W*C)       per-branch BN affine params, pre-tiled across W
    proj_ref : (W*C, W*C)      0/1 lane->channel fold + channel->lane broadcast (sel@selt)
    wblk_ref : (W*C, W*Cout)   block-diagonal 1x1-conv weight = kron(I_W, Wpw)
    bias_ref : (1, W*Cout)     1x1-conv bias tiled over W
    out_ref  : (4*B*H, W*Cout) parity-major lane-dense output,
                               row = (2r+s)*B*H + b*H + i, col = j*Cout + co
    conv_sc  : (4*B*H, W*C)    per-branch stacked parity convs (VMEM scratch)
    prod_sc  : (4*B*H, W*C)    running multi-branch product (VMEM scratch)
    """
    B, Hp2, F = x0_ref.shape
    H = Hp2 - 2
    BH = B * H
    f32 = jnp.float32
    xrefs = (xm_ref, x0_ref, xp_ref)   # indexed by ox + 1; all lane-dense (last dim F)

    def tap(oy, ox):
        # sublane(H)-only shifted view of the ox-aligned copy; no lane relayout.
        return xrefs[ox + 1][:, 1 + oy:1 + oy + H, :]

    ones_row = jnp.ones((1, 4 * BH), f32)   # hoisted: shared by all 3 branches

    for bi, k in enumerate(KERNEL_SIZES):
        offs = _FOLD_OFFSETS[k]

        # Depthwise conv fused with the 2x nearest upsample (parity decomposition).
        # Taps are loaded at point of use (low vreg pressure); the accumulator starts
        # from the first tap product, and each parity is stored straight into the
        # stacked (4*B*H, F) scratch layout (no concatenate later).
        for r in (0, 1):
            for s in (0, 1):
                p = 2 * r + s
                acc = None
                for oy in offs[r]:
                    for ox in offs[s]:
                        row = (bi * 4 + p) * 9 + (oy + 1) * 3 + (ox + 1)
                        t = tap(oy, ox) * wf_ref[row, :]
                        acc = t if acc is None else acc + t
                conv_sc[p * BH:(p + 1) * BH, :] = acc.reshape(BH, F)

        # One-pass BN stats on the (otherwise idle) MXU: two M=1 reductions over the
        # 4*B*H rows, then one fused (2,F)@(F,F) lane->channel fold that also
        # broadcasts back onto the lanes.  rsqrt runs at full F=128 lane width.
        cs = conv_sc[...]                                               # (4BH, F)
        s1 = jnp.dot(ones_row, cs, preferred_element_type=f32)          # (1, F)
        s2 = jnp.dot(ones_row, cs * cs, preferred_element_type=f32)     # (1, F)
        s12 = jnp.dot(jnp.concatenate([s1, s2], axis=0), proj_ref[...],
                      preferred_element_type=f32)                       # (2, F)
        mean = s12[0:1, :] * inv_n
        var = s12[1:2, :] * inv_n - mean * mean     # biased var (PyTorch BN, training)
        scale = gamma_ref[bi:bi + 1, :] * lax.rsqrt(var + BN_EPS)       # (1, F)
        shift = beta_ref[bi:bi + 1, :] - mean * scale                   # (1, F)

        # BN + ReLU on the whole parity stack, streamed into the running product.
        br = jnp.maximum(cs * scale + shift, 0.0)                       # (4BH, F)
        prod_sc[...] = br if bi == 0 else prod_sc[...] * br

    # channel_shuffle(groups=Cin) == identity (one channel per group) -> no-op.
    # 1x1 conv: ONE lane-dense MXU matmul with the block-diagonal kron(I_W, Wpw).
    # TODO(synk): cast prod/wblk to bf16 (keep f32 accumulation) on v5e/v6e/v7x once the
    # downstream tolerance allows; kept f32 here since the MXU is idle at this size and
    # the validation tolerance is tight.
    y = jnp.dot(prod_sc[...], wblk_ref[...], preferred_element_type=f32) + bias_ref[...]
    out_ref[...] = y.astype(out_ref.dtype)


def _full_spec(shape):
    return pl.BlockSpec(shape, lambda i: (0,) * len(shape))


def _fold_matrix(k, parity):
    """(k, 3) 0/1 matrix folding tap dy onto offset oy = (parity + dy - k//2) // 2."""
    p = k // 2
    m = np.zeros((k, 3), np.float32)
    for d in range(k):
        m[d, (parity + d - p) // 2 + 1] = 1.0
    return m


def _folded_weight_rows(params, W):
    """(3*4*9, W*C) parity-folded depthwise weights, tiled across W on the lane axis."""
    rows = []
    for k in KERNEL_SIZES:
        wk = params[_W_NAMES[k]].astype(jnp.float32)              # (k, k, C)
        for r in (0, 1):
            fy = _fold_matrix(k, r)
            for s in (0, 1):
                fx = _fold_matrix(k, s)
                folded = jnp.einsum("yY,xX,yxc->YXc", fy, fx, wk)  # (3, 3, C)
                rows.append(jnp.tile(folded, (1, 1, W)).reshape(9, -1))
    return jnp.concatenate(rows, axis=0)


@jax.jit
def efub_forward(x_nchw, params):
    """EFUB forward. x_nchw: (B, Cin, H, W) -> (B, Cout, 2H, 2W)."""
    B, C, H, W = x_nchw.shape
    Cout = params["wpw"].shape[1]
    F = W * C
    BH = B * H

    # layout glue: NCHW -> NHWC -> 1-px zero pad -> three lane-aligned x-shifted copies
    # (ox = -1, 0, +1), each with lane dim exactly W*C so in-kernel taps never cross a
    # (8,128) tile boundary on the lane axis.
    x = jnp.transpose(x_nchw, (0, 2, 3, 1)).astype(jnp.float32)
    xpad4 = jnp.pad(x, ((0, 0), (1, 1), (1, 1), (0, 0)))              # (B, H+2, W+2, C)
    xshift = [xpad4[:, :, 1 + ox:1 + ox + W, :].reshape(B, H + 2, F)
              for ox in (-1, 0, 1)]

    # parity-folded, lane-tiled depthwise weights (tiny one-time fold)
    wf = _folded_weight_rows(params, W)                                # (108, F)

    # BN affine params pre-tiled to lane width F; lane<->channel projector (sel @ selt);
    # block-diagonal pointwise weight and tiled bias.
    gamma_f = jnp.tile(params["gamma"].astype(jnp.float32), (1, W))    # (3, F)
    beta_f = jnp.tile(params["beta"].astype(jnp.float32), (1, W))      # (3, F)
    proj = jnp.asarray(np.kron(np.ones((W, W), np.float32),
                               np.eye(C, dtype=np.float32)))           # (F, F)
    wblk = jnp.kron(jnp.eye(W, dtype=jnp.float32),
                    params["wpw"].astype(jnp.float32))                 # (F, W*Cout)
    bias = jnp.tile(params["bpw"].astype(jnp.float32), (1, W))         # (1, W*Cout)

    kernel = partial(efub_kernel, inv_n=1.0 / float(4 * B * H * W))
    out_shape = (4 * BH, W * Cout)
    out2d = pl.pallas_call(
        kernel,
        out_shape=jax.ShapeDtypeStruct(out_shape, jnp.float32),
        grid=(1,),
        in_specs=[
            _full_spec(xshift[0].shape),
            _full_spec(xshift[1].shape),
            _full_spec(xshift[2].shape),
            _full_spec(wf.shape),
            _full_spec(gamma_f.shape),
            _full_spec(beta_f.shape),
            _full_spec(proj.shape),
            _full_spec(wblk.shape),
            _full_spec(bias.shape),
        ],
        out_specs=_full_spec(out_shape),
        scratch_shapes=[pltpu.VMEM((4 * BH, F), jnp.float32),   # per-branch conv stack
                        pltpu.VMEM((4 * BH, F), jnp.float32)],  # running branch product
        compiler_params=pltpu.CompilerParams(
            dimension_semantics=("arbitrary",),
            vmem_limit_bytes=32 * 1024 * 1024),
    )(xshift[0], xshift[1], xshift[2], wf, gamma_f, beta_f, proj, wblk, bias)

    # layout glue: un-interleave parity classes -> (B, 2H, 2W, Cout) -> NCHW
    out6 = out2d.reshape(2, 2, B, H, W, Cout)
    y_nhwc = jnp.transpose(out6, (2, 3, 0, 4, 1, 5)).reshape(B, 2 * H, 2 * W, Cout)
    return jnp.transpose(y_nhwc, (0, 3, 1, 2))


def init_params(key, cin, cout):
    """EFUB.init_weights('normal'): conv w ~ N(0, 0.02^2), conv b = 0, BN gamma=1 beta=0."""
    k1, k3, k5, kp = jax.random.split(key, 4)
    return {
        "w1": jax.random.normal(k1, (1, 1, cin), jnp.float32) * 0.02,
        "w3": jax.random.normal(k3, (3, 3, cin), jnp.float32) * 0.02,
        "w5": jax.random.normal(k5, (5, 5, cin), jnp.float32) * 0.02,
        "gamma": jnp.ones((3, cin), jnp.float32),
        "beta": jnp.zeros((3, cin), jnp.float32),
        "wpw": jax.random.normal(kp, (cin, cout), jnp.float32) * 0.02,
        "bpw": jnp.zeros((1, cout), jnp.float32),
    }


def efub_reference(x_nchw, params):
    """Pure-JAX (XLA) reference mirroring the PyTorch module, for validation."""
    B, C, H, W = x_nchw.shape
    up = jnp.repeat(jnp.repeat(x_nchw, 2, axis=2), 2, axis=3)   # nearest 2x
    hi = lax.Precision.HIGHEST
    branches = []
    for bi, (k, name) in enumerate(zip(KERNEL_SIZES, ("w1", "w3", "w5"))):
        w_oihw = jnp.transpose(params[name], (2, 0, 1))[:, None]  # (C,1,k,k)
        p = k // 2
        y = lax.conv_general_dilated(
            up, w_oihw, (1, 1), [(p, p), (p, p)],
            dimension_numbers=("NCHW", "OIHW", "NCHW"),
            feature_group_count=C, precision=hi)
        mean = jnp.mean(y, axis=(0, 2, 3), keepdims=True)
        var = jnp.mean((y - mean) ** 2, axis=(0, 2, 3), keepdims=True)
        g = params["gamma"][bi][None, :, None, None]
        b = params["beta"][bi][None, :, None, None]
        y = (y - mean) / jnp.sqrt(var + BN_EPS) * g + b
        branches.append(jnp.maximum(y, 0.0))
    prod = branches[0] * branches[1] * branches[2]
    # channel_shuffle(prod, groups=C) is the identity (channels_per_group == 1)
    w_pw = jnp.transpose(params["wpw"])[:, :, None, None]         # (Cout, C, 1, 1)
    out = lax.conv_general_dilated(
        prod, w_pw, (1, 1), [(0, 0), (0, 0)],
        dimension_numbers=("NCHW", "OIHW", "NCHW"), precision=hi)
    return out + params["bpw"][0][None, :, None, None]


if __name__ == "__main__":
    key = jax.random.PRNGKey(0)
    kx, kp = jax.random.split(key)
    B, Cin, Cout, H, W = 2, 8, 16, 16, 16   # W * Cin = 128 -> fully lane-dense in kernel

    x = jax.random.normal(kx, (B, Cin, H, W), jnp.float32)        # NCHW, like PyTorch
    params = init_params(kp, Cin, Cout)

    out = efub_forward(x, params)
    out = jax.block_until_ready(out)
    assert out.shape == (B, Cout, 2 * H, 2 * W), out.shape

    ref = efub_reference(x, params)
    np.testing.assert_allclose(np.asarray(out), np.asarray(ref), atol=3e-3, rtol=3e-3)

    print("KERNEL_OK")
</pallas_src>

<mosaic_0001>
module attributes {stable_mosaic.version = 11 : i64} {
  func.func @efub_kernel(%arg0: i32, %arg1: memref<2x18x128xf32, #tpu.memory_space<vmem>>, %arg2: memref<2x18x128xf32, #tpu.memory_space<vmem>>, %arg3: memref<2x18x128xf32, #tpu.memory_space<vmem>>, %arg4: memref<108x128xf32, #tpu.memory_space<vmem>>, %arg5: memref<3x128xf32, #tpu.memory_space<vmem>>, %arg6: memref<3x128xf32, #tpu.memory_space<vmem>>, %arg7: memref<128x128xf32, #tpu.memory_space<vmem>>, %arg8: memref<128x256xf32, #tpu.memory_space<vmem>>, %arg9: memref<1x256xf32, #tpu.memory_space<vmem>>, %arg10: memref<128x256xf32, #tpu.memory_space<vmem>>, %arg11: memref<128x128xf32, #tpu.memory_space<vmem>>, %arg12: memref<128x128xf32, #tpu.memory_space<vmem>>) attributes {dimension_semantics = [#tpu.dimension_semantics<arbitrary>], iteration_bounds = array<i64: 1>, scalar_prefetch = 0 : i64, scratch_operands = 2 : i64, tpu.core_type = #tpu.core_type<tc>, window_params = [{pipeline_mode = #tpu.pipeline_mode<synchronous>, transform_indices = @transform_0, window_bounds = array<i64: 2, 18, 128>}, {pipeline_mode = #tpu.pipeline_mode<synchronous>, transform_indices = @transform_1, window_bounds = array<i64: 2, 18, 128>}, {pipeline_mode = #tpu.pipeline_mode<synchronous>, transform_indices = @transform_2, window_bounds = array<i64: 2, 18, 128>}, {pipeline_mode = #tpu.pipeline_mode<synchronous>, transform_indices = @transform_3, window_bounds = array<i64: 108, 128>}, {pipeline_mode = #tpu.pipeline_mode<synchronous>, transform_indices = @transform_4, window_bounds = array<i64: 3, 128>}, {pipeline_mode = #tpu.pipeline_mode<synchronous>, transform_indices = @transform_5, window_bounds = array<i64: 3, 128>}, {pipeline_mode = #tpu.pipeline_mode<synchronous>, transform_indices = @transform_6, window_bounds = array<i64: 128, 128>}, {pipeline_mode = #tpu.pipeline_mode<synchronous>, transform_indices = @transform_7, window_bounds = array<i64: 128, 256>}, {pipeline_mode = #tpu.pipeline_mode<synchronous>, transform_indices = @transform_8, window_bounds = array<i64: 1, 256>}, {pipeline_mode = #tpu.pipeline_mode<synchronous>, transform_indices = @transform_9, window_bounds = array<i64: 128, 256>}]} {
    %cst = arith.constant 1.000000e+00 : f32
    %0 = vector.broadcast %cst : f32 to vector<1x128xf32>
    %c0 = arith.constant 0 : index
    %c1 = arith.constant 1 : index
    %c0_0 = arith.constant 0 : index
    %1 = vector.load %arg2[%c0, %c1, %c0_0] : memref<2x18x128xf32, #tpu.memory_space<vmem>>, vector<2x16x128xf32>
    %c4 = arith.constant 4 : index
    %c0_1 = arith.constant 0 : index
    %2 = vector.load %arg4[%c4, %c0_1] : memref<108x128xf32, #tpu.memory_space<vmem>>, vector<1x128xf32>
    %3 = vector.shape_cast %2 : vector<1x128xf32> to vector<128xf32>
    %4 = vector.shape_cast %3 : vector<128xf32> to vector<1x1x128xf32>
    %5 = vector.broadcast %4 : vector<1x1x128xf32> to vector<2x16x128xf32>
    %6 = arith.mulf %1, %5 : vector<2x16x128xf32>
    %7 = vector.shape_cast %6 : vector<2x16x128xf32> to vector<32x128xf32>
    %c0_2 = arith.constant 0 : index
    %c0_3 = arith.constant 0 : index
    %8 = vector.load %arg11[%c0_2, %c0_3] : memref<128x128xf32, #tpu.memory_space<vmem>>, vector<32x128xf32>
    tpu.vector_store %arg11[%c0_2, %c0_3], %7 {strides = array<i32>} : memref<128x128xf32, #tpu.memory_space<vmem>>, vector<32x128xf32>,
    %c0_4 = arith.constant 0 : index
    %c1_5 = arith.constant 1 : index
    %c0_6 = arith.constant 0 : index
    %9 = vector.load %arg2[%c0_4, %c1_5, %c0_6] : memref<2x18x128xf32, #tpu.memory_space<vmem>>, vector<2x16x128xf32>
    %c13 = arith.constant 13 : index
    %c0_7 = arith.constant 0 : index
    %10 = vector.load %arg4[%c13, %c0_7] : memref<108x128xf32, #tpu.memory_space<vmem>>, vector<1x128xf32>
    %11 = vector.shape_cast %10 : vector<1x128xf32> to vector<128xf32>
    %12 = vector.shape_cast %11 : vector<128xf32> to vector<1x1x128xf32>
    %13 = vector.broadcast %12 : vector<1x1x128xf32> to vector<2x16x128xf32>
    %14 = arith.mulf %9, %13 : vector<2x16x128xf32>
    %15 = vector.shape_cast %14 : vector<2x16x128xf32> to vector<32x128xf32>
    %c32 = arith.constant 32 : index
    %c0_8 = arith.constant 0 : index
    %16 = vector.load %arg11[%c32, %c0_8] : memref<128x128xf32, #tpu.memory_space<vmem>>, vector<32x128xf32>
    tpu.vector_store %arg11[%c32, %c0_8], %15 {strides = array<i32>} : memref<128x128xf32, #tpu.memory_space<vmem>>, vector<32x128xf32>,
    %c0_9 = arith.constant 0 : index
    %c1_10 = arith.constant 1 : index
    %c0_11 = arith.constant 0 : index
    %17 = vector.load %arg2[%c0_9, %c1_10, %c0_11] : memref<2x18x128xf32, #tpu.memory_space<vmem>>, vector<2x16x128xf32>
    %c22 = arith.constant 22 : index
    %c0_12 = arith.constant 0 : index
    %18 = vector.load %arg4[%c22, %c0_12] : memref<108x128xf32, #tpu.memory_space<vmem>>, vector<1x128xf32>
    %19 = vector.shape_cast %18 : vector<1x128xf32> to vector<128xf32>
    %20 = vector.shape_cast %19 : vector<128xf32> to vector<1x1x128xf32>
    %21 = vector.broadcast %20 : vector<1x1x128xf32> to vector<2x16x128xf32>
    %22 = arith.mulf %17, %21 : vector<2x16x128xf32>
    %23 = vector.shape_cast %22 : vector<2x16x128xf32> to vector<32x128xf32>
    %c64 = arith.constant 64 : index
    %c0_13 = arith.constant 0 : index
    %24 = vector.load %arg11[%c64, %c0_13] : memref<128x128xf32, #tpu.memory_space<vmem>>, vector<32x128xf32>
    tpu.vector_store %arg11[%c64, %c0_13], %23 {strides = array<i32>} : memref<128x128xf32, #tpu.memory_space<vmem>>, vector<32x128xf32>,
    %c0_14 = arith.constant 0 : index
    %c1_15 = arith.constant 1 : index
    %c0_16 = arith.constant 0 : index
    %25 = vector.load %arg2[%c0_14, %c1_15, %c0_16] : memref<2x18x128xf32, #tpu.memory_space<vmem>>, vector<2x16x128xf32>
    %c31 = arith.constant 31 : index
    %c0_17 = arith.constant 0 : index
    %26 = vector.load %arg4[%c31, %c0_17] : memref<108x128xf32, #tpu.memory_space<vmem>>, vector<1x128xf32>
    %27 = vector.shape_cast %26 : vector<1x128xf32> to vector<128xf32>
    %28 = vector.shape_cast %27 : vector<128xf32> to vector<1x1x128xf32>
    %29 = vector.broadcast %28 : vector<1x1x128xf32> to vector<2x16x128xf32>
    %30 = arith.mulf %25, %29 : vector<2x16x128xf32>
    %31 = vector.shape_cast %30 : vector<2x16x128xf32> to vector<32x128xf32>
    %c96 = arith.constant 96 : index
    %c0_18 = arith.constant 0 : index
    %32 = vector.load %arg11[%c96, %c0_18] : memref<128x128xf32, #tpu.memory_space<vmem>>, vector<32x128xf32>
    tpu.vector_store %arg11[%c96, %c0_18], %31 {strides = array<i32>} : memref<128x128xf32, #tpu.memory_space<vmem>>, vector<32x128xf32>,
    %c0_19 = arith.constant 0 : index
    %c0_20 = arith.constant 0 : index
    %33 = vector.load %arg11[%c0_19, %c0_20] : memref<128x128xf32, #tpu.memory_space<vmem>>, vector<128x128xf32>
    %cst_21 = arith.constant dense<0.000000e+00> : vector<1x128xf32>
    %34 = tpu.matmul %0, %33, %cst_21 {dimension_numbers = #tpu.dot_dimension_numbers<[1], [0], [0], [1], [0, 0, 1, 1], [], []>} : vector<1x128xf32>, vector<128x128xf32>, vector<1x128xf32> -> vector<1x128xf32>
    %35 = arith.mulf %33, %33 : vector<128x128xf32>
    %cst_22 = arith.constant dense<0.000000e+00> : vector<1x128xf32>
    %36 = tpu.matmul %0, %35, %cst_22 {dimension_numbers = #tpu.dot_dimension_numbers<[1], [0], [0], [1], [0, 0, 1, 1], [], []>} : vector<1x128xf32>, vector<128x128xf32>, vector<1x128xf32> -> vector<1x128xf32>
    %37 = tpu.concatenate %34, %36 in 0 : vector<1x128xf32>, vector<1x128xf32> -> vector<2x128xf32>
    %c0_23 = arith.constant 0 : index
    %c0_24 = arith.constant 0 : index
    %38 = vector.load %arg7[%c0_23, %c0_24] : memref<128x128xf32, #tpu.memory_space<vmem>>, vector<128x128xf32>
    %cst_25 = arith.constant dense<0.000000e+00> : vector<2x128xf32>
    %39 = tpu.matmul %37, %38, %cst_25 {dimension_numbers = #tpu.dot_dimension_numbers<[1], [0], [0], [1], [0, 0, 1, 1], [], []>} : vector<2x128xf32>, vector<128x128xf32>, vector<2x128xf32> -> vector<2x128xf32>
    %40 = vector.extract_strided_slice %39 {offsets = [0, 0], sizes = [1, 128], strides = [1, 1]} : vector<2x128xf32> to vector<1x128xf32>
    %cst_26 = arith.constant 4.8828125E-4 : f32
    %41 = vector.broadcast %cst_26 : f32 to vector<1x128xf32>
    %42 = arith.mulf %40, %41 : vector<1x128xf32>
    %43 = vector.extract_strided_slice %39 {offsets = [1, 0], sizes = [1, 128], strides = [1, 1]} : vector<2x128xf32> to vector<1x128xf32>
    %cst_27 = arith.constant 4.8828125E-4 : f32
    %44 = vector.broadcast %cst_27 : f32 to vector<1x128xf32>
    %45 = arith.mulf %43, %44 : vector<1x128xf32>
    %46 = arith.mulf %42, %42 : vector<1x128xf32>
    %47 = arith.subf %45, %46 : vector<1x128xf32>
    %c0_28 = arith.constant 0 : index
    %c0_29 = arith.constant 0 : index
    %48 = vector.load %arg5[%c0_28, %c0_29] : memref<3x128xf32, #tpu.memory_space<vmem>>, vector<1x128xf32>
    %cst_30 = arith.constant 9.99999974E-6 : f32
    %49 = vector.broadcast %cst_30 : f32 to vector<1x128xf32>
    %50 = arith.addf %47, %49 : vector<1x128xf32>
    %51 = math.rsqrt %50 : vector<1x128xf32>
    %52 = arith.mulf %48, %51 : vector<1x128xf32>
    %c0_31 = arith.constant 0 : index
    %c0_32 = arith.constant 0 : index
    %53 = vector.load %arg6[%c0_31, %c0_32] : memref<3x128xf32, #tpu.memory_space<vmem>>, vector<1x128xf32>
    %54 = arith.mulf %42, %52 : vector<1x128xf32>
    %55 = arith.subf %53, %54 : vector<1x128xf32>
    %56 = vector.broadcast %52 : vector<1x128xf32> to vector<128x128xf32>
    %57 = arith.mulf %33, %56 : vector<128x128xf32>
    %58 = vector.broadcast %55 : vector<1x128xf32> to vector<128x128xf32>
    %59 = arith.addf %57, %58 : vector<128x128xf32>
    %cst_33 = arith.constant 0.000000e+00 : f32
    %60 = vector.broadcast %cst_33 : f32 to vector<128x128xf32>
    %61 = arith.maximumf %59, %60 : vector<128x128xf32>
    %c0_34 = arith.constant 0 : index
    %c0_35 = arith.constant 0 : index
    %62 = vector.load %arg12[%c0_34, %c0_35] : memref<128x128xf32, #tpu.memory_space<vmem>>, vector<128x128xf32>
    tpu.vector_store %arg12[%c0_34, %c0_35], %61 {strides = array<i32>} : memref<128x128xf32, #tpu.memory_space<vmem>>, vector<128x128xf32>,
    %c0_36 = arith.constant 0 : index
    %c0_37 = arith.constant 0 : index
    %c0_38 = arith.constant 0 : index
    %63 = vector.load %arg1[%c0_36, %c0_37, %c0_38] : memref<2x18x128xf32, #tpu.memory_space<vmem>>, vector<2x16x128xf32>
    %c36 = arith.constant 36 : index
    %c0_39 = arith.constant 0 : index
    %64 = vector.load %arg4[%c36, %c0_39] : memref<108x128xf32, #tpu.memory_space<vmem>>, vector<1x128xf32>
    %65 = vector.shape_cast %64 : vector<1x128xf32> to vector<128xf32>
    %66 = vector.shape_cast %65 : vector<128xf32> to vector<1x1x128xf32>
    %67 = vector.broadcast %66 : vector<1x1x128xf32> to vector<2x16x128xf32>
    %68 = arith.mulf %63, %67 : vector<2x16x128xf32>
    %c0_40 = arith.constant 0 : index
    %c0_41 = arith.constant 0 : index
    %c0_42 = arith.constant 0 : index
    %69 = vector.load %arg2[%c0_40, %c0_41, %c0_42] : memref<2x18x128xf32, #tpu.memory_space<vmem>>, vector<2x16x128xf32>
    %c37 = arith.constant 37 : index
    %c0_43 = arith.constant 0 : index
    %70 = vector.load %arg4[%c37, %c0_43] : memref<108x128xf32, #tpu.memory_space<vmem>>, vector<1x128xf32>
    %71 = vector.shape_cast %70 : vector<1x128xf32> to vector<128xf32>
    %72 = vector.shape_cast %71 : vector<128xf32> to vector<1x1x128xf32>
    %73 = vector.broadcast %72 : vector<1x1x128xf32> to vector<2x16x128xf32>
    %74 = arith.mulf %69, %73 : vector<2x16x128xf32>
    %75 = arith.addf %68, %74 : vector<2x16x128xf32>
    %c0_44 = arith.constant 0 : index
    %c1_45 = arith.constant 1 : index
    %c0_46 = arith.constant 0 : index
    %76 = vector.load %arg1[%c0_44, %c1_45, %c0_46] : memref<2x18x128xf32, #tpu.memory_space<vmem>>, vector<2x16x128xf32>
    %c39 = arith.constant 39 : index
    %c0_47 = arith.constant 0 : index
    %77 = vector.load %arg4[%c39, %c0_47] : memref<108x128xf32, #tpu.memory_space<vmem>>, vector<1x128xf32>
    %78 = vector.shape_cast %77 : vector<1x128xf32> to vector<128xf32>
    %79 = vector.shape_cast %78 : vector<128xf32> to vector<1x1x128xf32>
    %80 = vector.broadcast %79 : vector<1x1x128xf32> to vector<2x16x128xf32>
    %81 = arith.mulf %76, %80 : vector<2x16x128xf32>
    %82 = arith.addf %75, %81 : vector<2x16x128xf32>
    %c0_48 = arith.constant 0 : index
    %c1_49 = arith.constant 1 : index
    %c0_50 = arith.constant 0 : index
    %83 = vector.load %arg2[%c0_48, %c1_49, %c0_50] : memref<2x18x128xf32, #tpu.memory_space<vmem>>, vector<2x16x128xf32>
    %c40 = arith.constant 40 : index
    %c0_51 = arith.constant 0 : index
    %84 = vector.load %arg4[%c40, %c0_51] : memref<108x128xf32, #tpu.memory_space<vmem>>, vector<1x128xf32>
    %85 = vector.shape_cast %84 : vector<1x128xf32> to vector<128xf32>
    %86 = vector.shape_cast %85 : vector<128xf32> to vector<1x1x128xf32>
    %87 = vector.broadcast %86 : vector<1x1x128xf32> to vector<2x16x128xf32>
    %88 = arith.mulf %83, %87 : vector<2x16x128xf32>
    %89 = arith.addf %82, %88 : vector<2x16x128xf32>
    %90 = vector.shape_cast %89 : vector<2x16x128xf32> to vector<32x128xf32>
    %c0_52 = arith.constant 0 : index
    %c0_53 = arith.constant 0 : index
    %91 = vector.load %arg11[%c0_52, %c0_53] : memref<128x128xf32, #tpu.memory_space<vmem>>, vector<32x128xf32>
    tpu.vector_store %arg11[%c0_52, %c0_53], %90 {strides = array<i32>} : memref<128x128xf32, #tpu.memory_space<vmem>>, vector<32x128xf32>,
    %c0_54 = arith.constant 0 : index
    %c0_55 = arith.constant 0 : index
    %c0_56 = arith.constant 0 : index
    %92 = vector.load %arg2[%c0_54, %c0_55, %c0_56] : memref<2x18x128xf32, #tpu.memory_space<vmem>>, vector<2x16x128xf32>
    %c46 = arith.constant 46 : index
    %c0_57 = arith.constant 0 : index
    %93 = vector.load %arg4[%c46, %c0_57] : memref<108x128xf32, #tpu.memory_space<vmem>>, vector<1x128xf32>
    %94 = vector.shape_cast %93 : vector<1x128xf32> to vector<128xf32>
    %95 = vector.shape_cast %94 : vector<128xf32> to vector<1x1x128xf32>
    %96 = vector.broadcast %95 : vector<1x1x128xf32> to vector<2x16x128xf32>
    %97 = arith.mulf %92, %96 : vector<2x16x128xf32>
    %c0_58 = arith.constant 0 : index
    %c0_59 = arith.constant 0 : index
    %c0_60 = arith.constant 0 : index
    %98 = vector.load %arg3[%c0_58, %c0_59, %c0_60] : memref<2x18x128xf32, #tpu.memory_space<vmem>>, vector<2x16x128xf32>
    %c47 = arith.constant 47 : index
    %c0_61 = arith.constant 0 : index
    %99 = vector.load %arg4[%c47, %c0_61] : memref<108x128xf32, #tpu.memory_space<vmem>>, vector<1x128xf32>
    %100 = vector.shape_cast %99 : vector<1x128xf32> to vector<128xf32>
    %101 = vector.shape_cast %100 : vector<128xf32> to vector<1x1x128xf32>
    %102 = vector.broadcast %101 : vector<1x1x128xf32> to vector<2x16x128xf32>
    %103 = arith.mulf %98, %102 : vector<2x16x128xf32>
    %104 = arith.addf %97, %103 : vector<2x16x128xf32>
    %c0_62 = arith.constant 0 : index
    %c1_63 = arith.constant 1 : index
    %c0_64 = arith.constant 0 : index
    %105 = vector.load %arg2[%c0_62, %c1_63, %c0_64] : memref<2x18x128xf32, #tpu.memory_space<vmem>>, vector<2x16x128xf32>
    %c49 = arith.constant 49 : index
    %c0_65 = arith.constant 0 : index
    %106 = vector.load %arg4[%c49, %c0_65] : memref<108x128xf32, #tpu.memory_space<vmem>>, vector<1x128xf32>
    %107 = vector.shape_cast %106 : vector<1x128xf32> to vector<128xf32>
    %108 = vector.shape_cast %107 : vector<128xf32> to vector<1x1x128xf32>
    %109 = vector.broadcast %108 : vector<1x1x128xf32> to vector<2x16x128xf32>
    %110 = arith.mulf %105, %109 : vector<2x16x128xf32>
    %111 = arith.addf %104, %110 : vector<2x16x128xf32>
    %c0_66 = arith.constant 0 : index
    %c1_67 = arith.constant 1 : index
    %c0_68 = arith.constant 0 : index
    %112 = vector.load %arg3[%c0_66, %c1_67, %c0_68] : memref<2x18x128xf32, #tpu.memory_space<vmem>>, vector<2x16x128xf32>
    %c50 = arith.constant 50 : index
    %c0_69 = arith.constant 0 : index
    %113 = vector.load %arg4[%c50, %c0_69] : memref<108x128xf32, #tpu.memory_space<vmem>>, vector<1x128xf32>
    %114 = vector.shape_cast %113 : vector<1x128xf32> to vector<128xf32>
    %115 = vector.shape_cast %114 : vector<128xf32> to vector<1x1x128xf32>
    %116 = vector.broadcast %115 : vector<1x1x128xf32> to vector<2x16x128xf32>
    %117 = arith.mulf %112, %116 : vector<2x16x128xf32>
    %118 = arith.addf %111, %117 : vector<2x16x128xf32>
    %119 = vector.shape_cast %118 : vector<2x16x128xf32> to vector<32x128xf32>
    %c32_70 = arith.constant 32 : index
    %c0_71 = arith.constant 0 : index
    %120 = vector.load %arg11[%c32_70, %c0_71] : memref<128x128xf32, #tpu.memory_space<vmem>>, vector<32x128xf32>
    tpu.vector_store %arg11[%c32_70, %c0_71], %119 {strides = array<i32>} : memref<128x128xf32, #tpu.memory_space<vmem>>, vector<32x128xf32>,
    %c0_72 = arith.constant 0 : index
    %c1_73 = arith.constant 1 : index
    %c0_74 = arith.constant 0 : index
    %121 = vector.load %arg1[%c0_72, %c1_73, %c0_74] : memref<2x18x128xf32, #tpu.memory_space<vmem>>, vector<2x16x128xf32>
    %c57 = arith.constant 57 : index
    %c0_75 = arith.constant 0 : index
    %122 = vector.load %arg4[%c57, %c0_75] : memref<108x128xf32, #tpu.memory_space<vmem>>, vector<1x128xf32>
    %123 = vector.shape_cast %122 : vector<1x128xf32> to vector<128xf32>
    %124 = vector.shape_cast %123 : vector<128xf32> to vector<1x1x128xf32>
    %125 = vector.broadcast %124 : vector<1x1x128xf32> to vector<2x16x128xf32>
    %126 = arith.mulf %121, %125 : vector<2x16x128xf32>
    %c0_76 = arith.constant 0 : index
    %c1_77 = arith.constant 1 : index
    %c0_78 = arith.constant 0 : index
    %127 = vector.load %arg2[%c0_76, %c1_77, %c0_78] : memref<2x18x128xf32, #tpu.memory_space<vmem>>, vector<2x16x128xf32>
    %c58 = arith.constant 58 : index
    %c0_79 = arith.constant 0 : index
    %128 = vector.load %arg4[%c58, %c0_79] : memref<108x128xf32, #tpu.memory_space<vmem>>, vector<1x128xf32>
    %129 = vector.shape_cast %128 : vector<1x128xf32> to vector<128xf32>
    %130 = vector.shape_cast %129 : vector<128xf32> to vector<1x1x128xf32>
    %131 = vector.broadcast %130 : vector<1x1x128xf32> to vector<2x16x128xf32>
    %132 = arith.mulf %127, %131 : vector<2x16x128xf32>
    %133 = arith.addf %126, %132 : vector<2x16x128xf32>
    %c0_80 = arith.constant 0 : index
    %c2 = arith.constant 2 : index
    %c0_81 = arith.constant 0 : index
    %134 = vector.load %arg1[%c0_80, %c2, %c0_81] : memref<2x18x128xf32, #tpu.memory_space<vmem>>, vector<2x16x128xf32>
    %c60 = arith.constant 60 : index
    %c0_82 = arith.constant 0 : index
    %135 = vector.load %arg4[%c60, %c0_82] : memref<108x128xf32, #tpu.memory_space<vmem>>, vector<1x128xf32>
    %136 = vector.shape_cast %135 : vector<1x128xf32> to vector<128xf32>
    %137 = vector.shape_cast %136 : vector<128xf32> to vector<1x1x128xf32>
    %138 = vector.broadcast %137 : vector<1x1x128xf32> to vector<2x16x128xf32>
    %139 = arith.mulf %134, %138 : vector<2x16x128xf32>
    %140 = arith.addf %133, %139 : vector<2x16x128xf32>
    %c0_83 = arith.constant 0 : index
    %c2_84 = arith.constant 2 : index
    %c0_85 = arith.constant 0 : index
    %141 = vector.load %arg2[%c0_83, %c2_84, %c0_85] : memref<2x18x128xf32, #tpu.memory_space<vmem>>, vector<2x16x128xf32>
    %c61 = arith.constant 61 : index
    %c0_86 = arith.constant 0 : index
    %142 = vector.load %arg4[%c61, %c0_86] : memref<108x128xf32, #tpu.memory_space<vmem>>, vector<1x128xf32>
    %143 = vector.shape_cast %142 : vector<1x128xf32> to vector<128xf32>
    %144 = vector.shape_cast %143 : vector<128xf32> to vector<1x1x128xf32>
    %145 = vector.broadcast %144 : vector<1x1x128xf32> to vector<2x16x128xf32>
    %146 = arith.mulf %141, %145 : vector<2x16x128xf32>
    %147 = arith.addf %140, %146 : vector<2x16x128xf32>
    %148 = vector.shape_cast %147 : vector<2x16x128xf32> to vector<32x128xf32>
    %c64_87 = arith.constant 64 : index
    %c0_88 = arith.constant 0 : index
    %149 = vector.load %arg11[%c64_87, %c0_88] : memref<128x128xf32, #tpu.memory_space<vmem>>, vector<32x128xf32>
    tpu.vector_store %arg11[%c64_87, %c0_88], %148 {strides = array<i32>} : memref<128x128xf32, #tpu.memory_space<vmem>>, vector<32x128xf32>,
    %c0_89 = arith.constant 0 : index
    %c1_90 = arith.constant 1 : index
    %c0_91 = arith.constant 0 : index
    %150 = vector.load %arg2[%c0_89, %c1_90, %c0_91] : memref<2x18x128xf32, #tpu.memory_space<vmem>>, vector<2x16x128xf32>
    %c67 = arith.constant 67 : index
    %c0_92 = arith.constant 0 : index
    %151 = vector.load %arg4[%c67, %c0_92] : memref<108x128xf32, #tpu.memory_space<vmem>>, vector<1x128xf32>
    %152 = vector.shape_cast %151 : vector<1x128xf32> to vector<128xf32>
    %153 = vector.shape_cast %152 : vector<128xf32> to vector<1x1x128xf32>
    %154 = vector.broadcast %153 : vector<1x1x128xf32> to vector<2x16x128xf32>
    %155 = arith.mulf %150, %154 : vector<2x16x128xf32>
    %c0_93 = arith.constant 0 : index
    %c1_94 = arith.constant 1 : index
    %c0_95 = arith.constant 0 : index
    %156 = vector.load %arg3[%c0_93, %c1_94, %c0_95] : memref<2x18x128xf32, #tpu.memory_space<vmem>>, vector<2x16x128xf32>
    %c68 = arith.constant 68 : index
    %c0_96 = arith.constant 0 : index
    %157 = vector.load %arg4[%c68, %c0_96] : memref<108x128xf32, #tpu.memory_space<vmem>>, vector<1x128xf32>
    %158 = vector.shape_cast %157 : vector<1x128xf32> to vector<128xf32>
    %159 = vector.shape_cast %158 : vector<128xf32> to vector<1x1x128xf32>
    %160 = vector.broadcast %159 : vector<1x1x128xf32> to vector<2x16x128xf32>
    %161 = arith.mulf %156, %160 : vector<2x16x128xf32>
    %162 = arith.addf %155, %161 : vector<2x16x128xf32>
    %c0_97 = arith.constant 0 : index
    %c2_98 = arith.constant 2 : index
    %c0_99 = arith.constant 0 : index
    %163 = vector.load %arg2[%c0_97, %c2_98, %c0_99] : memref<2x18x128xf32, #tpu.memory_space<vmem>>, vector<2x16x128xf32>
    %c70 = arith.constant 70 : index
    %c0_100 = arith.constant 0 : index
    %164 = vector.load %arg4[%c70, %c0_100] : memref<108x128xf32, #tpu.memory_space<vmem>>, vector<1x128xf32>
    %165 = vector.shape_cast %164 : vector<1x128xf32> to vector<128xf32>
    %166 = vector.shape_cast %165 : vector<128xf32> to vector<1x1x128xf32>
    %167 = vector.broadcast %166 : vector<1x1x128xf32> to vector<2x16x128xf32>
    %168 = arith.mulf %163, %167 : vector<2x16x128xf32>
    %169 = arith.addf %162, %168 : vector<2x16x128xf32>
    %c0_101 = arith.constant 0 : index
    %c2_102 = arith.constant 2 : index
    %c0_103 = arith.constant 0 : index
    %170 = vector.load %arg3[%c0_101, %c2_102, %c0_103] : memref<2x18x128xf32, #tpu.memory_space<vmem>>, vector<2x16x128xf32>
    %c71 = arith.constant 71 : index
    %c0_104 = arith.constant 0 : index
    %171 = vector.load %arg4[%c71, %c0_104] : memref<108x128xf32, #tpu.memory_space<vmem>>, vector<1x128xf32>
    %172 = vector.shape_cast %171 : vector<1x128xf32> to vector<128xf32>
    %173 = vector.shape_cast %172 : vector<128xf32> to vector<1x1x128xf32>
    %174 = vector.broadcast %173 : vector<1x1x128xf32> to vector<2x16x128xf32>
    %175 = arith.mulf %170, %174 : vector<2x16x128xf32>
    %176 = arith.addf %169, %175 : vector<2x16x128xf32>
    %177 = vector.shape_cast %176 : vector<2x16x128xf32> to vector<32x128xf32>
    %c96_105 = arith.constant 96 : index
    %c0_106 = arith.constant 0 : index
    %178 = vector.load %arg11[%c96_105, %c0_106] : memref<128x128xf32, #tpu.memory_space<vmem>>, vector<32x128xf32>
    tpu.vector_store %arg11[%c96_105, %c0_106], %177 {strides = array<i32>} : memref<128x128xf32, #tpu.memory_space<vmem>>, vector<32x128xf32>,
    %c0_107 = arith.constant 0 : index
    %c0_108 = arith.constant 0 : index
    %179 = vector.load %arg11[%c0_107, %c0_108] : memref<128x128xf32, #tpu.memory_space<vmem>>, vector<128x128xf32>
    %cst_109 = arith.constant dense<0.000000e+00> : vector<1x128xf32>
    %180 = tpu.matmul %0, %179, %cst_109 {dimension_numbers = #tpu.dot_dimension_numbers<[1], [0], [0], [1], [0, 0, 1, 1], [], []>} : vector<1x128xf32>, vector<128x128xf32>, vector<1x128xf32> -> vector<1x128xf32>
    %181 = arith.mulf %179, %179 : vector<128x128xf32>
    %cst_110 = arith.constant dense<0.000000e+00> : vector<1x128xf32>
    %182 = tpu.matmul %0, %181, %cst_110 {dimension_numbers = #tpu.dot_dimension_numbers<[1], [0], [0], [1], [0, 0, 1, 1], [], []>} : vector<1x128xf32>, vector<128x128xf32>, vector<1x128xf32> -> vector<1x128xf32>
    %183 = tpu.concatenate %180, %182 in 0 : vector<1x128xf32>, vector<1x128xf32> -> vector<2x128xf32>
    %c0_111 = arith.constant 0 : index
    %c0_112 = arith.constant 0 : index
    %184 = vector.load %arg7[%c0_111, %c0_112] : memref<128x128xf32, #tpu.memory_space<vmem>>, vector<128x128xf32>
    %cst_113 = arith.constant dense<0.000000e+00> : vector<2x128xf32>
    %185 = tpu.matmul %183, %184, %cst_113 {dimension_numbers = #tpu.dot_dimension_numbers<[1], [0], [0], [1], [0, 0, 1, 1], [], []>} : vector<2x128xf32>, vector<128x128xf32>, vector<2x128xf32> -> vector<2x128xf32>
    %186 = vector.extract_strided_slice %185 {offsets = [0, 0], sizes = [1, 128], strides = [1, 1]} : vector<2x128xf32> to vector<1x128xf32>
    %cst_114 = arith.constant 4.8828125E-4 : f32
    %187 = vector.broadcast %cst_114 : f32 to vector<1x128xf32>
    %188 = arith.mulf %186, %187 : vector<1x128xf32>
    %189 = vector.extract_strided_slice %185 {offsets = [1, 0], sizes = [1, 128], strides = [1, 1]} : vector<2x128xf32> to vector<1x128xf32>
    %cst_115 = arith.constant 4.8828125E-4 : f32
    %190 = vector.broadcast %cst_115 : f32 to vector<1x128xf32>
    %191 = arith.mulf %189, %190 : vector<1x128xf32>
    %192 = arith.mulf %188, %188 : vector<1x128xf32>
    %193 = arith.subf %191, %192 : vector<1x128xf32>
    %c1_116 = arith.constant 1 : index
    %c0_117 = arith.constant 0 : index
    %194 = vector.load %arg5[%c1_116, %c0_117] : memref<3x128xf32, #tpu.memory_space<vmem>>, vector<1x128xf32>
    %cst_118 = arith.constant 9.99999974E-6 : f32
    %195 = vector.broadcast %cst_118 : f32 to vector<1x128xf32>
    %196 = arith.addf %193, %195 : vector<1x128xf32>
    %197 = math.rsqrt %196 : vector<1x128xf32>
    %198 = arith.mulf %194, %197 : vector<1x128xf32>
    %c1_119 = arith.constant 1 : index
    %c0_120 = arith.constant 0 : index
    %199 = vector.load %arg6[%c1_119, %c0_120] : memref<3x128xf32, #tpu.memory_space<vmem>>, vector<1x128xf32>
    %200 = arith.mulf %188, %198 : vector<1x128xf32>
    %201 = arith.subf %199, %200 : vector<1x128xf32>
    %202 = vector.broadcast %198 : vector<1x128xf32> to vector<128x128xf32>
    %203 = arith.mulf %179, %202 : vector<128x128xf32>
    %204 = vector.broadcast %201 : vector<1x128xf32> to vector<128x128xf32>
    %205 = arith.addf %203, %204 : vector<128x128xf32>
    %cst_121 = arith.constant 0.000000e+00 : f32
    %206 = vector.broadcast %cst_121 : f32 to vector<128x128xf32>
    %207 = arith.maximumf %205, %206 : vector<128x128xf32>
    %c0_122 = arith.constant 0 : index
    %c0_123 = arith.constant 0 : index
    %208 = vector.load %arg12[%c0_122, %c0_123] : memref<128x128xf32, #tpu.memory_space<vmem>>, vector<128x128xf32>
    %209 = arith.mulf %208, %207 : vector<128x128xf32>
    %c0_124 = arith.constant 0 : index
    %c0_125 = arith.constant 0 : index
    %210 = vector.load %arg12[%c0_124, %c0_125] : memref<128x128xf32, #tpu.memory_space<vmem>>, vector<128x128xf32>
    tpu.vector_store %arg12[%c0_124, %c0_125], %209 {strides = array<i32>} : memref<128x128xf32, #tpu.memory_space<vmem>>, vector<128x128xf32>,
    %c0_126 = arith.constant 0 : index
    %c0_127 = arith.constant 0 : index
    %c0_128 = arith.constant 0 : index
    %211 = vector.load %arg1[%c0_126, %c0_127, %c0_128] : memref<2x18x128xf32, #tpu.memory_space<vmem>>, vector<2x16x128xf32>
    %c72 = arith.constant 72 : index
    %c0_129 = arith.constant 0 : index
    %212 = vector.load %arg4[%c72, %c0_129] : memref<108x128xf32, #tpu.memory_space<vmem>>, vector<1x128xf32>
    %213 = vector.shape_cast %212 : vector<1x128xf32> to vector<128xf32>
    %214 = vector.shape_cast %213 : vector<128xf32> to vector<1x1x128xf32>
    %215 = vector.broadcast %214 : vector<1x1x128xf32> to vector<2x16x128xf32>
    %216 = arith.mulf %211, %215 : vector<2x16x128xf32>
    %c0_130 = arith.constant 0 : index
    %c0_131 = arith.constant 0 : index
    %c0_132 = arith.constant 0 : index
    %217 = vector.load %arg2[%c0_130, %c0_131, %c0_132] : memref<2x18x128xf32, #tpu.memory_space<vmem>>, vector<2x16x128xf32>
    %c73 = arith.constant 73 : index
    %c0_133 = arith.constant 0 : index
    %218 = vector.load %arg4[%c73, %c0_133] : memref<108x128xf32, #tpu.memory_space<vmem>>, vector<1x128xf32>
    %219 = vector.shape_cast %218 : vector<1x128xf32> to vector<128xf32>
    %220 = vector.shape_cast %219 : vector<128xf32> to vector<1x1x128xf32>
    %221 = vector.broadcast %220 : vector<1x1x128xf32> to vector<2x16x128xf32>
    %222 = arith.mulf %217, %221 : vector<2x16x128xf32>
    %223 = arith.addf %216, %222 : vector<2x16x128xf32>
    %c0_134 = arith.constant 0 : index
    %c0_135 = arith.constant 0 : index
    %c0_136 = arith.constant 0 : index
    %224 = vector.load %arg3[%c0_134, %c0_135, %c0_136] : memref<2x18x128xf32, #tpu.memory_space<vmem>>, vector<2x16x128xf32>
    %c74 = arith.constant 74 : index
    %c0_137 = arith.constant 0 : index
    %225 = vector.load %arg4[%c74, %c0_137] : memref<108x128xf32, #tpu.memory_space<vmem>>, vector<1x128xf32>
    %226 = vector.shape_cast %225 : vector<1x128xf32> to vector<128xf32>
    %227 = vector.shape_cast %226 : vector<128xf32> to vector<1x1x128xf32>
    %228 = vector.broadcast %227 : vector<1x1x128xf32> to vector<2x16x128xf32>
    %229 = arith.mulf %224, %228 : vector<2x16x128xf32>
    %230 = arith.addf %223, %229 : vector<2x16x128xf32>
    %c0_138 = arith.constant 0 : index
    %c1_139 = arith.constant 1 : index
    %c0_140 = arith.constant 0 : index
    %231 = vector.load %arg1[%c0_138, %c1_139, %c0_140] : memref<2x18x128xf32, #tpu.memory_space<vmem>>, vector<2x16x128xf32>
    %c75 = arith.constant 75 : index
    %c0_141 = arith.constant 0 : index
    %232 = vector.load %arg4[%c75, %c0_141] : memref<108x128xf32, #tpu.memory_space<vmem>>, vector<1x128xf32>
    %233 = vector.shape_cast %232 : vector<1x128xf32> to vector<128xf32>
    %234 = vector.shape_cast %233 : vector<128xf32> to vector<1x1x128xf32>
    %235 = vector.broadcast %234 : vector<1x1x128xf32> to vector<2x16x128xf32>
    %236 = arith.mulf %231, %235 : vector<2x16x128xf32>
    %237 = arith.addf %230, %236 : vector<2x16x128xf32>
    %c0_142 = arith.constant 0 : index
    %c1_143 = arith.constant 1 : index
    %c0_144 = arith.constant 0 : index
    %238 = vector.load %arg2[%c0_142, %c1_143, %c0_144] : memref<2x18x128xf32, #tpu.memory_space<vmem>>, vector<2x16x128xf32>
    %c76 = arith.constant 76 : index
    %c0_145 = arith.constant 0 : index
    %239 = vector.load %arg4[%c76, %c0_145] : memref<108x128xf32, #tpu.memory_space<vmem>>, vector<1x128xf32>
    %240 = vector.shape_cast %239 : vector<1x128xf32> to vector<128xf32>
    %241 = vector.shape_cast %240 : vector<128xf32> to vector<1x1x128xf32>
    %242 = vector.broadcast %241 : vector<1x1x128xf32> to vector<2x16x128xf32>
    %243 = arith.mulf %238, %242 : vector<2x16x128xf32>
    %244 = arith.addf %237, %243 : vector<2x16x128xf32>
    %c0_146 = arith.constant 0 : index
    %c1_147 = arith.constant 1 : index
    %c0_148 = arith.constant 0 : index
    %245 = vector.load %arg3[%c0_146, %c1_147, %c0_148] : memref<2x18x128xf32, #tpu.memory_space<vmem>>, vector<2x16x128xf32>
    %c77 = arith.constant 77 : index
    %c0_149 = arith.constant 0 : index
    %246 = vector.load %arg4[%c77, %c0_149] : memref<108x128xf32, #tpu.memory_space<vmem>>, vector<1x128xf32>
    %247 = vector.shape_cast %246 : vector<1x128xf32> to vector<128xf32>
    %248 = vector.shape_cast %247 : vector<128xf32> to vector<1x1x128xf32>
    %249 = vector.broadcast %248 : vector<1x1x128xf32> to vector<2x16x128xf32>
    %250 = arith.mulf %245, %249 : vector<2x16x128xf32>
    %251 = arith.addf %244, %250 : vector<2x16x128xf32>
    %c0_150 = arith.constant 0 : index
    %c2_151 = arith.constant 2 : index
    %c0_152 = arith.constant 0 : index
    %252 = vector.load %arg1[%c0_150, %c2_151, %c0_152] : memref<2x18x128xf32, #tpu.memory_space<vmem>>, vector<2x16x128xf32>
    %c78 = arith.constant 78 : index
    %c0_153 = arith.constant 0 : index
    %253 = vector.load %arg4[%c78, %c0_153] : memref<108x128xf32, #tpu.memory_space<vmem>>, vector<1x128xf32>
    %254 = vector.shape_cast %253 : vector<1x128xf32> to vector<128xf32>
    %255 = vector.shape_cast %254 : vector<128xf32> to vector<1x1x128xf32>
    %256 = vector.broadcast %255 : vector<1x1x128xf32> to vector<2x16x128xf32>
    %257 = arith.mulf %252, %256 : vector<2x16x128xf32>
    %258 = arith.addf %251, %257 : vector<2x16x128xf32>
    %c0_154 = arith.constant 0 : index
    %c2_155 = arith.constant 2 : index
    %c0_156 = arith.constant 0 : index
    %259 = vector.load %arg2[%c0_154, %c2_155, %c0_156] : memref<2x18x128xf32, #tpu.memory_space<vmem>>, vector<2x16x128xf32>
    %c79 = arith.constant 79 : index
    %c0_157 = arith.constant 0 : index
    %260 = vector.load %arg4[%c79, %c0_157] : memref<108x128xf32, #tpu.memory_space<vmem>>, vector<1x128xf32>
    %261 = vector.shape_cast %260 : vector<1x128xf32> to vector<128xf32>
    %262 = vector.shape_cast %261 : vector<128xf32> to vector<1x1x128xf32>
    %263 = vector.broadcast %262 : vector<1x1x128xf32> to vector<2x16x128xf32>
    %264 = arith.mulf %259, %263 : vector<2x16x128xf32>
    %265 = arith.addf %258, %264 : vector<2x16x128xf32>
    %c0_158 = arith.constant 0 : index
    %c2_159 = arith.constant 2 : index
    %c0_160 = arith.constant 0 : index
    %266 = vector.load %arg3[%c0_158, %c2_159, %c0_160] : memref<2x18x128xf32, #tpu.memory_space<vmem>>, vector<2x16x128xf32>
    %c80 = arith.constant 80 : index
    %c0_161 = arith.constant 0 : index
    %267 = vector.load %arg4[%c80, %c0_161] : memref<108x128xf32, #tpu.memory_space<vmem>>, vector<1x128xf32>
    %268 = vector.shape_cast %267 : vector<1x128xf32> to vector<128xf32>
    %269 = vector.shape_cast %268 : vector<128xf32> to vector<1x1x128xf32>
    %270 = vector.broadcast %269 : vector<1x1x128xf32> to vector<2x16x128xf32>
    %271 = arith.mulf %266, %270 : vector<2x16x128xf32>
    %272 = arith.addf %265, %271 : vector<2x16x128xf32>
    %273 = vector.shape_cast %272 : vector<2x16x128xf32> to vector<32x128xf32>
    %c0_162 = arith.constant 0 : index
    %c0_163 = arith.constant 0 : index
    %274 = vector.load %arg11[%c0_162, %c0_163] : memref<128x128xf32, #tpu.memory_space<vmem>>, vector<32x128xf32>
    tpu.vector_store %arg11[%c0_162, %c0_163], %273 {strides = array<i32>} : memref<128x128xf32, #tpu.memory_space<vmem>>, vector<32x128xf32>,
    %c0_164 = arith.constant 0 : index
    %c0_165 = arith.constant 0 : index
    %c0_166 = arith.constant 0 : index
    %275 = vector.load %arg1[%c0_164, %c0_165, %c0_166] : memref<2x18x128xf32, #tpu.memory_space<vmem>>, vector<2x16x128xf32>
    %c81 = arith.constant 81 : index
    %c0_167 = arith.constant 0 : index
    %276 = vector.load %arg4[%c81, %c0_167] : memref<108x128xf32, #tpu.memory_space<vmem>>, vector<1x128xf32>
    %277 = vector.shape_cast %276 : vector<1x128xf32> to vector<128xf32>
    %278 = vector.shape_cast %277 : vector<128xf32> to vector<1x1x128xf32>
    %279 = vector.broadcast %278 : vector<1x1x128xf32> to vector<2x16x128xf32>
    %280 = arith.mulf %275, %279 : vector<2x16x128xf32>
    %c0_168 = arith.constant 0 : index
    %c0_169 = arith.constant 0 : index
    %c0_170 = arith.constant 0 : index
    %281 = vector.load %arg2[%c0_168, %c0_169, %c0_170] : memref<2x18x128xf32, #tpu.memory_space<vmem>>, vector<2x16x128xf32>
    %c82 = arith.constant 82 : index
    %c0_171 = arith.constant 0 : index
    %282 = vector.load %arg4[%c82, %c0_171] : memref<108x128xf32, #tpu.memory_space<vmem>>, vector<1x128xf32>
    %283 = vector.shape_cast %282 : vector<1x128xf32> to vector<128xf32>
    %284 = vector.shape_cast %283 : vector<128xf32> to vector<1x1x128xf32>
    %285 = vector.broadcast %284 : vector<1x1x128xf32> to vector<2x16x128xf32>
    %286 = arith.mulf %281, %285 : vector<2x16x128xf32>
    %287 = arith.addf %280, %286 : vector<2x16x128xf32>
    %c0_172 = arith.constant 0 : index
    %c0_173 = arith.constant 0 : index
    %c0_174 = arith.constant 0 : index
    %288 = vector.load %arg3[%c0_172, %c0_173, %c0_174] : memref<2x18x128xf32, #tpu.memory_space<vmem>>, vector<2x16x128xf32>
    %c83 = arith.constant 83 : index
    %c0_175 = arith.constant 0 : index
    %289 = vector.load %arg4[%c83, %c0_175] : memref<108x128xf32, #tpu.memory_space<vmem>>, vector<1x128xf32>
    %290 = vector.shape_cast %289 : vector<1x128xf32> to vector<128xf32>
    %291 = vector.shape_cast %290 : vector<128xf32> to vector<1x1x128xf32>
    %292 = vector.broadcast %291 : vector<1x1x128xf32> to vector<2x16x128xf32>
    %293 = arith.mulf %288, %292 : vector<2x16x128xf32>
    %294 = arith.addf %287, %293 : vector<2x16x128xf32>
    %c0_176 = arith.constant 0 : index
    %c1_177 = arith.constant 1 : index
    %c0_178 = arith.constant 0 : index
    %295 = vector.load %arg1[%c0_176, %c1_177, %c0_178] : memref<2x18x128xf32, #tpu.memory_space<vmem>>, vector<2x16x128xf32>
    %c84 = arith.constant 84 : index
    %c0_179 = arith.constant 0 : index
    %296 = vector.load %arg4[%c84, %c0_179] : memref<108x128xf32, #tpu.memory_space<vmem>>, vector<1x128xf32>
    %297 = vector.shape_cast %296 : vector<1x128xf32> to vector<128xf32>
    %298 = vector.shape_cast %297 : vector<128xf32> to vector<1x1x128xf32>
    %299 = vector.broadcast %298 : vector<1x1x128xf32> to vector<2x16x128xf32>
    %300 = arith.mulf %295, %299 : vector<2x16x128xf32>
    %301 = arith.addf %294, %300 : vector<2x16x128xf32>
    %c0_180 = arith.constant 0 : index
    %c1_181 = arith.constant 1 : index
    %c0_182 = arith.constant 0 : index
    %302 = vector.load %arg2[%c0_180, %c1_181, %c0_182] : memref<2x18x128xf32, #tpu.memory_space<vmem>>, vector<2x16x128xf32>
    %c85 = arith.constant 85 : index
    %c0_183 = arith.constant 0 : index
    %303 = vector.load %arg4[%c85, %c0_183] : memref<108x128xf32, #tpu.memory_space<vmem>>, vector<1x128xf32>
    %304 = vector.shape_cast %303 : vector<1x128xf32> to vector<128xf32>
    %305 = vector.shape_cast %304 : vector<128xf32> to vector<1x1x128xf32>
    %306 = vector.broadcast %305 : vector<1x1x128xf32> to vector<2x16x128xf32>
    %307 = arith.mulf %302, %306 : vector<2x16x128xf32>
    %308 = arith.addf %301, %307 : vector<2x16x128xf32>
    %c0_184 = arith.constant 0 : index
    %c1_185 = arith.constant 1 : index
    %c0_186 = arith.constant 0 : index
    %309 = vector.load %arg3[%c0_184, %c1_185, %c0_186] : memref<2x18x128xf32, #tpu.memory_space<vmem>>, vector<2x16x128xf32>
    %c86 = arith.constant 86 : index
    %c0_187 = arith.constant 0 : index
    %310 = vector.load %arg4[%c86, %c0_187] : memref<108x128xf32, #tpu.memory_space<vmem>>, vector<1x128xf32>
    %311 = vector.shape_cast %310 : vector<1x128xf32> to vector<128xf32>
    %312 = vector.shape_cast %311 : vector<128xf32> to vector<1x1x128xf32>
    %313 = vector.broadcast %312 : vector<1x1x128xf32> to vector<2x16x128xf32>
    %314 = arith.mulf %309, %313 : vector<2x16x128xf32>
    %315 = arith.addf %308, %314 : vector<2x16x128xf32>
    %c0_188 = arith.constant 0 : index
    %c2_189 = arith.constant 2 : index
    %c0_190 = arith.constant 0 : index
    %316 = vector.load %arg1[%c0_188, %c2_189, %c0_190] : memref<2x18x128xf32, #tpu.memory_space<vmem>>, vector<2x16x128xf32>
    %c87 = arith.constant 87 : index
    %c0_191 = arith.constant 0 : index
    %317 = vector.load %arg4[%c87, %c0_191] : memref<108x128xf32, #tpu.memory_space<vmem>>, vector<1x128xf32>
    %318 = vector.shape_cast %317 : vector<1x128xf32> to vector<128xf32>
    %319 = vector.shape_cast %318 : vector<128xf32> to vector<1x1x128xf32>
    %320 = vector.broadcast %319 : vector<1x1x128xf32> to vector<2x16x128xf32>
    %321 = arith.mulf %316, %320 : vector<2x16x128xf32>
    %322 = arith.addf %315, %321 : vector<2x16x128xf32>
    %c0_192 = arith.constant 0 : index
    %c2_193 = arith.constant 2 : index
    %c0_194 = arith.constant 0 : index
    %323 = vector.load %arg2[%c0_192, %c2_193, %c0_194] : memref<2x18x128xf32, #tpu.memory_space<vmem>>, vector<2x16x128xf32>
    %c88 = arith.constant 88 : index
    %c0_195 = arith.constant 0 : index
    %324 = vector.load %arg4[%c88, %c0_195] : memref<108x128xf32, #tpu.memory_space<vmem>>, vector<1x128xf32>
    %325 = vector.shape_cast %324 : vector<1x128xf32> to vector<128xf32>
    %326 = vector.shape_cast %325 : vector<128xf32> to vector<1x1x128xf32>
    %327 = vector.broadcast %326 : vector<1x1x128xf32> to vector<2x16x128xf32>
    %328 = arith.mulf %323, %327 : vector<2x16x128xf32>
    %329 = arith.addf %322, %328 : vector<2x16x128xf32>
    %c0_196 = arith.constant 0 : index
    %c2_197 = arith.constant 2 : index
    %c0_198 = arith.constant 0 : index
    %330 = vector.load %arg3[%c0_196, %c2_197, %c0_198] : memref<2x18x128xf32, #tpu.memory_space<vmem>>, vector<2x16x128xf32>
    %c89 = arith.constant 89 : index
    %c0_199 = arith.constant 0 : index
    %331 = vector.load %arg4[%c89, %c0_199] : memref<108x128xf32, #tpu.memory_space<vmem>>, vector<1x128xf32>
    %332 = vector.shape_cast %331 : vector<1x128xf32> to vector<128xf32>
    %333 = vector.shape_cast %332 : vector<128xf32> to vector<1x1x128xf32>
    %334 = vector.broadcast %333 : vector<1x1x128xf32> to vector<2x16x128xf32>
    %335 = arith.mulf %330, %334 : vector<2x16x128xf32>
    %336 = arith.addf %329, %335 : vector<2x16x128xf32>
    %337 = vector.shape_cast %336 : vector<2x16x128xf32> to vector<32x128xf32>
    %c32_200 = arith.constant 32 : index
    %c0_201 = arith.constant 0 : index
    %338 = vector.load %arg11[%c32_200, %c0_201] : memref<128x128xf32, #tpu.memory_space<vmem>>, vector<32x128xf32>
    tpu.vector_store %arg11[%c32_200, %c0_201], %337 {strides = array<i32>} : memref<128x128xf32, #tpu.memory_space<vmem>>, vector<32x128xf32>,
    %c0_202 = arith.constant 0 : index
    %c0_203 = arith.constant 0 : index
    %c0_204 = arith.constant 0 : index
    %339 = vector.load %arg1[%c0_202, %c0_203, %c0_204] : memref<2x18x128xf32, #tpu.memory_space<vmem>>, vector<2x16x128xf32>
    %c90 = arith.constant 90 : index
    %c0_205 = arith.constant 0 : index
    %340 = vector.load %arg4[%c90, %c0_205] : memref<108x128xf32, #tpu.memory_space<vmem>>, vector<1x128xf32>
    %341 = vector.shape_cast %340 : vector<1x128xf32> to vector<128xf32>
    %342 = vector.shape_cast %341 : vector<128xf32> to vector<1x1x128xf32>
    %343 = vector.broadcast %342 : vector<1x1x128xf32> to vector<2x16x128xf32>
    %344 = arith.mulf %339, %343 : vector<2x16x128xf32>
    %c0_206 = arith.constant 0 : index
    %c0_207 = arith.constant 0 : index
    %c0_208 = arith.constant 0 : index
    %345 = vector.load %arg2[%c0_206, %c0_207, %c0_208] : memref<2x18x128xf32, #tpu.memory_space<vmem>>, vector<2x16x128xf32>
    %c91 = arith.constant 91 : index
    %c0_209 = arith.constant 0 : index
    %346 = vector.load %arg4[%c91, %c0_209] : memref<108x128xf32, #tpu.memory_space<vmem>>, vector<1x128xf32>
    %347 = vector.shape_cast %346 : vector<1x128xf32> to vector<128xf32>
    %348 = vector.shape_cast %347 : vector<128xf32> to vector<1x1x128xf32>
    %349 = vector.broadcast %348 : vector<1x1x128xf32> to vector<2x16x128xf32>
    %350 = arith.mulf %345, %349 : vector<2x16x128xf32>
    %351 = arith.addf %344, %350 : vector<2x16x128xf32>
    %c0_210 = arith.constant 0 : index
    %c0_211 = arith.constant 0 : index
    %c0_212 = arith.constant 0 : index
    %352 = vector.load %arg3[%c0_210, %c0_211, %c0_212] : memref<2x18x128xf32, #tpu.memory_space<vmem>>, vector<2x16x128xf32>
    %c92 = arith.constant 92 : index
    %c0_213 = arith.constant 0 : index
    %353 = vector.load %arg4[%c92, %c0_213] : memref<108x128xf32, #tpu.memory_space<vmem>>, vector<1x128xf32>
    %354 = vector.shape_cast %353 : vector<1x128xf32> to vector<128xf32>
    %355 = vector.shape_cast %354 : vector<128xf32> to vector<1x1x128xf32>
    %356 = vector.broadcast %355 : vector<1x1x128xf32> to vector<2x16x128xf32>
    %357 = arith.mulf %352, %356 : vector<2x16x128xf32>
    %358 = arith.addf %351, %357 : vector<2x16x128xf32>
    %c0_214 = arith.constant 0 : index
    %c1_215 = arith.constant 1 : index
    %c0_216 = arith.constant 0 : index
    %359 = vector.load %arg1[%c0_214, %c1_215, %c0_216] : memref<2x18x128xf32, #tpu.memory_space<vmem>>, vector<2x16x128xf32>
    %c93 = arith.constant 93 : index
    %c0_217 = arith.constant 0 : index
    %360 = vector.load %arg4[%c93, %c0_217] : memref<108x128xf32, #tpu.memory_space<vmem>>, vector<1x128xf32>
    %361 = vector.shape_cast %360 : vector<1x128xf32> to vector<128xf32>
    %362 = vector.shape_cast %361 : vector<128xf32> to vector<1x1x128xf32>
    %363 = vector.broadcast %362 : vector<1x1x128xf32> to vector<2x16x128xf32>
    %364 = arith.mulf %359, %363 : vector<2x16x128xf32>
    %365 = arith.addf %358, %364 : vector<2x16x128xf32>
    %c0_218 = arith.constant 0 : index
    %c1_219 = arith.constant 1 : index
    %c0_220 = arith.constant 0 : index
    %366 = vector.load %arg2[%c0_218, %c1_219, %c0_220] : memref<2x18x128xf32, #tpu.memory_space<vmem>>, vector<2x16x128xf32>
    %c94 = arith.constant 94 : index
    %c0_221 = arith.constant 0 : index
    %367 = vector.load %arg4[%c94, %c0_221] : memref<108x128xf32, #tpu.memory_space<vmem>>, vector<1x128xf32>
    %368 = vector.shape_cast %367 : vector<1x128xf32> to vector<128xf32>
    %369 = vector.shape_cast %368 : vector<128xf32> to vector<1x1x128xf32>
    %370 = vector.broadcast %369 : vector<1x1x128xf32> to vector<2x16x128xf32>
    %371 = arith.mulf %366, %370 : vector<2x16x128xf32>
    %372 = arith.addf %365, %371 : vector<2x16x128xf32>
    %c0_222 = arith.constant 0 : index
    %c1_223 = arith.constant 1 : index
    %c0_224 = arith.constant 0 : index
    %373 = vector.load %arg3[%c0_222, %c1_223, %c0_224] : memref<2x18x128xf32, #tpu.memory_space<vmem>>, vector<2x16x128xf32>
    %c95 = arith.constant 95 : index
    %c0_225 = arith.constant 0 : index
    %374 = vector.load %arg4[%c95, %c0_225] : memref<108x128xf32, #tpu.memory_space<vmem>>, vector<1x128xf32>
    %375 = vector.shape_cast %374 : vector<1x128xf32> to vector<128xf32>
    %376 = vector.shape_cast %375 : vector<128xf32> to vector<1x1x128xf32>
    %377 = vector.broadcast %376 : vector<1x1x128xf32> to vector<2x16x128xf32>
    %378 = arith.mulf %373, %377 : vector<2x16x128xf32>
    %379 = arith.addf %372, %378 : vector<2x16x128xf32>
    %c0_226 = arith.constant 0 : index
    %c2_227 = arith.constant 2 : index
    %c0_228 = arith.constant 0 : index
    %380 = vector.load %arg1[%c0_226, %c2_227, %c0_228] : memref<2x18x128xf32, #tpu.memory_space<vmem>>, vector<2x16x128xf32>
    %c96_229 = arith.constant 96 : index
    %c0_230 = arith.constant 0 : index
    %381 = vector.load %arg4[%c96_229, %c0_230] : memref<108x128xf32, #tpu.memory_space<vmem>>, vector<1x128xf32>
    %382 = vector.shape_cast %381 : vector<1x128xf32> to vector<128xf32>
    %383 = vector.shape_cast %382 : vector<128xf32> to vector<1x1x128xf32>
    %384 = vector.broadcast %383 : vector<1x1x128xf32> to vector<2x16x128xf32>
    %385 = arith.mulf %380, %384 : vector<2x16x128xf32>
    %386 = arith.addf %379, %385 : vector<2x16x128xf32>
    %c0_231 = arith.constant 0 : index
    %c2_232 = arith.constant 2 : index
    %c0_233 = arith.constant 0 : index
    %387 = vector.load %arg2[%c0_231, %c2_232, %c0_233] : memref<2x18x128xf32, #tpu.memory_space<vmem>>, vector<2x16x128xf32>
    %c97 = arith.constant 97 : index
    %c0_234 = arith.constant 0 : index
    %388 = vector.load %arg4[%c97, %c0_234] : memref<108x128xf32, #tpu.memory_space<vmem>>, vector<1x128xf32>
    %389 = vector.shape_cast %388 : vector<1x128xf32> to vector<128xf32>
    %390 = vector.shape_cast %389 : vector<128xf32> to vector<1x1x128xf32>
    %391 = vector.broadcast %390 : vector<1x1x128xf32> to vector<2x16x128xf32>
    %392 = arith.mulf %387, %391 : vector<2x16x128xf32>
    %393 = arith.addf %386, %392 : vector<2x16x128xf32>
    %c0_235 = arith.constant 0 : index
    %c2_236 = arith.constant 2 : index
    %c0_237 = arith.constant 0 : index
    %394 = vector.load %arg3[%c0_235, %c2_236, %c0_237] : memref<2x18x128xf32, #tpu.memory_space<vmem>>, vector<2x16x128xf32>
    %c98 = arith.constant 98 : index
    %c0_238 = arith.constant 0 : index
    %395 = vector.load %arg4[%c98, %c0_238] : memref<108x128xf32, #tpu.memory_space<vmem>>, vector<1x128xf32>
    %396 = vector.shape_cast %395 : vector<1x128xf32> to vector<128xf32>
    %397 = vector.shape_cast %396 : vector<128xf32> to vector<1x1x128xf32>
    %398 = vector.broadcast %397 : vector<1x1x128xf32> to vector<2x16x128xf32>
    %399 = arith.mulf %394, %398 : vector<2x16x128xf32>
    %400 = arith.addf %393, %399 : vector<2x16x128xf32>
    %401 = vector.shape_cast %400 : vector<2x16x128xf32> to vector<32x128xf32>
    %c64_239 = arith.constant 64 : index
    %c0_240 = arith.constant 0 : index
    %402 = vector.load %arg11[%c64_239, %c0_240] : memref<128x128xf32, #tpu.memory_space<vmem>>, vector<32x128xf32>
    tpu.vector_store %arg11[%c64_239, %c0_240], %401 {strides = array<i32>} : memref<128x128xf32, #tpu.memory_space<vmem>>, vector<32x128xf32>,
    %c0_241 = arith.constant 0 : index
    %c0_242 = arith.constant 0 : index
    %c0_243 = arith.constant 0 : index
    %403 = vector.load %arg1[%c0_241, %c0_242, %c0_243] : memref<2x18x128xf32, #tpu.memory_space<vmem>>, vector<2x16x128xf32>
    %c99 = arith.constant 99 : index
    %c0_244 = arith.constant 0 : index
    %404 = vector.load %arg4[%c99, %c0_244] : memref<108x128xf32, #tpu.memory_space<vmem>>, vector<1x128xf32>
    %405 = vector.shape_cast %404 : vector<1x128xf32> to vector<128xf32>
    %406 = vector.shape_cast %405 : vector<128xf32> to vector<1x1x128xf32>
    %407 = vector.broadcast %406 : vector<1x1x128xf32> to vector<2x16x128xf32>
    %408 = arith.mulf %403, %407 : vector<2x16x128xf32>
    %c0_245 = arith.constant 0 : index
    %c0_246 = arith.constant 0 : index
    %c0_247 = arith.constant 0 : index
    %409 = vector.load %arg2[%c0_245, %c0_246, %c0_247] : memref<2x18x128xf32, #tpu.memory_space<vmem>>, vector<2x16x128xf32>
    %c100 = arith.constant 100 : index
    %c0_248 = arith.constant 0 : index
    %410 = vector.load %arg4[%c100, %c0_248] : memref<108x128xf32, #tpu.memory_space<vmem>>, vector<1x128xf32>
    %411 = vector.shape_cast %410 : vector<1x128xf32> to vector<128xf32>
    %412 = vector.shape_cast %411 : vector<128xf32> to vector<1x1x128xf32>
    %413 = vector.broadcast %412 : vector<1x1x128xf32> to vector<2x16x128xf32>
    %414 = arith.mulf %409, %413 : vector<2x16x128xf32>
    %415 = arith.addf %408, %414 : vector<2x16x128xf32>
    %c0_249 = arith.constant 0 : index
    %c0_250 = arith.constant 0 : index
    %c0_251 = arith.constant 0 : index
    %416 = vector.load %arg3[%c0_249, %c0_250, %c0_251] : memref<2x18x128xf32, #tpu.memory_space<vmem>>, vector<2x16x128xf32>
    %c101 = arith.constant 101 : index
    %c0_252 = arith.constant 0 : index
    %417 = vector.load %arg4[%c101, %c0_252] : memref<108x128xf32, #tpu.memory_space<vmem>>, vector<1x128xf32>
    %418 = vector.shape_cast %417 : vector<1x128xf32> to vector<128xf32>
    %419 = vector.shape_cast %418 : vector<128xf32> to vector<1x1x128xf32>
    %420 = vector.broadcast %419 : vector<1x1x128xf32> to vector<2x16x128xf32>
    %421 = arith.mulf %416, %420 : vector<2x16x128xf32>
    %422 = arith.addf %415, %421 : vector<2x16x128xf32>
    %c0_253 = arith.constant 0 : index
    %c1_254 = arith.constant 1 : index
    %c0_255 = arith.constant 0 : index
    %423 = vector.load %arg1[%c0_253, %c1_254, %c0_255] : memref<2x18x128xf32, #tpu.memory_space<vmem>>, vector<2x16x128xf32>
    %c102 = arith.constant 102 : index
    %c0_256 = arith.constant 0 : index
    %424 = vector.load %arg4[%c102, %c0_256] : memref<108x128xf32, #tpu.memory_space<vmem>>, vector<1x128xf32>
    %425 = vector.shape_cast %424 : vector<1x128xf32> to vector<128xf32>
    %426 = vector.shape_cast %425 : vector<128xf32> to vector<1x1x128xf32>
    %427 = vector.broadcast %426 : vector<1x1x128xf32> to vector<2x16x128xf32>
    %428 = arith.mulf %423, %427 : vector<2x16x128xf32>
    %429 = arith.addf %422, %428 : vector<2x16x128xf32>
    %c0_257 = arith.constant 0 : index
    %c1_258 = arith.constant 1 : index
    %c0_259 = arith.constant 0 : index
    %430 = vector.load %arg2[%c0_257, %c1_258, %c0_259] : memref<2x18x128xf32, #tpu.memory_space<vmem>>, vector<2x16x128xf32>
    %c103 = arith.constant 103 : index
    %c0_260 = arith.constant 0 : index
    %431 = vector.load %arg4[%c103, %c0_260] : memref<108x128xf32, #tpu.memory_space<vmem>>, vector<1x128xf32>
    %432 = vector.shape_cast %431 : vector<1x128xf32> to vector<128xf32>
    %433 = vector.shape_cast %432 : vector<128xf32> to vector<1x1x128xf32>
    %434 = vector.broadcast %433 : vector<1x1x128xf32> to vector<2x16x128xf32>
    %435 = arith.mulf %430, %434 : vector<2x16x128xf32>
    %436 = arith.addf %429, %435 : vector<2x16x128xf32>
    %c0_261 = arith.constant 0 : index
    %c1_262 = arith.constant 1 : index
    %c0_263 = arith.constant 0 : index
    %437 = vector.load %arg3[%c0_261, %c1_262, %c0_263] : memref<2x18x128xf32, #tpu.memory_space<vmem>>, vector<2x16x128xf32>
    %c104 = arith.constant 104 : index
    %c0_264 = arith.constant 0 : index
    %438 = vector.load %arg4[%c104, %c0_264] : memref<108x128xf32, #tpu.memory_space<vmem>>, vector<1x128xf32>
    %439 = vector.shape_cast %438 : vector<1x128xf32> to vector<128xf32>
    %440 = vector.shape_cast %439 : vector<128xf32> to vector<1x1x128xf32>
    %441 = vector.broadcast %440 : vector<1x1x128xf32> to vector<2x16x128xf32>
    %442 = arith.mulf %437, %441 : vector<2x16x128xf32>
    %443 = arith.addf %436, %442 : vector<2x16x128xf32>
    %c0_265 = arith.constant 0 : index
    %c2_266 = arith.constant 2 : index
    %c0_267 = arith.constant 0 : index
    %444 = vector.load %arg1[%c0_265, %c2_266, %c0_267] : memref<2x18x128xf32, #tpu.memory_space<vmem>>, vector<2x16x128xf32>
    %c105 = arith.constant 105 : index
    %c0_268 = arith.constant 0 : index
    %445 = vector.load %arg4[%c105, %c0_268] : memref<108x128xf32, #tpu.memory_space<vmem>>, vector<1x128xf32>
    %446 = vector.shape_cast %445 : vector<1x128xf32> to vector<128xf32>
    %447 = vector.shape_cast %446 : vector<128xf32> to vector<1x1x128xf32>
    %448 = vector.broadcast %447 : vector<1x1x128xf32> to vector<2x16x128xf32>
    %449 = arith.mulf %444, %448 : vector<2x16x128xf32>
    %450 = arith.addf %443, %449 : vector<2x16x128xf32>
    %c0_269 = arith.constant 0 : index
    %c2_270 = arith.constant 2 : index
    %c0_271 = arith.constant 0 : index
    %451 = vector.load %arg2[%c0_269, %c2_270, %c0_271] : memref<2x18x128xf32, #tpu.memory_space<vmem>>, vector<2x16x128xf32>
    %c106 = arith.constant 106 : index
    %c0_272 = arith.constant 0 : index
    %452 = vector.load %arg4[%c106, %c0_272] : memref<108x128xf32, #tpu.memory_space<vmem>>, vector<1x128xf32>
    %453 = vector.shape_cast %452 : vector<1x128xf32> to vector<128xf32>
    %454 = vector.shape_cast %453 : vector<128xf32> to vector<1x1x128xf32>
    %455 = vector.broadcast %454 : vector<1x1x128xf32> to vector<2x16x128xf32>
    %456 = arith.mulf %451, %455 : vector<2x16x128xf32>
    %457 = arith.addf %450, %456 : vector<2x16x128xf32>
    %c0_273 = arith.constant 0 : index
    %c2_274 = arith.constant 2 : index
    %c0_275 = arith.constant 0 : index
    %458 = vector.load %arg3[%c0_273, %c2_274, %c0_275] : memref<2x18x128xf32, #tpu.memory_space<vmem>>, vector<2x16x128xf32>
    %c107 = arith.constant 107 : index
    %c0_276 = arith.constant 0 : index
    %459 = vector.load %arg4[%c107, %c0_276] : memref<108x128xf32, #tpu.memory_space<vmem>>, vector<1x128xf32>
    %460 = vector.shape_cast %459 : vector<1x128xf32> to vector<128xf32>
    %461 = vector.shape_cast %460 : vector<128xf32> to vector<1x1x128xf32>
    %462 = vector.broadcast %461 : vector<1x1x128xf32> to vector<2x16x128xf32>
    %463 = arith.mulf %458, %462 : vector<2x16x128xf32>
    %464 = arith.addf %457, %463 : vector<2x16x128xf32>
    %465 = vector.shape_cast %464 : vector<2x16x128xf32> to vector<32x128xf32>
    %c96_277 = arith.constant 96 : index
    %c0_278 = arith.constant 0 : index
    %466 = vector.load %arg11[%c96_277, %c0_278] : memref<128x128xf32, #tpu.memory_space<vmem>>, vector<32x128xf32>
    tpu.vector_store %arg11[%c96_277, %c0_278], %465 {strides = array<i32>} : memref<128x128xf32, #tpu.memory_space<vmem>>, vector<32x128xf32>,
    %c0_279 = arith.constant 0 : index
    %c0_280 = arith.constant 0 : index
    %467 = vector.load %arg11[%c0_279, %c0_280] : memref<128x128xf32, #tpu.memory_space<vmem>>, vector<128x128xf32>
    %cst_281 = arith.constant dense<0.000000e+00> : vector<1x128xf32>
    %468 = tpu.matmul %0, %467, %cst_281 {dimension_numbers = #tpu.dot_dimension_numbers<[1], [0], [0], [1], [0, 0, 1, 1], [], []>} : vector<1x128xf32>, vector<128x128xf32>, vector<1x128xf32> -> vector<1x128xf32>
    %469 = arith.mulf %467, %467 : vector<128x128xf32>
    %cst_282 = arith.constant dense<0.000000e+00> : vector<1x128xf32>
    %470 = tpu.matmul %0, %469, %cst_282 {dimension_numbers = #tpu.dot_dimension_numbers<[1], [0], [0], [1], [0, 0, 1, 1], [], []>} : vector<1x128xf32>, vector<128x128xf32>, vector<1x128xf32> -> vector<1x128xf32>
    %471 = tpu.concatenate %468, %470 in 0 : vector<1x128xf32>, vector<1x128xf32> -> vector<2x128xf32>
    %c0_283 = arith.constant 0 : index
    %c0_284 = arith.constant 0 : index
    %472 = vector.load %arg7[%c0_283, %c0_284] : memref<128x128xf32, #tpu.memory_space<vmem>>, vector<128x128xf32>
    %cst_285 = arith.constant dense<0.000000e+00> : vector<2x128xf32>
    %473 = tpu.matmul %471, %472, %cst_285 {dimension_numbers = #tpu.dot_dimension_numbers<[1], [0], [0], [1], [0, 0, 1, 1], [], []>} : vector<2x128xf32>, vector<128x128xf32>, vector<2x128xf32> -> vector<2x128xf32>
    %474 = vector.extract_strided_slice %473 {offsets = [0, 0], sizes = [1, 128], strides = [1, 1]} : vector<2x128xf32> to vector<1x128xf32>
    %cst_286 = arith.constant 4.8828125E-4 : f32
    %475 = vector.broadcast %cst_286 : f32 to vector<1x128xf32>
    %476 = arith.mulf %474, %475 : vector<1x128xf32>
    %477 = vector.extract_strided_slice %473 {offsets = [1, 0], sizes = [1, 128], strides = [1, 1]} : vector<2x128xf32> to vector<1x128xf32>
    %cst_287 = arith.constant 4.8828125E-4 : f32
    %478 = vector.broadcast %cst_287 : f32 to vector<1x128xf32>
    %479 = arith.mulf %477, %478 : vector<1x128xf32>
    %480 = arith.mulf %476, %476 : vector<1x128xf32>
    %481 = arith.subf %479, %480 : vector<1x128xf32>
    %c2_288 = arith.constant 2 : index
    %c0_289 = arith.constant 0 : index
    %482 = vector.load %arg5[%c2_288, %c0_289] : memref<3x128xf32, #tpu.memory_space<vmem>>, vector<1x128xf32>
    %cst_290 = arith.constant 9.99999974E-6 : f32
    %483 = vector.broadcast %cst_290 : f32 to vector<1x128xf32>
    %484 = arith.addf %481, %483 : vector<1x128xf32>
    %485 = math.rsqrt %484 : vector<1x128xf32>
    %486 = arith.mulf %482, %485 : vector<1x128xf32>
    %c2_291 = arith.constant 2 : index
    %c0_292 = arith.constant 0 : index
    %487 = vector.load %arg6[%c2_291, %c0_292] : memref<3x128xf32, #tpu.memory_space<vmem>>, vector<1x128xf32>
    %488 = arith.mulf %476, %486 : vector<1x128xf32>
    %489 = arith.subf %487, %488 : vector<1x128xf32>
    %490 = vector.broadcast %486 : vector<1x128xf32> to vector<128x128xf32>
    %491 = arith.mulf %467, %490 : vector<128x128xf32>
    %492 = vector.broadcast %489 : vector<1x128xf32> to vector<128x128xf32>
    %493 = arith.addf %491, %492 : vector<128x128xf32>
    %cst_293 = arith.constant 0.000000e+00 : f32
    %494 = vector.broadcast %cst_293 : f32 to vector<128x128xf32>
    %495 = arith.maximumf %493, %494 : vector<128x128xf32>
    %c0_294 = arith.constant 0 : index
    %c0_295 = arith.constant 0 : index
    %496 = vector.load %arg12[%c0_294, %c0_295] : memref<128x128xf32, #tpu.memory_space<vmem>>, vector<128x128xf32>
    %497 = arith.mulf %496, %495 : vector<128x128xf32>
    %c0_296 = arith.constant 0 : index
    %c0_297 = arith.constant 0 : index
    %498 = vector.load %arg12[%c0_296, %c0_297] : memref<128x128xf32, #tpu.memory_space<vmem>>, vector<128x128xf32>
    tpu.vector_store %arg12[%c0_296, %c0_297], %497 {strides = array<i32>} : memref<128x128xf32, #tpu.memory_space<vmem>>, vector<128x128xf32>,
    %c0_298 = arith.constant 0 : index
    %c0_299 = arith.constant 0 : index
    %499 = vector.load %arg12[%c0_298, %c0_299] : memref<128x128xf32, #tpu.memory_space<vmem>>, vector<128x128xf32>
    %c0_300 = arith.constant 0 : index
    %c0_301 = arith.constant 0 : index
    %500 = vector.load %arg8[%c0_300, %c0_301] : memref<128x256xf32, #tpu.memory_space<vmem>>, vector<128x256xf32>
    %cst_302 = arith.constant dense<0.000000e+00> : vector<128x256xf32>
    %501 = tpu.matmul %499, %500, %cst_302 {dimension_numbers = #tpu.dot_dimension_numbers<[1], [0], [0], [1], [0, 0, 1, 1], [], []>} : vector<128x128xf32>, vector<128x256xf32>, vector<128x256xf32> -> vector<128x256xf32>
    %c0_303 = arith.constant 0 : index
    %c0_304 = arith.constant 0 : index
    %502 = vector.load %arg9[%c0_303, %c0_304] : memref<1x256xf32, #tpu.memory_space<vmem>>, vector<1x256xf32>
    %503 = vector.broadcast %502 : vector<1x256xf32> to vector<128x256xf32>
    %504 = arith.addf %501, %503 : vector<128x256xf32>
    %c0_305 = arith.constant 0 : index
    %c0_306 = arith.constant 0 : index
    %505 = vector.load %arg10[%c0_305, %c0_306] : memref<128x256xf32, #tpu.memory_space<vmem>>, vector<128x256xf32>
    tpu.vector_store %arg10[%c0_305, %c0_306], %504 {strides = array<i32>} : memref<128x256xf32, #tpu.memory_space<vmem>>, vector<128x256xf32>,
    return
  }
  func.func @transform_0(%arg0: i32) -> (i32, i32, i32) {
    %c0_i32 = arith.constant 0 : i32
    %c0_i32_0 = arith.constant 0 : i32
    %c0_i32_1 = arith.constant 0 : i32
    %c0_i32_2 = arith.constant 0 : i32
    return %c0_i32, %c0_i32_0, %c0_i32_1 : i32, i32, i32
  }
  func.func @transform_1(%arg0: i32) -> (i32, i32, i32) {
    %c0_i32 = arith.constant 0 : i32
    %c0_i32_0 = arith.constant 0 : i32
    %c0_i32_1 = arith.constant 0 : i32
    %c0_i32_2 = arith.constant 0 : i32
    return %c0_i32, %c0_i32_0, %c0_i32_1 : i32, i32, i32
  }
  func.func @transform_2(%arg0: i32) -> (i32, i32, i32) {
    %c0_i32 = arith.constant 0 : i32
    %c0_i32_0 = arith.constant 0 : i32
    %c0_i32_1 = arith.constant 0 : i32
    %c0_i32_2 = arith.constant 0 : i32
    return %c0_i32, %c0_i32_0, %c0_i32_1 : i32, i32, i32
  }
  func.func @transform_3(%arg0: i32) -> (i32, i32) {
    %c0_i32 = arith.constant 0 : i32
    %c0_i32_0 = arith.constant 0 : i32
    %c0_i32_1 = arith.constant 0 : i32
    return %c0_i32, %c0_i32_0 : i32, i32
  }
  func.func @transform_4(%arg0: i32) -> (i32, i32) {
    %c0_i32 = arith.constant 0 : i32
    %c0_i32_0 = arith.constant 0 : i32
    %c0_i32_1 = arith.constant 0 : i32
    return %c0_i32, %c0_i32_0 : i32, i32
  }
  func.func @transform_5(%arg0: i32) -> (i32, i32) {
    %c0_i32 = arith.constant 0 : i32
    %c0_i32_0 = arith.constant 0 : i32
    %c0_i32_1 = arith.constant 0 : i32
    return %c0_i32, %c0_i32_0 : i32, i32
  }
  func.func @transform_6(%arg0: i32) -> (i32, i32) {
    %c0_i32 = arith.constant 0 : i32
    %c0_i32_0 = arith.constant 0 : i32
    %c0_i32_1 = arith.constant 0 : i32
    return %c0_i32, %c0_i32_0 : i32, i32
  }
  func.func @transform_7(%arg0: i32) -> (i32, i32) {
    %c0_i32 = arith.constant 0 : i32
    %c0_i32_0 = arith.constant 0 : i32
    %c0_i32_1 = arith.constant 0 : i32
    return %c0_i32, %c0_i32_0 : i32, i32
  }
  func.func @transform_8(%arg0: i32) -> (i32, i32) {
    %c0_i32 = arith.constant 0 : i32
    %c0_i32_0 = arith.constant 0 : i32
    %c0_i32_1 = arith.constant 0 : i32
    return %c0_i32, %c0_i32_0 : i32, i32
  }
  func.func @transform_9(%arg0: i32) -> (i32, i32) {
    %c0_i32 = arith.constant 0 : i32
    %c0_i32_0 = arith.constant 0 : i32
    %c0_i32_1 = arith.constant 0 : i32
    return %c0_i32, %c0_i32_0 : i32, i32
  }
}

</mosaic_0001>

<bundles_post_ra>
// kernel: tile.144
= control target key start
LH: loop header
LB: loop body
LE: loop exit
PB: predicated region body
PF: predicated region fallthrough
CT: control target
= control target key end

     0   :  { %vm6_vm0 = vcmask 1042434   ;;  %s11_s6 = smov 3  ;;  %s33_s11 = smov 3  ;;  %vm8_vm1 = vcmask 64512   ;;  %vm19_vm2 = vcmask 1048512   ;;  %vm30_vm3 = vcmask 982912   ;;  %s369_s0 = inlined_call_operand.vmem [shape: f32[3,16,8], index: 0, kind: input, shape index: {}]   ;;  %s370_s1 = inlined_call_operand.vmem [shape: f32[3,128], index: 1, kind: output, shape index: {}]  }
   0x1   :  { %v185_v0 = vld [vmem:[%s369_s0 + $0x2d] sm:$0x4]   ;;  %v189_v2 = vld [vmem:[%s369_s0 + $0x2b] sm:$0x4]   ;;  %s22_s16 = smov 3  ;;  %s229_s19 = smov 120  }
   0x2   :  { %v184_v1 = vld [vmem:[%s369_s0 + $0xf] ss:$16 sm:%s11_s6]   ;;  %v188_v4 = vld [vmem:[%s369_s0 + $0xd] ss:$16 sm:%s33_s11]   ;;  %s44_s22 = smov 3  ;;  %s230_s25 = smov 104  }
   0x3   :  { %v16_v3 = vsel %vm6_vm0, %v185_v0, %v184_v1  ;;  %v187_v5 = vld [vmem:[%s369_s0 + $0x2c] sm:$0x4]   ;;  %v38_v6 = vsel %vm6_vm0, %v189_v2, %v188_v4  ;;  %v191_v8 = vld [vmem:[%s369_s0 + $0x2a] sm:$0x4]   ;;  %s55_s28 = smov 3  ;;  %s66_s4 = smov 3 }
   0x4   :  { %17 = vrot.lane.b32.xlu0 %v16_v3, %s229_s19  ;;  %v186_v7 = vld [vmem:[%s369_s0 + $0xe] ss:$16 sm:%s22_s16]   ;;  %39 = vrot.lane.b32.xlu1 %v38_v6, %s230_s25  ;;  %s77_s9 = smov 3  ;;  %s231_s10 = smov 112   ;;  %vm41_vm4 = vcmask 917312   ;;  %vm52_vm5 = vcmask 851712  }
   0x5   :  { %v27_v9 = vsel %vm6_vm0, %v187_v5, %v186_v7  ;;  %v190_v10 = vld [vmem:[%s369_s0 + $0xc] ss:$16 sm:%s44_s22]   ;;  %v192_v12 = vld [vmem:[%s369_s0 + $0xb] ss:$16 sm:%s55_s28]   ;;  %s88_s11 = smov 3  ;;  %s232_s12 = smov 96  }
   0x6   :  { %v49_v11 = vsel %vm6_vm0, %v191_v8, %v190_v10  ;;  %v193_v13 = vld [vmem:[%s369_s0 + $0x29] sm:$0x4]   ;;  %v194_v14 = vld [vmem:[%s369_s0 + $0xa] ss:$16 sm:%s66_s4]   ;;  %v197_v19 = vld [vmem:[%s369_s0 + $0x27] sm:$0x4]  }
   0x7   :  { %v195_v15 = vld [vmem:[%s369_s0 + $0x28] sm:$0x4]   ;;  %v60_v16 = vsel %vm6_vm0, %v193_v13, %v192_v12  ;;  %v196_v18 = vld [vmem:[%s369_s0 + $0x9] ss:$16 sm:%s77_s9]   ;;  %v199_v21 = vld [vmem:[%s369_s0 + $0x26] sm:$0x4]  }
   0x8   :  { %28 = vrot.lane.b32.xlu0 %v27_v9, %s231_s10  ;;  %50 = vrot.lane.b32.xlu1 %v49_v11, %s232_s12  ;;  %v71_v17 = vsel %vm6_vm0, %v195_v15, %v194_v14  ;;  %v198_v20 = vld [vmem:[%s369_s0 + $0x8] ss:$16 sm:%s88_s11]   ;;  %s99_s21 = smov 3  ;;  %s233_s22 = smov 88   ;;  %v82_v22 = vsel %vm6_vm0, %v197_v19, %v196_v18  ;;  %vm63_vm6 = vcmask 786112   ;;  %vm74_vm7 = vcmask 720512  }
   0x9   :  { %s110_s23 = smov 3  ;;  %s234_s24 = smov 80   ;;  %v93_v23 = vsel %vm6_vm0, %v199_v21, %v198_v20  ;;  %v200_v24 = vld [vmem:[%s369_s0 + $0x7] ss:$16 sm:%s99_s21]   ;;  %v203_v27 = vld [vmem:[%s369_s0 + $0x24] sm:$0x4]  }
   0xa   :  { %v201_v25 = vld [vmem:[%s369_s0 + $0x25] sm:$0x4]   ;;  %v202_v26 = vld [vmem:[%s369_s0 + $0x6] ss:$16 sm:%s110_s23]   ;;  %s121_s4 = smov 3  ;;  %s235_s5 = smov 72  }
   0xb   :  { %s132_s6 = smov 3  ;;  %s2_s7 = smov 3  ;;  %v183_v28 = vld [vmem:[%s369_s0 + $0x1e] sm:$0x4]   ;;  %v104_v29 = vsel %vm6_vm0, %v201_v25, %v200_v24  ;;  %v115_v31 = vsel %vm6_vm0, %v203_v27, %v202_v26  ;;  %v204_v32 = vld [vmem:[%s369_s0 + $0x5] ss:$16 sm:%s121_s4]  }
   0xc   :  { %61 = vrot.lane.b32.xlu0 %v60_v16, %s233_s22  ;;  %72 = vrot.lane.b32.xlu1 %v71_v17, %s234_s24  ;;  %s236_s10 = smov 64   ;;  %v3_v30 = vld [vmem:[%s369_s0] ss:$16 sm:%s2_s7]   ;;  %s143_s21 = smov 3  ;;  %vm85_vm8 = vcmask 654912   ;;  %vm96_vm9 = vcmask 589312  }
   0xd   :  { %v205_v33 = vld [vmem:[%s369_s0 + $0x23] sm:$0x4]   ;;  %v7_v34 = vsel %vm6_vm0, %v183_v28, %v3_v30  ;;  %v206_v35 = vld [vmem:[%s369_s0 + $0x4] ss:$16 sm:%s132_s6]   ;;  %s237_s22 = smov 56   ;;  %s154_s23 = smov 3 }
   0xe   :  { %v207_v36 = vld [vmem:[%s369_s0 + $0x22] sm:$0x4]   ;;  %9 = vst.msk [vmem:[#allocation0] sm:$0x7] %vm8_vm1, %v7_v34   ;;  %s238_s24 = smov 48   ;;  %v126_v37 = vsel %vm6_vm0, %v205_v33, %v204_v32  ;;  %s165_s4 = smov 3 }
   0xf   :  { %v137_v38 = vsel %vm6_vm0, %v207_v36, %v206_v35  ;;  %v208_v39 = vld [vmem:[%s369_s0 + $0x3] ss:$16 sm:%s143_s21]   ;;  %v210_v41 = vld [vmem:[%s369_s0 + $0x2] ss:$16 sm:%s154_s23]   ;;  %s240_s6 = smov 32   ;;  %s242_s11 = smov 16  }
  0x10   :  { %83 = vrot.lane.b32.xlu0 %v82_v22, %s235_s5  ;;  %94 = vrot.lane.b32.xlu1 %v93_v23, %s236_s10  ;;  %v209_v40 = vld [vmem:[%s369_s0 + $0x21] sm:$0x4]   ;;  %v211_v42 = vld [vmem:[%s369_s0 + $0x20] sm:$0x4]   ;;  %s239_s5 = smov 40   ;;  %s243_s12 = smov 8  }
  0x11   :  { %v148_v43 = vsel %vm6_vm0, %v209_v40, %v208_v39  ;;  %v159_v44 = vsel %vm6_vm0, %v211_v42, %v210_v41  ;;  %v212_v45 = vld [vmem:[%s369_s0 + $0x1] ss:$16 sm:%s165_s4]   ;;  %vm107_vm10 = vcmask 523712   ;;  %vm118_vm11 = vcmask 458112  }
  0x12   :  { %v213_v46 = vld [vmem:[%s369_s0 + $0x1f] sm:$0x4]   ;;  %s241_s0 = smov 24   ;;  %vm129_vm12 = vcmask 392512   ;;  %vm140_vm13 = vcmask 326912   ;;  %vm151_vm14 = vcmask 261312  }
  0x13   :  { %v170_v47 = vsel %vm6_vm0, %v213_v46, %v212_v45  ;;  %vm162_vm15 = vcmask 195712   ;;  %vm173_vm0 = vcmask 130112  }
  0x14   :  { %105 = vrot.lane.b32.xlu0 %v104_v29, %s237_s22  ;;  %116 = vrot.lane.b32.xlu1 %v115_v31, %s238_s24 }
  0x18   :  { %127 = vrot.lane.b32.xlu0 %v126_v37, %s239_s5  ;;  %138 = vrot.lane.b32.xlu1 %v137_v38, %s240_s6 }
  0x1c   :  { %149 = vrot.lane.b32.xlu0 %v148_v43, %s241_s0  ;;  %160 = vrot.lane.b32.xlu1 %v159_v44, %s242_s11 }
  0x20   :  { %171 = vrot.lane.b32.xlu0 %v170_v47, %s243_s12 }
  0x76   :  { %v18_v48 = vpop.permute.xlu0 %17   ;;  %v40_v49 = vpop.permute.xlu1 %39  }
  0x77   :  { %20 = vst.msk [vmem:[#allocation0] sm:$0x7] %vm19_vm2, %v18_v48  }
  0x7a   :  { %v29_v50 = vpop.permute.xlu0 %28   ;;  %v51_v51 = vpop.permute.xlu1 %50  }
  0x7b   :  { %31 = vst.msk [vmem:[#allocation0] sm:$0x7] %vm30_vm3, %v29_v50  }
  0x7c   :  { %42 = vst.msk [vmem:[#allocation0] sm:$0x7] %vm41_vm4, %v40_v49  }
  0x7d   :  { %53 = vst.msk [vmem:[#allocation0] sm:$0x7] %vm52_vm5, %v51_v51  }
  0x7e   :  { %v62_v52 = vpop.permute.xlu0 %61   ;;  %v73_v53 = vpop.permute.xlu1 %72  }
  0x7f   :  { %64 = vst.msk [vmem:[#allocation0] sm:$0x7] %vm63_vm6, %v62_v52  }
  0x80   :  { %75 = vst.msk [vmem:[#allocation0] sm:$0x7] %vm74_vm7, %v73_v53  }
  0x82   :  { %v84_v54 = vpop.permute.xlu0 %83   ;;  %v95_v55 = vpop.permute.xlu1 %94  }
  0x83   :  { %86 = vst.msk [vmem:[#allocation0] sm:$0x7] %vm85_vm8, %v84_v54  }
  0x84   :  { %97 = vst.msk [vmem:[#allocation0] sm:$0x7] %vm96_vm9, %v95_v55  }
  0x86   :  { %v106_v56 = vpop.permute.xlu0 %105   ;;  %v117_v57 = vpop.permute.xlu1 %116  }
  0x87   :  { %108 = vst.msk [vmem:[#allocation0] sm:$0x7] %vm107_vm10, %v106_v56  }
  0x88   :  { %119 = vst.msk [vmem:[#allocation0] sm:$0x7] %vm118_vm11, %v117_v57  }
  0x8a   :  { %v128_v58 = vpop.permute.xlu0 %127   ;;  %v139_v59 = vpop.permute.xlu1 %138  }
  0x8b   :  { %130 = vst.msk [vmem:[#allocation0] sm:$0x7] %vm129_vm12, %v128_v58  }
  0x8c   :  { %141 = vst.msk [vmem:[#allocation0] sm:$0x7] %vm140_vm13, %v139_v59  }
  0x8e   :  { %v150_v60 = vpop.permute.xlu0 %149   ;;  %v161_v61 = vpop.permute.xlu1 %160  }
  0x8f   :  { %152 = vst.msk [vmem:[#allocation0] sm:$0x7] %vm151_vm14, %v150_v60  }
  0x90   :  { %163 = vst.msk [vmem:[#allocation0] sm:$0x7] %vm162_vm15, %v161_v61  }
  0x92   :  { %v172_v62 = vpop.permute.xlu0 %171  }
  0x93   :  { %174 = vst.msk [vmem:[#allocation0] sm:$0x7] %vm173_vm0, %v172_v62  }
  0x9a   :  { %v179_v63 = vld [vmem:[#allocation0] sm:$0xf] }
  0x9b   :  { %182 = vst [vmem:[%s370_s1] sm:$0xf] %v179_v63 }

// kernel: tile.79
= control target key start
LH: loop header
LB: loop body
LE: loop exit
PB: predicated region body
PF: predicated region fallthrough
CT: control target
= control target key end

     0   :  { %vm6_vm0 = vcmask 1043458   ;;  %s53_s10 = smov 3  ;;  %s56_s11 = smov 12  ;;  %vm10_vm1 = vcmask 1045508   ;;  %vm14_vm2 = vcmask 1047558   ;;  %vm16_vm3 = vcmask 64512   ;;  %s978_s0 = inlined_call_operand.vmem [shape: f32[3,1,3,16,8], index: 0, kind: input, shape index: {}]   ;;  %s979_s1 = inlined_call_operand.vmem [shape: f32[9,128], index: 1, kind: output, shape index: {}]  }
   0x1   :  { %v470_v0 = vld [vmem:[%s978_s0 + $0x8e] sm:$0x1]   ;;  %v464_v1 = vld [vmem:[%s978_s0 + $0x8f] sm:$0x1]   ;;  %s565_s12 = smov 112   ;;  %s566_s13 = smov 120  }
   0x2   :  { %76 = vrot.lane.b32.xlu1 %v470_v0, %s565_s12  ;;  %47 = vrot.lane.b32.xlu0 %v464_v1, %s566_s13  ;;  %v466_v2 = vld [vmem:[%s978_s0 + $0xe] ss:$16 sm:%s53_s10]   ;;  %s61_s16 = smov 48  ;;  %s66_s17 = smov 192  ;;  %vm43_vm4 = vcmask 1048512   ;;  %vm72_vm5 = vcmask 982912  }
   0x3   :  { %v467_v3 = vld [vmem:[%s978_s0 + $0xe] ss:$16 sm:%s56_s11]   ;;  %s24_s22 = smov 3  ;;  %s27_s23 = smov 12  ;;  %v476_v15 = vld [vmem:[%s978_s0 + $0x8d] sm:$0x1]  }
   0x4   :  { %v468_v4 = vld [vmem:[%s978_s0 + $0xe] ss:$16 sm:%s61_s16]   ;;  %v59_v5 = vsel %vm6_vm0, %v467_v3, %v466_v2  ;;  %v460_v7 = vld [vmem:[%s978_s0 + $0xf] ss:$16 sm:%s24_s22]   ;;  %s32_s28 = smov 48  ;;  %s37_s29 = smov 192 }
   0x5   :  { %v469_v6 = vld [vmem:[%s978_s0 + $0xe] ss:$16 sm:%s66_s17]   ;;  %v64_v8 = vsel %vm10_vm1, %v468_v4, %v59_v5  ;;  %v461_v9 = vld [vmem:[%s978_s0 + $0xf] ss:$16 sm:%s27_s23]   ;;  %s82_s5 = smov 3  ;;  %s85_s8 = smov 12 }
   0x6   :  { %v462_v10 = vld [vmem:[%s978_s0 + $0xf] ss:$16 sm:%s32_s28]   ;;  %v69_v11 = vsel %vm14_vm2, %v469_v6, %v64_v8  ;;  %v30_v12 = vsel %vm6_vm0, %v461_v9, %v460_v7  ;;  %s90_s9 = smov 48  ;;  %v472_v16 = vld [vmem:[%s978_s0 + $0xd] ss:$16 sm:%s82_s5]   ;;  %s95_s15 = smov 192 }
   0x7   :  { %v463_v13 = vld [vmem:[%s978_s0 + $0xf] ss:$16 sm:%s37_s29]   ;;  %70 = vrot.lane.b32.xlu1 %v69_v11, %s565_s12  ;;  %v35_v14 = vsel %vm10_vm1, %v462_v10, %v30_v12  ;;  %s111_s20 = smov 3  ;;  %s114_s21 = smov 12  ;;  %v482_v26 = vld [vmem:[%s978_s0 + $0x8c] sm:$0x1]  }
   0x8   :  { %v40_v17 = vsel %vm14_vm2, %v463_v13, %v35_v14  ;;  %v473_v18 = vld [vmem:[%s978_s0 + $0xd] ss:$16 sm:%s85_s8]   ;;  %s119_s23 = smov 48  ;;  %s124_s24 = smov 192  ;;  %v478_v23 = vld [vmem:[%s978_s0 + $0xc] ss:$16 sm:%s111_s20]  }
   0x9   :  { %v474_v19 = vld [vmem:[%s978_s0 + $0xd] ss:$16 sm:%s90_s9]   ;;  %41 = vrot.lane.b32.xlu0 %v40_v17, %s566_s13  ;;  %v88_v20 = vsel %vm6_vm0, %v473_v18, %v472_v16  ;;  %s140_s29 = smov 3  ;;  %s567_s30 = smov 104   ;;  %v488_v37 = vld [vmem:[%s978_s0 + $0x8b] sm:$0x1]  }
   0xa   :  { %v475_v21 = vld [vmem:[%s978_s0 + $0xd] ss:$16 sm:%s95_s15]   ;;  %v93_v22 = vsel %vm10_vm1, %v474_v19, %v88_v20  ;;  %v479_v24 = vld [vmem:[%s978_s0 + $0xc] ss:$16 sm:%s114_s21]   ;;  %s143_s6 = smov 12  ;;  %s148_s7 = smov 48 }
   0xb   :  { %105 = vrot.lane.b32.xlu1 %v476_v15, %s567_s30  ;;  %v98_v25 = vsel %vm14_vm2, %v475_v21, %v93_v22  ;;  %v117_v27 = vsel %vm6_vm0, %v479_v24, %v478_v23  ;;  %v480_v28 = vld [vmem:[%s978_s0 + $0xc] ss:$16 sm:%s119_s23]   ;;  %s153_s12 = smov 192  ;;  %s169_s16 = smov 3  ;;  %v494_v46 = vld [vmem:[%s978_s0 + $0x8a] sm:$0x1]  }
   0xc   :  { %v122_v29 = vsel %vm10_vm1, %v480_v28, %v117_v27  ;;  %v481_v30 = vld [vmem:[%s978_s0 + $0xc] ss:$16 sm:%s124_s24]   ;;  %v484_v31 = vld [vmem:[%s978_s0 + $0xb] ss:$16 sm:%s140_s29]   ;;  %s172_s17 = smov 12  ;;  %s177_s13 = smov 48 }
   0xd   :  { %99 = vrot.lane.b32.xlu0 %v98_v25, %s567_s30  ;;  %v485_v32 = vld [vmem:[%s978_s0 + $0xb] ss:$16 sm:%s143_s6]   ;;  %v127_v33 = vsel %vm14_vm2, %v481_v30, %v122_v29  ;;  %s568_s22 = smov 96   ;;  %s198_s27 = smov 3  ;;  %v500_v54 = vld [vmem:[%s978_s0 + $0x89] sm:$0x1]  }
   0xe   :  { %v146_v34 = vsel %vm6_vm0, %v485_v32, %v484_v31  ;;  %v486_v35 = vld [vmem:[%s978_s0 + $0xb] ss:$16 sm:%s148_s7]   ;;  %v490_v39 = vld [vmem:[%s978_s0 + $0xa] ss:$16 sm:%s169_s16]   ;;  %s182_s3 = smov 192  ;;  %s201_s4 = smov 12 }
   0xf   :  { %v487_v36 = vld [vmem:[%s978_s0 + $0xb] ss:$16 sm:%s153_s12]   ;;  %134 = vrot.lane.b32.xlu1 %v482_v26, %s568_s22  ;;  %v151_v38 = vsel %vm10_vm1, %v486_v35, %v146_v34  ;;  %s206_s5 = smov 48  ;;  %s227_s10 = smov 3  ;;  %v506_v62 = vld [vmem:[%s978_s0 + $0x88] sm:$0x1]  }
  0x10   :  { %v491_v40 = vld [vmem:[%s978_s0 + $0xa] ss:$16 sm:%s172_s17]   ;;  %v156_v43 = vsel %vm14_vm2, %v487_v36, %v151_v38  ;;  %v496_v44 = vld [vmem:[%s978_s0 + $0x9] ss:$16 sm:%s198_s27]   ;;  %s230_s11 = smov 12  ;;  %s569_s12 = smov 88  }
  0x11   :  { %v492_v41 = vld [vmem:[%s978_s0 + $0xa] ss:$16 sm:%s177_s13]   ;;  %128 = vrot.lane.b32.xlu0 %v127_v33, %s568_s22  ;;  %v175_v42 = vsel %vm6_vm0, %v491_v40, %v490_v39  ;;  %s211_s20 = smov 192  ;;  %s235_s24 = smov 48  ;;  %v512_v6 = vld [vmem:[%s978_s0 + $0x87] sm:$0x1]  }
  0x12   :  { %v497_v45 = vld [vmem:[%s978_s0 + $0x9] ss:$16 sm:%s201_s4]   ;;  %v180_v47 = vsel %vm10_vm1, %v492_v41, %v175_v42  ;;  %v493_v48 = vld [vmem:[%s978_s0 + $0xa] ss:$16 sm:%s182_s3]   ;;  %s256_s25 = smov 3  ;;  %s259_s26 = smov 12 }
  0x13   :  { %163 = vrot.lane.b32.xlu1 %v488_v37, %s569_s12  ;;  %v204_v49 = vsel %vm6_vm0, %v497_v45, %v496_v44  ;;  %v498_v50 = vld [vmem:[%s978_s0 + $0x9] ss:$16 sm:%s206_s5]   ;;  %v185_v53 = vsel %vm14_vm2, %v493_v48, %v180_v47  ;;  %s570_s27 = smov 80   ;;  %s240_s5 = smov 192  ;;  %v458_v9 = vld [vmem:[%s978_s0 + $0x80] sm:$0x1]  }
  0x14   :  { %v502_v51 = vld [vmem:[%s978_s0 + $0x8] ss:$16 sm:%s227_s10]   ;;  %v209_v55 = vsel %vm10_vm1, %v498_v50, %v204_v49  ;;  %v499_v56 = vld [vmem:[%s978_s0 + $0x9] ss:$16 sm:%s211_s20]   ;;  %s264_s10 = smov 48  ;;  %s571_s14 = smov 72  }
  0x15   :  { %157 = vrot.lane.b32.xlu0 %v156_v43, %s569_s12  ;;  %v503_v52 = vld [vmem:[%s978_s0 + $0x8] ss:$16 sm:%s230_s11]   ;;  %s285_s11 = smov 3  ;;  %v214_v61 = vsel %vm14_vm2, %v499_v56, %v209_v55  ;;  %s288_s12 = smov 12  ;;  %459 = vst.msk [vmem:[%s979_s1 + $0x8] sm:$0x1] %vm16_vm3, %v458_v9  }
  0x16   :  { %v233_v57 = vsel %vm6_vm0, %v503_v52, %v502_v51  ;;  %v504_v58 = vld [vmem:[%s978_s0 + $0x8] ss:$16 sm:%s235_s24]   ;;  %v508_v59 = vld [vmem:[%s978_s0 + $0x7] ss:$16 sm:%s256_s25]   ;;  %s269_s21 = smov 192  ;;  %s293_s25 = smov 48 }
  0x17   :  { %192 = vrot.lane.b32.xlu1 %v494_v46, %s570_s27  ;;  %v509_v60 = vld [vmem:[%s978_s0 + $0x7] ss:$16 sm:%s259_s26]   ;;  %v238_v63 = vsel %vm10_vm1, %v504_v58, %v233_v57  ;;  %s314_s26 = smov 3  ;;  %s317_s29 = smov 12  ;;  %v518_v15 = vld [vmem:[%s978_s0 + $0x86] sm:$0x1]  }
  0x18   :  { %v505_v0 = vld [vmem:[%s978_s0 + $0x8] ss:$16 sm:%s240_s5]   ;;  %v262_v1 = vsel %vm6_vm0, %v509_v60, %v508_v59  ;;  %v510_v2 = vld [vmem:[%s978_s0 + $0x7] ss:$16 sm:%s264_s10]   ;;  %s572_s30 = smov 64   ;;  %s298_s8 = smov 192 }
  0x19   :  { %186 = vrot.lane.b32.xlu0 %v185_v53, %s570_s27  ;;  %v514_v3 = vld [vmem:[%s978_s0 + $0x6] ss:$16 sm:%s285_s11]   ;;  %v243_v5 = vsel %vm14_vm2, %v505_v0, %v238_v63  ;;  %v267_v7 = vsel %vm10_vm1, %v510_v2, %v262_v1  ;;  %s322_s16 = smov 48  ;;  %s343_s17 = smov 3  ;;  %v524_v23 = vld [vmem:[%s978_s0 + $0x85] sm:$0x1]  }
  0x1a   :  { %v515_v4 = vld [vmem:[%s978_s0 + $0x6] ss:$16 sm:%s288_s12]   ;;  %v511_v8 = vld [vmem:[%s978_s0 + $0x7] ss:$16 sm:%s269_s21]   ;;  %s346_s18 = smov 12  ;;  %s573_s19 = smov 56  }
  0x1b   :  { %221 = vrot.lane.b32.xlu1 %v500_v54, %s571_s14  ;;  %v291_v10 = vsel %vm6_vm0, %v515_v4, %v514_v3  ;;  %v516_v11 = vld [vmem:[%s978_s0 + $0x6] ss:$16 sm:%s293_s25]   ;;  %v272_v14 = vsel %vm14_vm2, %v511_v8, %v267_v7  ;;  %s327_s25 = smov 192  ;;  %s351_s28 = smov 48  ;;  %v530_v35 = vld [vmem:[%s978_s0 + $0x84] sm:$0x1]  }
  0x1c   :  { %v520_v12 = vld [vmem:[%s978_s0 + $0x5] ss:$16 sm:%s314_s26]   ;;  %v296_v16 = vsel %vm10_vm1, %v516_v11, %v291_v10  ;;  %v517_v17 = vld [vmem:[%s978_s0 + $0x6] ss:$16 sm:%s298_s8]   ;;  %s356_s2 = smov 192  ;;  %s372_s3 = smov 3 }
  0x1d   :  { %215 = vrot.lane.b32.xlu0 %v214_v61, %s571_s14  ;;  %v521_v13 = vld [vmem:[%s978_s0 + $0x5] ss:$16 sm:%s317_s29]   ;;  %v301_v22 = vsel %vm14_vm2, %v517_v17, %v296_v16  ;;  %s375_s4 = smov 12  ;;  %s380_s5 = smov 48  ;;  %v536_v46 = vld [vmem:[%s978_s0 + $0x83] sm:$0x1]  }
  0x1e   :  { %v320_v18 = vsel %vm6_vm0, %v521_v13, %v520_v12  ;;  %v522_v19 = vld [vmem:[%s978_s0 + $0x5] ss:$16 sm:%s322_s16]   ;;  %v526_v20 = vld [vmem:[%s978_s0 + $0x4] ss:$16 sm:%s343_s17]   ;;  %s574_s6 = smov 48   ;;  %s2_s11 = smov 3 }
  0x1f   :  { %250 = vrot.lane.b32.xlu1 %v506_v62, %s572_s30  ;;  %v527_v21 = vld [vmem:[%s978_s0 + $0x4] ss:$16 sm:%s346_s18]   ;;  %v325_v24 = vsel %vm10_vm1, %v522_v19, %v320_v18  ;;  %s4_s12 = smov 12  ;;  %s8_s18 = smov 48  ;;  %v542_v56 = vld [vmem:[%s978_s0 + $0x82] sm:$0x1]  }
  0x20   :  { %v523_v25 = vld [vmem:[%s978_s0 + $0x5] ss:$16 sm:%s327_s25]   ;;  %v349_v26 = vsel %vm6_vm0, %v527_v21, %v526_v20  ;;  %v528_v27 = vld [vmem:[%s978_s0 + $0x4] ss:$16 sm:%s351_s28]   ;;  %s401_s22 = smov 3  ;;  %s12_s23 = smov 192 }
  0x21   :  { %244 = vrot.lane.b32.xlu0 %v243_v5, %s572_s30  ;;  %v532_v28 = vld [vmem:[%s978_s0 + $0x3] ss:$16 sm:%s372_s3]   ;;  %v330_v31 = vsel %vm14_vm2, %v523_v25, %v325_v24  ;;  %s404_s26 = smov 12  ;;  %v354_v36 = vsel %vm10_vm1, %v528_v27, %v349_v26  ;;  %s385_s7 = smov 192  ;;  %v548_v62 = vld [vmem:[%s978_s0 + $0x81] sm:$0x1]  }
  0x22   :  { %v529_v29 = vld [vmem:[%s978_s0 + $0x4] ss:$16 sm:%s356_s2]   ;;  %v533_v30 = vld [vmem:[%s978_s0 + $0x3] ss:$16 sm:%s375_s4]   ;;  %s575_s2 = smov 40   ;;  %s409_s15 = smov 48 }
  0x23   :  { %279 = vrot.lane.b32.xlu1 %v512_v6, %s573_s19  ;;  %v534_v32 = vld [vmem:[%s978_s0 + $0x3] ss:$16 sm:%s380_s5]   ;;  %v378_v39 = vsel %vm6_vm0, %v533_v30, %v532_v28  ;;  %s430_s16 = smov 3  ;;  %v359_v45 = vsel %vm14_vm2, %v529_v29, %v354_v36  ;;  %s433_s17 = smov 12  ;;  %vm101_vm6 = vcmask 917312   ;;  %vm130_vm7 = vcmask 851712  }
  0x24   :  { %v3_v33 = vld [vmem:[%s978_s0] ss:$16 sm:%s2_s11]   ;;  %v538_v40 = vld [vmem:[%s978_s0 + $0x2] ss:$16 sm:%s401_s22]   ;;  %s576_s20 = smov 32   ;;  %v383_v47 = vsel %vm10_vm1, %v534_v32, %v378_v39  ;;  %s577_s3 = smov 24  }
  0x25   :  { %273 = vrot.lane.b32.xlu0 %v272_v14, %s573_s19  ;;  %v5_v34 = vld [vmem:[%s978_s0] ss:$16 sm:%s4_s12]   ;;  %s443_s10 = smov 192  ;;  %s578_s11 = smov 16   ;;  %vm159_vm8 = vcmask 786112   ;;  %vm188_vm9 = vcmask 720512  }
  0x26   :  { %v7_v37 = vsel %vm6_vm0, %v5_v34, %v3_v33  ;;  %v9_v38 = vld [vmem:[%s978_s0] ss:$16 sm:%s8_s18]   ;;  %v539_v43 = vld [vmem:[%s978_s0 + $0x2] ss:$16 sm:%s404_s26]   ;;  %s414_s26 = smov 192  ;;  %vm217_vm10 = vcmask 654912  }
  0x27   :  { %308 = vrot.lane.b32.xlu1 %v518_v15, %s574_s6  ;;  %v11_v41 = vsel %vm10_vm1, %v9_v38, %v7_v37  ;;  %v13_v42 = vld [vmem:[%s978_s0] ss:$16 sm:%s12_s23]   ;;  %v407_v49 = vsel %vm6_vm0, %v539_v43, %v538_v40  ;;  %vm246_vm11 = vcmask 589312   ;;  %vm275_vm12 = vcmask 523712  }
  0x28   :  { %v15_v44 = vsel %vm14_vm2, %v13_v42, %v11_v41  ;;  %v535_v48 = vld [vmem:[%s978_s0 + $0x3] ss:$16 sm:%s385_s7]   ;;  %v540_v50 = vld [vmem:[%s978_s0 + $0x2] ss:$16 sm:%s409_s15]   ;;  %vm304_vm13 = vcmask 458112   ;;  %vm333_vm14 = vcmask 392512  }
  0x29   :  { %302 = vrot.lane.b32.xlu0 %v301_v22, %s574_s6  ;;  %17 = vst.msk [vmem:[%s979_s1] sm:$0xff] %vm16_vm3, %v15_v44   ;;  %v544_v51 = vld [vmem:[%s978_s0 + $0x1] ss:$16 sm:%s430_s16]   ;;  %v388_v53 = vsel %vm14_vm2, %v535_v48, %v383_v47  ;;  %v412_v54 = vsel %vm10_vm1, %v540_v50, %v407_v49  ;;  %vm362_vm15 = vcmask 326912  }
  0x2a   :  { %v545_v52 = vld [vmem:[%s978_s0 + $0x1] ss:$16 sm:%s433_s17]   ;;  %v541_v55 = vld [vmem:[%s978_s0 + $0x2] ss:$16 sm:%s414_s26]  }
  0x2b   :  { %337 = vrot.lane.b32.xlu1 %v524_v23, %s575_s2  ;;  %v436_v57 = vsel %vm6_vm0, %v545_v52, %v544_v51  ;;  %v417_v59 = vsel %vm14_vm2, %v541_v55, %v412_v54  ;;  %v547_v61 = vld [vmem:[%s978_s0 + $0x1] ss:$16 sm:%s443_s10]   ;;  %vm391_vm0 = vcmask 261312  }
  0x2d   :  { %331 = vrot.lane.b32.xlu0 %v330_v31, %s575_s2  ;;  %s438_s2 = smov 48 }
  0x2e   :  { %v546_v58 = vld [vmem:[%s978_s0 + $0x1] ss:$16 sm:%s438_s2]   ;;  %s579_s0 = smov 8  }
  0x2f   :  { %366 = vrot.lane.b32.xlu1 %v530_v35, %s576_s20  ;;  %v441_v60 = vsel %vm10_vm1, %v546_v58, %v436_v57  ;;  %vm420_vm1 = vcmask 195712  }
  0x30   :  { %v446_v63 = vsel %vm14_vm2, %v547_v61, %v441_v60  ;;  %vm449_vm2 = vcmask 130112  }
  0x31   :  { %360 = vrot.lane.b32.xlu0 %v359_v45, %s576_s20 }
  0x33   :  { %395 = vrot.lane.b32.xlu1 %v536_v46, %s577_s3 }
  0x35   :  { %389 = vrot.lane.b32.xlu0 %v388_v53, %s577_s3 }
  0x37   :  { %424 = vrot.lane.b32.xlu1 %v542_v56, %s578_s11 }
  0x39   :  { %418 = vrot.lane.b32.xlu0 %v417_v59, %s578_s11 }
  0x3b   :  { %453 = vrot.lane.b32.xlu1 %v548_v62, %s579_s0 }
  0x3d   :  { %447 = vrot.lane.b32.xlu0 %v446_v63, %s579_s0 }
  0x74   :  { %v77_v0 = vpop.permute.xlu1 %76   ;;  %v48_v1 = vpop.permute.xlu0 %47  }
  0x75   :  { %465 = vst.msk [vmem:[%s979_s1 + $0x8] sm:$0x1] %vm43_vm4, %v48_v1  }
  0x76   :  { %471 = vst.msk [vmem:[%s979_s1 + $0x8] sm:$0x1] %vm72_vm5, %v77_v0  }
  0x79   :  { %v71_v2 = vpop.permute.xlu1 %70  }
  0x7b   :  { %v42_v3 = vpop.permute.xlu0 %41  }
  0x7c   :  { %44 = vst.msk [vmem:[%s979_s1] sm:$0xff] %vm43_vm4, %v42_v3  }
  0x7d   :  { %73 = vst.msk [vmem:[%s979_s1] sm:$0xff] %vm72_vm5, %v71_v2   ;;  %v106_v4 = vpop.permute.xlu1 %105  }
  0x7e   :  { %477 = vst.msk [vmem:[%s979_s1 + $0x8] sm:$0x1] %vm101_vm6, %v106_v4  }
  0x7f   :  { %v100_v5 = vpop.permute.xlu0 %99  }
  0x80   :  { %102 = vst.msk [vmem:[%s979_s1] sm:$0xff] %vm101_vm6, %v100_v5  }
  0x81   :  { %v135_v6 = vpop.permute.xlu1 %134  }
  0x82   :  { %483 = vst.msk [vmem:[%s979_s1 + $0x8] sm:$0x1] %vm130_vm7, %v135_v6  }
  0x83   :  { %v129_v7 = vpop.permute.xlu0 %128  }
  0x84   :  { %131 = vst.msk [vmem:[%s979_s1] sm:$0xff] %vm130_vm7, %v129_v7  }
  0x85   :  { %v164_v8 = vpop.permute.xlu1 %163  }
  0x86   :  { %489 = vst.msk [vmem:[%s979_s1 + $0x8] sm:$0x1] %vm159_vm8, %v164_v8  }
  0x87   :  { %v158_v9 = vpop.permute.xlu0 %157  }
  0x88   :  { %160 = vst.msk [vmem:[%s979_s1] sm:$0xff] %vm159_vm8, %v158_v9  }
  0x89   :  { %v193_v10 = vpop.permute.xlu1 %192  }
  0x8a   :  { %495 = vst.msk [vmem:[%s979_s1 + $0x8] sm:$0x1] %vm188_vm9, %v193_v10  }
  0x8b   :  { %v187_v11 = vpop.permute.xlu0 %186  }
  0x8c   :  { %189 = vst.msk [vmem:[%s979_s1] sm:$0xff] %vm188_vm9, %v187_v11  }
  0x8d   :  { %v222_v12 = vpop.permute.xlu1 %221  }
  0x8e   :  { %501 = vst.msk [vmem:[%s979_s1 + $0x8] sm:$0x1] %vm217_vm10, %v222_v12  }
  0x8f   :  { %v216_v13 = vpop.permute.xlu0 %215  }
  0x90   :  { %218 = vst.msk [vmem:[%s979_s1] sm:$0xff] %vm217_vm10, %v216_v13  }
  0x91   :  { %v251_v14 = vpop.permute.xlu1 %250  }
  0x92   :  { %507 = vst.msk [vmem:[%s979_s1 + $0x8] sm:$0x1] %vm246_vm11, %v251_v14  }
  0x93   :  { %v245_v15 = vpop.permute.xlu0 %244  }
  0x94   :  { %247 = vst.msk [vmem:[%s979_s1] sm:$0xff] %vm246_vm11, %v245_v15  }
  0x95   :  { %v280_v16 = vpop.permute.xlu1 %279  }
  0x96   :  { %513 = vst.msk [vmem:[%s979_s1 + $0x8] sm:$0x1] %vm275_vm12, %v280_v16  }
  0x97   :  { %v274_v17 = vpop.permute.xlu0 %273  }
  0x98   :  { %276 = vst.msk [vmem:[%s979_s1] sm:$0xff] %vm275_vm12, %v274_v17  }
  0x99   :  { %v309_v18 = vpop.permute.xlu1 %308  }
  0x9a   :  { %519 = vst.msk [vmem:[%s979_s1 + $0x8] sm:$0x1] %vm304_vm13, %v309_v18  }
  0x9b   :  { %v303_v19 = vpop.permute.xlu0 %302  }
  0x9c   :  { %305 = vst.msk [vmem:[%s979_s1] sm:$0xff] %vm304_vm13, %v303_v19  }
  0x9d   :  { %v338_v20 = vpop.permute.xlu1 %337  }
  0x9e   :  { %525 = vst.msk [vmem:[%s979_s1 + $0x8] sm:$0x1] %vm333_vm14, %v338_v20  }
  0x9f   :  { %v332_v21 = vpop.permute.xlu0 %331  }
  0xa0   :  { %334 = vst.msk [vmem:[%s979_s1] sm:$0xff] %vm333_vm14, %v332_v21  }
  0xa1   :  { %v367_v22 = vpop.permute.xlu1 %366  }
  0xa2   :  { %531 = vst.msk [vmem:[%s979_s1 + $0x8] sm:$0x1] %vm362_vm15, %v367_v22  }
  0xa3   :  { %v361_v23 = vpop.permute.xlu0 %360  }
  0xa4   :  { %363 = vst.msk [vmem:[%s979_s1] sm:$0xff] %vm362_vm15, %v361_v23  }
  0xa5   :  { %v396_v24 = vpop.permute.xlu1 %395  }
  0xa6   :  { %537 = vst.msk [vmem:[%s979_s1 + $0x8] sm:$0x1] %vm391_vm0, %v396_v24  }
  0xa7   :  { %v390_v25 = vpop.permute.xlu0 %389  }
  0xa8   :  { %392 = vst.msk [vmem:[%s979_s1] sm:$0xff] %vm391_vm0, %v390_v25  }
  0xa9   :  { %v425_v26 = vpop.permute.xlu1 %424  }
  0xaa   :  { %543 = vst.msk [vmem:[%s979_s1 + $0x8] sm:$0x1] %vm420_vm1, %v425_v26  }
  0xab   :  { %v419_v27 = vpop.permute.xlu0 %418  }
  0xac   :  { %421 = vst.msk [vmem:[%s979_s1] sm:$0xff] %vm420_vm1, %v419_v27  }
  0xad   :  { %v454_v28 = vpop.permute.xlu1 %453  }
  0xae   :  { %549 = vst.msk [vmem:[%s979_s1 + $0x8] sm:$0x1] %vm449_vm2, %v454_v28  }
  0xaf   :  { %v448_v29 = vpop.permute.xlu0 %447  }
  0xb0   :  { %450 = vst.msk [vmem:[%s979_s1] sm:$0xff] %vm449_vm2, %v448_v29  }

// kernel: efub_forward.1
= control target key start
LH: loop header
LB: loop body
LE: loop exit
PB: predicated region body
PF: predicated region fallthrough
CT: control target
= control target key end

     0   :  { %v4901_v0 = vmov 0.0   ;;  %vm2890_vm0 = vmmov 0   ;;  %v4898_v27 = vmov 1.0   ;;  %vm275_vm1 = vcmask 1040384   ;;  %s4888_s1 = inlined_call_operand.vmem [shape: f32[2,18,128], index: 1, kind: input, shape index: {}]   ;;  %s4889_s3 = inlined_call_operand.vmem [shape: f32[108,128], index: 3, kind: input, shape index: {}]   ;;  %s4890_s6 = inlined_call_operand.vmem [shape: f32[128,128], index: 6, kind: input, shape index: {}]   ;;  %s4891_s2 = inlined_call_operand.vmem [shape: f32[2,18,128], index: 2, kind: input, shape index: {}]   ;;  %s4892_s0 = inlined_call_operand.vmem [shape: f32[2,18,128], index: 0, kind: input, shape index: {}]   ;;  %s4893_s4 = inlined_call_operand.vmem [shape: f32[3,128], index: 4, kind: input, shape index: {}]   ;;  %s4894_s5 = inlined_call_operand.vmem [shape: f32[3,128], index: 5, kind: input, shape index: {}]   ;;  %s4895_s7 = inlined_call_operand.vmem [shape: f32[128,256], index: 7, kind: input, shape index: {}]   ;;  %s4896_s8 = inlined_call_operand.vmem [shape: f32[1,256], index: 8, kind: input, shape index: {}]   ;;  %s4897_s9 = inlined_call_operand.vmem [shape: f32[128,256], index: 9, kind: output, shape index: {}]  }
   0x1   :  { %2565 = vmatprep.subr.mxu0 %v4901_v0  ;;  %v2946_v1 = vld [vmem:[%s4888_s1 + $0x21] sm:$0xff]  ;;  %v2359_v2 = vld [vmem:[%s4889_s3 + $0x1f] ss:$0 sm:$0xff]  ;;  %2597 = vmatprep.mubr.msk.f32.mxu0 %vm2890_vm0, %v4901_v0  ;;  %v2967_v6 = vld [vmem:[%s4888_s1 + $0x9] sm:$0xff] }
   0x2   :  { %v2954_v3 = vld [vmem:[%s4888_s1 + $0x19] sm:$0xff]  ;;  %v2959_v4 = vmul.f32 %v2359_v2, %v2946_v1  ;;  %2670 = vmatprep.subr.mxu1 %v4901_v0  ;;  %2702 = vmatprep.mubr.msk.f32.mxu1 %vm2890_vm0, %v4901_v0  ;;  %v2975_v7 = vld [vmem:[%s4888_s1 + $0x1] sm:$0xff]  ;;  %v2979_v8 = vmul.f32 %v2359_v2, %v2967_v6  ;;  %v2358_v9 = vld [vmem:[%s4889_s3 + $0x16] ss:$0 sm:$0xff] }
   0x3   :  { %v2962_v5 = vmul.f32 %v2359_v2, %v2954_v3  ;;  %v2987_v10 = vmul.f32 %v2359_v2, %v2975_v7  ;;  %v2992_v11 = vmul.f32 %v2358_v9, %v2946_v1  ;;  %v2997_v12 = vmul.f32 %v2358_v9, %v2954_v3  ;;  %v2357_v14 = vld [vmem:[%s4889_s3 + $0xd] ss:$0 sm:$0xff]  ;;  %v2356_v19 = vld [vmem:[%s4889_s3 + $0x4] ss:$0 sm:$0xff]  ;;  %v3117_v42 = vld [vmem:[%s4890_s6 + $0x78] sm:$0xff] }
   0x4   :  { %4981 = vst [vmem:[#allocation4_spill] sm:$0xff] %v2959_v4  ;;  %2566 = vmatpush3.msra.mxu0 %v2959_v4  ;;  %4983 = vst [vmem:[#allocation6_spill] sm:$0xff] %v2979_v8  ;;  %v3002_v13 = vmul.f32 %v2358_v9, %v2967_v6  ;;  %v3010_v15 = vmul.f32 %v2358_v9, %v2975_v7  ;;  %v3015_v16 = vmul.f32 %v2357_v14, %v2946_v1  ;;  %v3122_v43 = vld [vmem:[%s4890_s6 + $0x70] sm:$0xff]  ;;  %v3129_v44 = vld [vmem:[%s4890_s6 + $0x68] sm:$0xff] }
   0x5   :  { %4982 = vst [vmem:[#allocation5_spill] sm:$0xff] %v2962_v5  ;;  %2567 = vmatprep.subr.mxu0 %v4901_v0  ;;  %4984 = vst [vmem:[#allocation7_spill] sm:$0xff] %v2987_v10  ;;  %v3020_v17 = vmul.f32 %v2357_v14, %v2954_v3  ;;  %v3025_v18 = vmul.f32 %v2357_v14, %v2967_v6  ;;  %v3033_v20 = vmul.f32 %v2357_v14, %v2975_v7  ;;  %v3136_v45 = vld [vmem:[%s4890_s6 + $0x60] sm:$0xff]  ;;  %v3143_v46 = vld [vmem:[%s4890_s6 + $0x58] sm:$0xff] }
   0x6   :  { %2568 = vmatpush3.msra.mxu0 %v2962_v5  ;;  %4985 = vst [vmem:[#allocation8_spill] sm:$0xff] %v2992_v11  ;;  %4986 = vst [vmem:[#allocation9_spill] sm:$0xff] %v2997_v12  ;;  %v3038_v21 = vmul.f32 %v2356_v19, %v2946_v1  ;;  %v3043_v22 = vmul.f32 %v2356_v19, %v2954_v3  ;;  %v3048_v23 = vmul.f32 %v2356_v19, %v2967_v6  ;;  %v3150_v47 = vld [vmem:[%s4890_s6 + $0x50] sm:$0xff]  ;;  %v3157_v48 = vld [vmem:[%s4890_s6 + $0x48] sm:$0xff] }
   0x7   :  { %2569 = vmatprep.subr.mxu0 %v4901_v0  ;;  %4987 = vst [vmem:[#allocation10_spill] sm:$0xff] %v3002_v13  ;;  %4988 = vst [vmem:[#allocation11_spill] sm:$0xff] %v3010_v15  ;;  %v3053_v24 = vmul.f32 %v2356_v19, %v2975_v7  ;;  %v201_v25 = vmul.f32 %v2959_v4, %v2959_v4  ;;  %v200_v26 = vmul.f32 %v2962_v5, %v2962_v5  ;;  %v3164_v49 = vld [vmem:[%s4890_s6 + $0x40] sm:$0xff]  ;;  %v3171_v50 = vld [vmem:[%s4890_s6 + $0x38] sm:$0xff] }
   0x8   :  { %2570 = vmatpush3.msra.mxu0 %v2979_v8  ;;  %4989 = vst [vmem:[#allocation12_spill] sm:$0xff] %v3015_v16  ;;  %4990 = vst [vmem:[#allocation13_spill] sm:$0xff] %v3020_v17  ;;  %v199_v28 = vmul.f32 %v2979_v8, %v2979_v8  ;;  %v198_v29 = vmul.f32 %v2987_v10, %v2987_v10  ;;  %v197_v30 = vmul.f32 %v2992_v11, %v2992_v11  ;;  %v3178_v51 = vld [vmem:[%s4890_s6 + $0x30] sm:$0xff]  ;;  %v3185_v52 = vld [vmem:[%s4890_s6 + $0x28] sm:$0xff]  ;;  %v5014_v8 = vmov 0.0  }
   0x9   :  { %2571 = vmatprep.subr.mxu0 %v4901_v0  ;;  %4991 = vst [vmem:[#allocation14_spill] sm:$0xff] %v3025_v18  ;;  %4992 = vst [vmem:[#allocation15_spill] sm:$0xff] %v3033_v20  ;;  %v196_v31 = vmul.f32 %v2997_v12, %v2997_v12  ;;  %v195_v32 = vmul.f32 %v3002_v13, %v3002_v13  ;;  %v194_v33 = vmul.f32 %v3010_v15, %v3010_v15  ;;  %v3192_v53 = vld [vmem:[%s4890_s6 + $0x20] sm:$0xff]  ;;  %v3198_v54 = vld [vmem:[%s4890_s6 + $0x18] sm:$0xff] }
   0xa   :  { %2572 = vmatpush3.msra.mxu0 %v2987_v10  ;;  %4993 = vst [vmem:[#allocation16_spill] sm:$0xff] %v3038_v21  ;;  %4994 = vst [vmem:[#allocation17_spill] sm:$0xff] %v3043_v22  ;;  %v193_v34 = vmul.f32 %v3015_v16, %v3015_v16  ;;  %v192_v35 = vmul.f32 %v3020_v17, %v3020_v17  ;;  %v191_v36 = vmul.f32 %v3025_v18, %v3025_v18  ;;  %v2372_v55 = vld [vmem:[%s4889_s3 + $0x43] ss:$0 sm:$0xff]  ;;  %v2373_v57 = vld [vmem:[%s4889_s3 + $0x44] ss:$0 sm:$0xff] }
   0xb   :  { %2573 = vmatprep.subr.mxu0 %v4901_v0  ;;  %4995 = vst [vmem:[#allocation18_spill] sm:$0xff] %v3048_v23  ;;  %4996 = vst [vmem:[#allocation19_spill] sm:$0xff] %v3053_v24  ;;  %v190_v37 = vmul.f32 %v3033_v20, %v3033_v20  ;;  %v189_v38 = vmul.f32 %v3038_v21, %v3038_v21  ;;  %v188_v39 = vmul.f32 %v3043_v22, %v3043_v22  ;;  %v3207_v56 = vld [vmem:[%s4891_s2 + $0x21] sm:$0xff]  ;;  %v3219_v60 = vld [vmem:[%s4890_s6 + $0x10] sm:$0xff] }
   0xc   :  { %2574 = vmatpush3.msra.mxu0 %v2992_v11  ;;  %v187_v40 = vmul.f32 %v3048_v23, %v3048_v23  ;;  %v186_v41 = vmul.f32 %v3053_v24, %v3053_v24  ;;  %4997 = vst [vmem:[#allocation20_spill] sm:$0xff] %v3207_v56  ;;  %v667_v58 = vmul.f32 %v2372_v55, %v2946_v1  ;;  %v3224_v61 = vld [vmem:[%s4888_s1 + $0x22] sm:$0xff]  ;;  %v3234_v9 = vld [vmem:[%s4891_s2 + $0x19] sm:$0xff] }
   0xd   :  { %2575 = vmatprep.subr.mxu0 %v4901_v0  ;;  %v680_v59 = vmul.f32 %v2373_v57, %v3207_v56  ;;  %4998 = vst [vmem:[#allocation21_spill] sm:$0xff] %v3224_v61  ;;  %v2374_v62 = vld [vmem:[%s4889_s3 + $0x46] ss:$0 sm:$0xff]  ;;  %4999 = vst [vmem:[#allocation22_spill] sm:$0xff] %v3234_v9  ;;  %v2375_v19 = vld [vmem:[%s4889_s3 + $0x47] ss:$0 sm:$0xff] }
   0xe   :  { %2576 = vmatpush3.msra.mxu0 %v2997_v12  ;;  %v697_v2 = vmul.f32 %v2374_v62, %v3224_v61  ;;  %v3240_v14 = vld [vmem:[%s4891_s2 + $0x22] sm:$0xff]  ;;  %v3348_v5 = vld [vmem:[%s4892_s0 + $0x19] sm:$0xff] }
   0xf   :  { %2577 = vmatprep.subr.mxu0 %v4901_v0  ;;  %v684_v63 = vadd.f32 %v680_v59, %v667_v58  ;;  %5000 = vst [vmem:[#allocation23_spill] sm:$0xff] %v3240_v14  ;;  %5013 = vst [vmem:[#allocation36_spill] sm:$0xff] %v3348_v5  ;;  %v2371_v12 = vld [vmem:[%s4889_s3 + $0x3d] ss:$0 sm:$0xff] }
  0x10   :  { %2578 = vmatpush3.msra.mxu0 %v3002_v13  ;;  %v3364_v13 = vld [vmem:[%s4892_s0 + $0x9] sm:$0xff] }
  0x11   :  { %2579 = vmatprep.subr.mxu0 %v4901_v0  ;;  %5016 = vst [vmem:[#allocation38_spill] sm:$0xff] %v3364_v13 }
  0x12   :  { %2580 = vmatpush3.msra.mxu0 %v3010_v15 }
  0x13   :  { %2581 = vmatprep.subr.mxu0 %v4901_v0 }
  0x14   :  { %2582 = vmatpush3.msra.mxu0 %v3015_v16 }
  0x15   :  { %2583 = vmatprep.subr.mxu0 %v4901_v0 }
  0x16   :  { %2584 = vmatpush3.msra.mxu0 %v3020_v17 }
  0x17   :  { %2585 = vmatprep.subr.mxu0 %v4901_v0 }
  0x18   :  { %2586 = vmatpush3.msra.mxu0 %v3025_v18  ;;  %v3377_v18 = vld [vmem:[%s4892_s0 + $0xa] sm:$0xff] }
  0x19   :  { %2587 = vmatprep.subr.mxu0 %v4901_v0  ;;  %5018 = vst [vmem:[#allocation40_spill] sm:$0xff] %v3377_v18 }
  0x1a   :  { %2588 = vmatpush3.msra.mxu0 %v3033_v20  ;;  %v3382_v20 = vld [vmem:[%s4892_s0 + $0x1] sm:$0xff] }
  0x1b   :  { %2589 = vmatprep.subr.mxu0 %v4901_v0 }
  0x1c   :  { %2590 = vmatpush3.msra.mxu0 %v3038_v21 }
  0x1d   :  { %2591 = vmatprep.subr.mxu0 %v4901_v0 }
  0x1e   :  { %2592 = vmatpush3.msra.mxu0 %v3043_v22 }
  0x1f   :  { %2593 = vmatprep.subr.mxu0 %v4901_v0 }
  0x20   :  { %2594 = vmatpush3.msra.mxu0 %v3048_v23  ;;  %v3399_v23 = vld [vmem:[%s4888_s1 + $0x20] sm:$0xff] }
  0x21   :  { %2595 = vmatprep.subr.mxu0 %v4901_v0 }
  0x22   :  { %2596 = vmatpush3.msra.mxu0 %v3053_v24 }
  0x23   :  { %2598 = vmatmul.mubr.f32.vlgmr.msra.gmra.mxu0 %v4898_v27  ;;  %2600 = vmatprep.subr.mxu0 %v4901_v0 }
  0x24   :  { %2601 = vmatpush3.msra.mxu0 %v201_v25  ;;  %2632 = vmatprep.mubr.msk.f32.mxu0 %vm2890_vm0, %v4901_v0  ;;  %v666_v25 = vmul.f32 %v2372_v55, %v2954_v3 }
  0x25   :  { %2602 = vmatprep.subr.mxu0 %v4901_v0 }
  0x26   :  { %2603 = vmatpush3.msra.mxu0 %v200_v26  ;;  %v679_v26 = vmul.f32 %v2373_v57, %v3234_v9 }
  0x27   :  { %2604 = vmatprep.subr.mxu0 %v4901_v0 }
  0x28   :  { %2605 = vmatpush3.msra.mxu0 %v199_v28  ;;  %v701_v28 = vadd.f32 %v697_v2, %v684_v63 }
  0x29   :  { %2606 = vmatprep.subr.mxu0 %v4901_v0 }
  0x2a   :  { %2607 = vmatpush3.msra.mxu0 %v198_v29  ;;  %v714_v29 = vmul.f32 %v2375_v19, %v3240_v14  ;;  %v3470_v14 = vld [vmem:[%s4891_s2] sm:$0xff] }
  0x2b   :  { %2608 = vmatprep.subr.mxu0 %v4901_v0  ;;  %5025 = vst [vmem:[#allocation47_spill] sm:$0xff] %v3470_v14 }
  0x2c   :  { %2609 = vmatpush3.msra.mxu0 %v197_v30  ;;  %v3252_v30 = vld [vmem:[%s4888_s1 + $0x1a] sm:$0xff] }
  0x2d   :  { %2610 = vmatprep.subr.mxu0 %v4901_v0  ;;  %5001 = vst [vmem:[#allocation24_spill] sm:$0xff] %v3252_v30  ;;  %v645_v21 = vmul.f32 %v2371_v12, %v3252_v30 }
  0x2e   :  { %2611 = vmatpush3.msra.mxu0 %v196_v31  ;;  %v3257_v31 = vld [vmem:[%s4891_s2 + $0x9] sm:$0xff] }
  0x2f   :  { %2612 = vmatprep.subr.mxu0 %v4901_v0  ;;  %5002 = vst [vmem:[#allocation25_spill] sm:$0xff] %v3257_v31 }
  0x30   :  { %2613 = vmatpush3.msra.mxu0 %v195_v32  ;;  %v3263_v32 = vld [vmem:[%s4890_s6 + $0x8] sm:$0xff] }
  0x31   :  { %2614 = vmatprep.subr.mxu0 %v4901_v0 }
  0x32   :  { %2615 = vmatpush3.msra.mxu0 %v194_v33  ;;  %v683_v33 = vadd.f32 %v679_v26, %v666_v25  ;;  %v3299_v25 = vld [vmem:[%s4891_s2 + $0xa] sm:$0xff]  ;;  %v664_v26 = vmul.f32 %v2372_v55, %v2975_v7 }
  0x33   :  { %2616 = vmatprep.subr.mxu0 %v4901_v0  ;;  %5007 = vst [vmem:[#allocation30_spill] sm:$0xff] %v3299_v25 }
  0x34   :  { %2617 = vmatpush3.msra.mxu0 %v193_v34  ;;  %v696_v34 = vmul.f32 %v2374_v62, %v3252_v30  ;;  %v3465_v30 = vld [vmem:[%s4888_s1] sm:$0xff] }
  0x35   :  { %2618 = vmatprep.subr.mxu0 %v4901_v0 }
  0x36   :  { %2619 = vmatpush3.msra.mxu0 %v192_v35  ;;  %v665_v35 = vmul.f32 %v2372_v55, %v2967_v6  ;;  %v700_v58 = vadd.f32 %v696_v34, %v683_v33  ;;  %v3311_v33 = vld [vmem:[%s4892_s0 + $0x21] sm:$0xff]  ;;  %v712_v55 = vmul.f32 %v2375_v19, %v3299_v25 }
  0x37   :  { %2620 = vmatprep.subr.mxu0 %v4901_v0 }
  0x38   :  { %2621 = vmatpush3.msra.mxu0 %v191_v36  ;;  %v678_v36 = vmul.f32 %v2373_v57, %v3257_v31 }
  0x39   :  { %2622 = vmatprep.subr.mxu0 %v4901_v0 }
  0x3a   :  { %2623 = vmatpush3.msra.mxu0 %v190_v37  ;;  %v3269_v37 = vadd.f32 %v714_v29, %v701_v28  ;;  %v682_v63 = vadd.f32 %v678_v36, %v665_v35  ;;  %v3306_v29 = vld [vmem:[%s4888_s1 + $0x2] sm:$0xff]  ;;  %v2369_v36 = vld [vmem:[%s4889_s3 + $0x3a] ss:$0 sm:$0xff] }
  0x3b   :  { %2624 = vmatprep.subr.mxu0 %v4901_v0  ;;  %5008 = vst [vmem:[#allocation31_spill] sm:$0xff] %v3306_v29  ;;  %v694_v4 = vmul.f32 %v2374_v62, %v3306_v29  ;;  %v610_v17 = vmul.f32 %v2369_v36, %v2967_v6 }
  0x3c   :  { %2625 = vmatpush3.msra.mxu0 %v189_v38  ;;  %5003 = vst [vmem:[#allocation26_spill] sm:$0xff] %v3269_v37  ;;  %v3274_v38 = vld [vmem:[%s4891_s2 + $0x1a] sm:$0xff]  ;;  %2671 = vmatpush3.msra.mxu1 %v3269_v37 }
  0x3d   :  { %2626 = vmatprep.subr.mxu0 %v4901_v0  ;;  %5004 = vst [vmem:[#allocation27_spill] sm:$0xff] %v3274_v38  ;;  %v713_v59 = vmul.f32 %v2375_v19, %v3274_v38  ;;  %2672 = vmatprep.subr.mxu1 %v4901_v0 }
  0x3e   :  { %2627 = vmatpush3.msra.mxu0 %v188_v39  ;;  %v3279_v39 = vld [vmem:[%s4888_s1 + $0xa] sm:$0xff] }
  0x3f   :  { %2628 = vmatprep.subr.mxu0 %v4901_v0  ;;  %5005 = vst [vmem:[#allocation28_spill] sm:$0xff] %v3279_v39  ;;  %v695_v2 = vmul.f32 %v2374_v62, %v3279_v39  ;;  %v3315_v34 = vadd.f32 %v713_v59, %v700_v58  ;;  %v612_v59 = vmul.f32 %v2369_v36, %v2946_v1 }
  0x40   :  { %2629 = vmatpush3.msra.mxu0 %v187_v40  ;;  %v3284_v40 = vld [vmem:[%s4891_s2 + $0x1] sm:$0xff] }
  0x41   :  { %2630 = vmatprep.subr.mxu0 %v4901_v0  ;;  %5006 = vst [vmem:[#allocation29_spill] sm:$0xff] %v3284_v40  ;;  %v677_v28 = vmul.f32 %v2373_v57, %v3284_v40  ;;  %5009 = vst [vmem:[#allocation32_spill] sm:$0xff] %v3315_v34  ;;  %v699_v35 = vadd.f32 %v695_v2, %v682_v63  ;;  %v2368_v57 = vld [vmem:[%s4889_s3 + $0x39] ss:$0 sm:$0xff]  ;;  %v3335_v63 = vld [vmem:[%s4892_s0 + $0x22] sm:$0xff]  ;;  %2673 = vmatpush3.msra.mxu1 %v3315_v34 }
  0x42   :  { %2631 = vmatpush3.msra.mxu0 %v186_v41  ;;  %v3290_v41 = vld [vmem:[%s4890_s6] sm:$0xff]  ;;  %v599_v58 = vmul.f32 %v2368_v57, %v3311_v33  ;;  %5011 = vst [vmem:[#allocation34_spill] sm:$0xff] %v3335_v63  ;;  %v2370_v2 = vld [vmem:[%s4889_s3 + $0x3c] ss:$0 sm:$0xff]  ;;  %2674 = vmatprep.subr.mxu1 %v5014_v8 }
  0x43   :  { %2633 = vmatmul.mubr.f32.vlgmr.msra.gmra.mxu0 %v4898_v27  ;;  %2635 = vmatprep.subr.mxu0 %v4901_v0  ;;  %v681_v27 = vadd.f32 %v677_v28, %v664_v26  ;;  %v3341_v62 = vadd.f32 %v712_v55, %v699_v35  ;;  %v629_v28 = vmul.f32 %v2370_v2, %v3335_v63 }
  0x44   :  { %2667 = vmatprep.mubr.msk.f32.mxu0 %vm2890_vm0, %v4901_v0  ;;  %2636 = vmatpush3.msra.mxu0 %v3117_v42  ;;  %v616_v11 = vadd.f32 %v612_v59, %v599_v58  ;;  %v598_v35 = vmul.f32 %v2368_v57, %v3348_v5  ;;  %v611_v55 = vmul.f32 %v2369_v36, %v2954_v3 }
  0x45   :  { %2637 = vmatprep.subr.mxu0 %v4901_v0  ;;  %5012 = vst [vmem:[#allocation35_spill] sm:$0xff] %v3341_v62  ;;  %v698_v10 = vadd.f32 %v694_v4, %v681_v27  ;;  %2675 = vmatpush3.msra.mxu1 %v3341_v62  ;;  %v646_v4 = vmul.f32 %v2371_v12, %v3224_v61  ;;  %v3483_v61 = vld [vmem:[%s4892_s0 + $0x20] sm:$0xff] }
  0x46   :  { %2638 = vmatpush3.msra.mxu0 %v3122_v43  ;;  %v597_v58 = vmul.f32 %v2368_v57, %v3364_v13  ;;  %2676 = vmatprep.subr.mxu1 %v5014_v8  ;;  %v633_v15 = vadd.f32 %v629_v28, %v616_v11  ;;  %v615_v16 = vadd.f32 %v611_v55, %v598_v35  ;;  %v3394_v55 = vld [vmem:[%s4892_s0 + $0x2] sm:$0xff] }
  0x47   :  { %2639 = vmatprep.subr.mxu0 %v4901_v0  ;;  %v627_v22 = vmul.f32 %v2370_v2, %v3377_v18  ;;  %v609_v11 = vmul.f32 %v2369_v36, %v2975_v7  ;;  %5020 = vst [vmem:[#allocation42_spill] sm:$0xff] %v3394_v55 }
  0x48   :  { %2640 = vmatpush3.msra.mxu0 %v3129_v44  ;;  %v614_v35 = vadd.f32 %v610_v17, %v597_v58  ;;  %v626_v17 = vmul.f32 %v2370_v2, %v3394_v55 }
  0x49   :  { %2641 = vmatprep.subr.mxu0 %v4901_v0 }
  0x4a   :  { %2642 = vmatpush3.msra.mxu0 %v3136_v45  ;;  %v631_v24 = vadd.f32 %v627_v22, %v614_v35  ;;  %v643_v22 = vmul.f32 %v2371_v12, %v3306_v29 }
  0x4b   :  { %2643 = vmatprep.subr.mxu0 %v4901_v0 }
  0x4c   :  { %2644 = vmatpush3.msra.mxu0 %v3143_v46 }
  0x4d   :  { %2645 = vmatprep.subr.mxu0 %v4901_v0 }
  0x4e   :  { %2646 = vmatpush3.msra.mxu0 %v3150_v47 }
  0x4f   :  { %2647 = vmatprep.subr.mxu0 %v4901_v0 }
  0x50   :  { %2648 = vmatpush3.msra.mxu0 %v3157_v48 }
  0x51   :  { %2649 = vmatprep.subr.mxu0 %v4901_v0 }
  0x52   :  { %2650 = vmatpush3.msra.mxu0 %v3164_v49 }
  0x53   :  { %2651 = vmatprep.subr.mxu0 %v4901_v0 }
  0x54   :  { %2652 = vmatpush3.msra.mxu0 %v3171_v50 }
  0x55   :  { %2653 = vmatprep.subr.mxu0 %v4901_v0 }
  0x56   :  { %2654 = vmatpush3.msra.mxu0 %v3178_v51 }
  0x57   :  { %2655 = vmatprep.subr.mxu0 %v4901_v0 }
  0x58   :  { %2656 = vmatpush3.msra.mxu0 %v3185_v52 }
  0x59   :  { %2657 = vmatprep.subr.mxu0 %v4901_v0 }
  0x5a   :  { %2658 = vmatpush3.msra.mxu0 %v3192_v53 }
  0x5b   :  { %2659 = vmatprep.subr.mxu0 %v4901_v0 }
  0x5c   :  { %2660 = vmatpush3.msra.mxu0 %v3198_v54 }
  0x5d   :  { %2661 = vmatprep.subr.mxu0 %v4901_v0 }
  0x5e   :  { %2662 = vmatpush3.msra.mxu0 %v3219_v60 }
  0x5f   :  { %2663 = vmatprep.subr.mxu0 %v4901_v0 }
  0x60   :  { %2664 = vmatpush3.msra.mxu0 %v3263_v32 }
  0x61   :  { %2665 = vmatprep.subr.mxu0 %v4901_v0 }
  0x62   :  { %2666 = vmatpush3.msra.mxu0 %v3290_v41 }
  0x63   :  { %2705 = vmatprep.subr.mxu0 %v4901_v0  ;;  %v3328_v0 = vld [vmem:[%s4891_s2 + $0x2] sm:$0xff] }
  0x64   :  { %5010 = vst [vmem:[#allocation33_spill] sm:$0xff] %v3328_v0  ;;  %v711_v26 = vmul.f32 %v2375_v19, %v3328_v0  ;;  %v3359_v19 = vld [vmem:[%s4892_s0 + $0x1a] sm:$0xff] }
  0x65   :  { %5015 = vst [vmem:[#allocation37_spill] sm:$0xff] %v3359_v19  ;;  %v628_v27 = vmul.f32 %v2370_v2, %v3359_v19  ;;  %v2366_v2 = vld [vmem:[%s4889_s3 + $0x31] ss:$0 sm:$0xff]  ;;  %v3431_v0 = vld [vmem:[%s4891_s2 + $0x18] sm:$0xff] }
  0x66   :  { %v3371_v59 = vadd.f32 %v711_v26, %v698_v10  ;;  %v596_v10 = vmul.f32 %v2368_v57, %v3382_v20  ;;  %v3389_v26 = vadd.f32 %v646_v4, %v633_v15  ;;  %v2364_v57 = vld [vmem:[%s4889_s3 + $0x2e] ss:$0 sm:$0xff]  ;;  %v644_v15 = vmul.f32 %v2371_v12, %v3279_v39  ;;  %v3411_v4 = vld [vmem:[%s4891_s2 + $0x20] sm:$0xff]  ;;  %v2367_v39 = vld [vmem:[%s4889_s3 + $0x32] ss:$0 sm:$0xff] }
  0x67   :  { %v632_v28 = vadd.f32 %v628_v27, %v615_v16  ;;  %v531_v36 = vmul.f32 %v2364_v57, %v3399_v23  ;;  %v2365_v27 = vld [vmem:[%s4889_s3 + $0x2f] ss:$0 sm:$0xff]  ;;  %v577_v19 = vmul.f32 %v2367_v39, %v3234_v9  ;;  %v2360_v9 = vld [vmem:[%s4889_s3 + $0x24] ss:$0 sm:$0xff] }
  0x68   :  { %5017 = vst [vmem:[#allocation39_spill] sm:$0xff] %v3371_v59  ;;  %2677 = vmatpush3.msra.mxu1 %v3371_v59  ;;  %5019 = vst [vmem:[#allocation41_spill] sm:$0xff] %v3389_v26  ;;  %v613_v16 = vadd.f32 %v609_v11, %v596_v10  ;;  %v544_v10 = vmul.f32 %v2365_v27, %v3411_v4  ;;  %v3426_v11 = vld [vmem:[%s4888_s1 + $0x18] sm:$0xff]  ;;  %v3438_v55 = vadd.f32 %v644_v15, %v631_v24  ;;  %v3452_v12 = vld [vmem:[%s4891_s2 + $0x8] sm:$0xff] }
  0x69   :  { %2678 = vmatprep.subr.mxu1 %v5014_v8  ;;  %v3417_v58 = vadd.f32 %v645_v21, %v632_v28  ;;  %v561_v28 = vmul.f32 %v2366_v2, %v2946_v1  ;;  %v530_v35 = vmul.f32 %v2364_v57, %v3426_v11  ;;  %v543_v38 = vmul.f32 %v2365_v27, %v3431_v0 }
  0x6a   :  { %2679 = vmatpush3.msra.mxu1 %v3389_v26  ;;  %v630_v21 = vadd.f32 %v626_v17, %v613_v16  ;;  %5022 = vst [vmem:[#allocation44_spill] sm:$0xff] %v3438_v55  ;;  %v548_v25 = vadd.f32 %v544_v10, %v531_v36  ;;  %v3447_v16 = vld [vmem:[%s4888_s1 + $0x8] sm:$0xff]  ;;  %5023 = vst [vmem:[#allocation45_spill] sm:$0xff] %v3452_v12  ;;  %v578_v24 = vmul.f32 %v2367_v39, %v3207_v56 }
  0x6b   :  { %5021 = vst [vmem:[#allocation43_spill] sm:$0xff] %v3417_v58  ;;  %2680 = vmatprep.subr.mxu1 %v5014_v8  ;;  %v560_v15 = vmul.f32 %v2366_v2, %v2954_v3  ;;  %v529_v17 = vmul.f32 %v2364_v57, %v3447_v16  ;;  %v547_v29 = vadd.f32 %v543_v38, %v530_v35 }
  0x6c   :  { %2681 = vmatpush3.msra.mxu1 %v3417_v58  ;;  %v3459_v36 = vadd.f32 %v643_v22, %v630_v21  ;;  %v565_v10 = vadd.f32 %v561_v28, %v548_v25  ;;  %v542_v18 = vmul.f32 %v2365_v27, %v3452_v12  ;;  %v559_v21 = vmul.f32 %v2366_v2, %v2967_v6 }
  0x6d   :  { %2682 = vmatprep.subr.mxu1 %v5014_v8  ;;  %v528_v38 = vmul.f32 %v2364_v57, %v3465_v30  ;;  %v564_v22 = vadd.f32 %v560_v15, %v547_v29  ;;  %v541_v35 = vmul.f32 %v2365_v27, %v3470_v14  ;;  %v2361_v57 = vld [vmem:[%s4889_s3 + $0x25] ss:$0 sm:$0xff]  ;;  %v576_v29 = vmul.f32 %v2367_v39, %v3257_v31  ;;  %v2362_v14 = vld [vmem:[%s4889_s3 + $0x27] ss:$0 sm:$0xff]  ;;  %v3505_v31 = vld [vmem:[%s4892_s0 + $0x18] sm:$0xff] }
  0x6e   :  { %2683 = vmatpush3.msra.mxu1 %v3438_v55  ;;  %5024 = vst [vmem:[#allocation46_spill] sm:$0xff] %v3459_v36  ;;  %v3477_v25 = vadd.f32 %v578_v24, %v565_v10  ;;  %v546_v28 = vadd.f32 %v542_v18, %v529_v17  ;;  %v558_v18 = vmul.f32 %v2366_v2, %v2975_v7 }
  0x6f   :  { %2684 = vmatprep.subr.mxu1 %v5014_v8  ;;  %v463_v27 = vmul.f32 %v2360_v9, %v3483_v61  ;;  %v476_v24 = vmul.f32 %v2361_v57, %v3399_v23  ;;  %v3497_v15 = vadd.f32 %v577_v19, %v564_v22  ;;  %v545_v10 = vadd.f32 %v541_v35, %v528_v38  ;;  %v2363_v22 = vld [vmem:[%s4889_s3 + $0x28] ss:$0 sm:$0xff] }
  0x70   :  { %2685 = vmatpush3.msra.mxu1 %v3459_v36  ;;  %5026 = vst [vmem:[#allocation48_spill] sm:$0xff] %v3477_v25  ;;  %v563_v17 = vadd.f32 %v559_v21, %v546_v28  ;;  %v575_v2 = vmul.f32 %v2367_v39, %v3284_v40  ;;  %v493_v56 = vmul.f32 %v2362_v14, %v3311_v33  ;;  %v3521_v39 = vld [vmem:[%s4892_s0 + $0x8] sm:$0xff]  ;;  %v3534_v40 = vld [vmem:[%s4892_s0] sm:$0xff] }
  0x71   :  { %2686 = vmatprep.subr.mxu1 %v5014_v8  ;;  %5027 = vst [vmem:[#allocation49_spill] sm:$0xff] %v3497_v15  ;;  %v480_v63 = vadd.f32 %v476_v24, %v463_v27  ;;  %v462_v19 = vmul.f32 %v2360_v9, %v3505_v31  ;;  %v562_v38 = vadd.f32 %v558_v18, %v545_v10 }
  0x72   :  { %2687 = vmatpush3.msra.mxu1 %v3477_v25  ;;  %v3512_v21 = vadd.f32 %v576_v29, %v563_v17  ;;  %v475_v28 = vmul.f32 %v2361_v57, %v3426_v11  ;;  %v510_v27 = vmul.f32 %v2363_v22, %v2946_v1  ;;  %v492_v29 = vmul.f32 %v2362_v14, %v3348_v5 }
  0x73   :  { %2688 = vmatprep.subr.mxu1 %v5014_v8  ;;  %v497_v35 = vadd.f32 %v493_v56, %v480_v63  ;;  %v461_v18 = vmul.f32 %v2360_v9, %v3521_v39  ;;  %v3528_v24 = vadd.f32 %v575_v2, %v562_v38  ;;  %v474_v10 = vmul.f32 %v2361_v57, %v3447_v16 }
  0x74   :  { %2689 = vmatpush3.msra.mxu1 %v3497_v15  ;;  %5028 = vst [vmem:[#allocation50_spill] sm:$0xff] %v3512_v21  ;;  %v479_v17 = vadd.f32 %v475_v28, %v462_v19  ;;  %v509_v1 = vmul.f32 %v2363_v22, %v2954_v3  ;;  %v491_v56 = vmul.f32 %v2362_v14, %v3364_v13 }
  0x75   :  { %2690 = vmatprep.subr.mxu1 %v5014_v8  ;;  %5029 = vst [vmem:[#allocation51_spill] sm:$0xff] %v3528_v24  ;;  %v460_v63 = vmul.f32 %v2360_v9, %v3534_v40  ;;  %v3541_v2 = vadd.f32 %v510_v27, %v497_v35  ;;  %v478_v38 = vadd.f32 %v474_v10, %v461_v18  ;;  %v2403_v18 = vld [vmem:[%s4889_s3 + $0x63] ss:$0 sm:$0xff] }
  0x76   :  { %2691 = vmatpush3.msra.mxu1 %v3512_v21  ;;  %v496_v19 = vadd.f32 %v492_v29, %v479_v17  ;;  %v473_v28 = vmul.f32 %v2361_v57, %v3465_v30  ;;  %v508_v12 = vmul.f32 %v2363_v22, %v2967_v6  ;;  %v490_v5 = vmul.f32 %v2362_v14, %v3382_v20  ;;  %v2404_v17 = vld [vmem:[%s4889_s3 + $0x64] ss:$0 sm:$0xff] }
  0x77   :  { %2692 = vmatprep.subr.mxu1 %v5014_v8  ;;  %5030 = vst [vmem:[#allocation52_spill] sm:$0xff] %v3541_v2  ;;  %v495_v13 = vadd.f32 %v491_v56, %v478_v38  ;;  %v507_v35 = vmul.f32 %v2363_v22, %v2975_v7  ;;  %v5034_v14 = vmov 1.0   ;;  %v1576_v10 = vmul.f32 %v2403_v18, %v3483_v61  ;;  %v2405_v56 = vld [vmem:[%s4889_s3 + $0x65] ss:$0 sm:$0xff]  ;;  %v2406_v38 = vld [vmem:[%s4889_s3 + $0x66] ss:$0 sm:$0xff] }
  0x78   :  { %2693 = vmatpush3.msra.mxu1 %v3528_v24  ;;  %v3548_v3 = vadd.f32 %v509_v1, %v496_v19  ;;  %v477_v9 = vadd.f32 %v473_v28, %v460_v63  ;;  %v1589_v1 = vmul.f32 %v2404_v17, %v3399_v23  ;;  %v1606_v19 = vmul.f32 %v2405_v56, %v3411_v4 }
  0x79   :  { %2694 = vmatprep.subr.mxu1 %v5014_v8  ;;  %v3553_v27 = vadd.f32 %v508_v12, %v495_v13  ;;  %v1575_v28 = vmul.f32 %v2403_v18, %v3505_v31 }
  0x7a   :  { %2695 = vmatpush3.msra.mxu1 %v3541_v2  ;;  %5031 = vst [vmem:[#allocation53_spill] sm:$0xff] %v3548_v3  ;;  %v494_v57 = vadd.f32 %v490_v5, %v477_v9  ;;  %v811_v12 = vmul.f32 %v3548_v3, %v3548_v3  ;;  %v1593_v63 = vadd.f32 %v1589_v1, %v1576_v10 }
  0x7b   :  { %2696 = vmatprep.subr.mxu1 %v5014_v8  ;;  %5032 = vst [vmem:[#allocation54_spill] sm:$0xff] %v3553_v27  ;;  %v810_v22 = vmul.f32 %v3553_v27, %v3553_v27  ;;  %v1588_v9 = vmul.f32 %v2404_v17, %v3426_v11 }
  0x7c   :  { %2697 = vmatpush3.msra.mxu1 %v3548_v3  ;;  %v3557_v6 = vadd.f32 %v507_v35, %v494_v57  ;;  %v1610_v35 = vadd.f32 %v1606_v19, %v1593_v63  ;;  %v1623_v57 = vmul.f32 %v2406_v38, %v3311_v33  ;;  %v5038_v63 = vld [vmem:[#allocation38_spill] sm:$0xff] }
  0x7d   :  { %2698 = vmatprep.subr.mxu1 %v5014_v8  ;;  %v1621_v19 = vmul.f32 %v2406_v38, %v5038_v63 }
  0x7e   :  { %2699 = vmatpush3.msra.mxu1 %v3553_v27  ;;  %5033 = vst [vmem:[#allocation55_spill] sm:$0xff] %v3557_v6  ;;  %v809_v29 = vmul.f32 %v3557_v6, %v3557_v6 }
  0x7f   :  { %2700 = vmatprep.subr.mxu1 %v5014_v8 }
  0x80   :  { %2701 = vmatpush3.msra.mxu1 %v3557_v6 }
  0x81   :  { %2703 = vmatmul.mubr.f32.vlgmr.msra.gmra.mxu1 %v5034_v14  ;;  %2740 = vmatprep.subr.mxu1 %v5014_v8 }
  0x82   :  { %2741 = vmatpush3.msra.mxu1 %v3117_v42  ;;  %2772 = vmatprep.mubr.msk.f32.mxu1 %vm2890_vm0, %v5014_v8 }
  0x83   :  { %2742 = vmatprep.subr.mxu1 %v5014_v8 }
  0x84   :  { %2743 = vmatpush3.msra.mxu1 %v3122_v43  ;;  %v824_v43 = vmul.f32 %v3269_v37, %v3269_v37 }
  0x85   :  { %2744 = vmatprep.subr.mxu1 %v5014_v8 }
  0x86   :  { %2745 = vmatpush3.msra.mxu1 %v3129_v44 }
  0x87   :  { %2746 = vmatprep.subr.mxu1 %v5014_v8 }
  0x88   :  { %2747 = vmatpush3.msra.mxu1 %v3136_v45 }
  0x89   :  { %2748 = vmatprep.subr.mxu1 %v5014_v8 }
  0x8a   :  { %2749 = vmatpush3.msra.mxu1 %v3143_v46  ;;  %v823_v46 = vmul.f32 %v3315_v34, %v3315_v34 }
  0x8b   :  { %2750 = vmatprep.subr.mxu1 %v5014_v8 }
  0x8c   :  { %2751 = vmatpush3.msra.mxu1 %v3150_v47  ;;  %v822_v47 = vmul.f32 %v3341_v62, %v3341_v62  ;;  %v5043_v62 = vld [vmem:[#allocation25_spill] sm:$0xff] }
  0x8d   :  { %2752 = vmatprep.subr.mxu1 %v5014_v8 }
  0x8e   :  { %2753 = vmatpush3.msra.mxu1 %v3157_v48  ;;  %v821_v48 = vmul.f32 %v3371_v59, %v3371_v59 }
  0x8f   :  { %2754 = vmatprep.subr.mxu1 %v5014_v8 }
  0x90   :  { %2755 = vmatpush3.msra.mxu1 %v3164_v49  ;;  %v820_v49 = vmul.f32 %v3389_v26, %v3389_v26  ;;  %v5047_v26 = vld [vmem:[#allocation40_spill] sm:$0xff] }
  0x91   :  { %2756 = vmatprep.subr.mxu1 %v5014_v8 }
  0x92   :  { %2757 = vmatpush3.msra.mxu1 %v3171_v50  ;;  %v819_v50 = vmul.f32 %v3417_v58, %v3417_v58 }
  0x93   :  { %2758 = vmatprep.subr.mxu1 %v5014_v8 }
  0x94   :  { %2759 = vmatpush3.msra.mxu1 %v3178_v51  ;;  %v818_v51 = vmul.f32 %v3438_v55, %v3438_v55 }
  0x95   :  { %2760 = vmatprep.subr.mxu1 %v5014_v8 }
  0x96   :  { %2761 = vmatpush3.msra.mxu1 %v3185_v52  ;;  %v817_v52 = vmul.f32 %v3459_v36, %v3459_v36 }
  0x97   :  { %2762 = vmatprep.subr.mxu1 %v5014_v8 }
  0x98   :  { %2763 = vmatpush3.msra.mxu1 %v3192_v53  ;;  %v816_v53 = vmul.f32 %v3477_v25, %v3477_v25 }
  0x99   :  { %2764 = vmatprep.subr.mxu1 %v5014_v8 }
  0x9a   :  { %2765 = vmatpush3.msra.mxu1 %v3198_v54  ;;  %v815_v54 = vmul.f32 %v3497_v15, %v3497_v15 }
  0x9b   :  { %2766 = vmatprep.subr.mxu1 %v5014_v8 }
  0x9c   :  { %2767 = vmatpush3.msra.mxu1 %v3219_v60  ;;  %v814_v60 = vmul.f32 %v3512_v21, %v3512_v21 }
  0x9d   :  { %2768 = vmatprep.subr.mxu1 %v5014_v8 }
  0x9e   :  { %2769 = vmatpush3.msra.mxu1 %v3263_v32  ;;  %v813_v32 = vmul.f32 %v3528_v24, %v3528_v24  ;;  %v4062_v24 = vld [vmem:[%s4888_s1] sm:$0xff] }
  0x9f   :  { %2770 = vmatprep.subr.mxu1 %v5014_v8 }
  0xa0   :  { %2771 = vmatpush3.msra.mxu1 %v3290_v41  ;;  %v812_v41 = vmul.f32 %v3541_v2, %v3541_v2 }
  0xa1   :  { %2810 = vmatprep.subr.mxu1 %v5014_v8 }
  0xe3   :  { %v182_v5 = vpop.f32.mrf.mxu0 }
  0xe5   :  { %v2599_v7 = vpop.f32.mrf.mxu0 }
  0xe6   :  { %v2407_v7 = vld [vmem:[%s4889_s3 + $0x67] ss:$0 sm:$0xff] }
 0x103   :  { %v268_v13 = vpop.f32.mrf.mxu0 }
 0x104   :  { %v273_v42 = vrot.slane %v268_v13, 7  ;;  %v1592_v13 = vadd.f32 %v1588_v9, %v1575_v28  ;;  %v5039_v9 = vld [vmem:[#allocation34_spill] sm:$0xff] }
 0x105   :  { %v2634_v44 = vpop.f32.mrf.mxu0 }
 0x106   :  { %v276_v45 = vsel %vm275_vm1, %v182_v5, %v273_v42  ;;  %v3672_v5 = vld [vmem:[%s4888_s1 + $0x21] sm:$0xff]  ;;  %v1605_v42 = vmul.f32 %v2405_v56, %v3431_v0  ;;  %v1587_v44 = vmul.f32 %v2404_v17, %v3447_v16 }
 0x107   :  { %2668 = vmatmul.mubr.f32.vlgmr.msra.gmra.mxu0 %v276_v45  ;;  %v1627_v45 = vadd.f32 %v1623_v57, %v1610_v35  ;;  %v3702_v57 = vld [vmem:[%s4888_s1 + $0x9] sm:$0xff] }
 0x108   :  { %2706 = vmatpush3.msra.mxu0 %v824_v43  ;;  %2737 = vmatprep.mubr.msk.f32.mxu0 %vm2890_vm0, %v5014_v8  ;;  %v1574_v43 = vmul.f32 %v2403_v18, %v3521_v39 }
 0x109   :  { %2707 = vmatprep.subr.mxu0 %v5014_v8 }
 0x10a   :  { %2708 = vmatpush3.msra.mxu0 %v823_v46  ;;  %v1640_v46 = vmul.f32 %v2407_v7, %v3672_v5 }
 0x10b   :  { %2709 = vmatprep.subr.mxu0 %v5014_v8 }
 0x10c   :  { %2710 = vmatpush3.msra.mxu0 %v822_v47  ;;  %v2408_v47 = vld [vmem:[%s4889_s3 + $0x68] ss:$0 sm:$0xff] }
 0x10d   :  { %2711 = vmatprep.subr.mxu0 %v5014_v8  ;;  %v1655_v59 = vmul.f32 %v2408_v47, %v5043_v62 }
 0x10e   :  { %2712 = vmatpush3.msra.mxu0 %v821_v48  ;;  %v1609_v48 = vadd.f32 %v1605_v42, %v1592_v13  ;;  %v2410_v13 = vld [vmem:[%s4889_s3 + $0x6a] ss:$0 sm:$0xff] }
 0x10f   :  { %2713 = vmatprep.subr.mxu0 %v5014_v8 }
 0x110   :  { %2714 = vmatpush3.msra.mxu0 %v820_v49  ;;  %v5035_v49 = vld [vmem:[#allocation36_spill] sm:$0xff] }
 0x111   :  { %2715 = vmatprep.subr.mxu0 %v5014_v8 }
 0x112   :  { %2716 = vmatpush3.msra.mxu0 %v819_v50  ;;  %v1622_v50 = vmul.f32 %v2406_v38, %v5035_v49 }
 0x113   :  { %2717 = vmatprep.subr.mxu0 %v5014_v8 }
 0x114   :  { %2718 = vmatpush3.msra.mxu0 %v818_v51  ;;  %v1591_v51 = vadd.f32 %v1587_v44, %v1574_v43  ;;  %v5040_v43 = vld [vmem:[#allocation22_spill] sm:$0xff] }
 0x115   :  { %2719 = vmatprep.subr.mxu0 %v5014_v8  ;;  %v1656_v44 = vmul.f32 %v2408_v47, %v5040_v43  ;;  %v5046_v43 = vld [vmem:[#allocation24_spill] sm:$0xff] }
 0x116   :  { %2720 = vmatpush3.msra.mxu0 %v817_v52  ;;  %v5036_v52 = vld [vmem:[#allocation45_spill] sm:$0xff] }
 0x117   :  { %2721 = vmatprep.subr.mxu0 %v5014_v8 }
 0x118   :  { %2722 = vmatpush3.msra.mxu0 %v816_v53  ;;  %v1604_v53 = vmul.f32 %v2405_v56, %v5036_v52 }
 0x119   :  { %2723 = vmatprep.subr.mxu0 %v5014_v8 }
 0x11a   :  { %2724 = vmatpush3.msra.mxu0 %v815_v54  ;;  %v1644_v54 = vadd.f32 %v1640_v46, %v1627_v45  ;;  %v1608_v1 = vadd.f32 %v1604_v53, %v1591_v51  ;;  %v1638_v46 = vmul.f32 %v2407_v7, %v3702_v57 }
 0x11b   :  { %2725 = vmatprep.subr.mxu0 %v5014_v8 }
 0x11c   :  { %2726 = vmatpush3.msra.mxu0 %v814_v60  ;;  %v5037_v60 = vld [vmem:[#allocation20_spill] sm:$0xff]  ;;  %v1625_v45 = vadd.f32 %v1621_v19, %v1608_v1  ;;  %v5044_v1 = vld [vmem:[#allocation23_spill] sm:$0xff] }
 0x11d   :  { %2727 = vmatprep.subr.mxu0 %v5014_v8 }
 0x11e   :  { %2728 = vmatpush3.msra.mxu0 %v813_v32  ;;  %v1657_v32 = vmul.f32 %v2408_v47, %v5037_v60  ;;  %v1642_v34 = vadd.f32 %v1638_v46, %v1625_v45 }
 0x11f   :  { %2729 = vmatprep.subr.mxu0 %v5014_v8 }
 0x120   :  { %2730 = vmatpush3.msra.mxu0 %v812_v41  ;;  %v3690_v41 = vld [vmem:[%s4888_s1 + $0x19] sm:$0xff]  ;;  %v1661_v28 = vadd.f32 %v1657_v32, %v1644_v54  ;;  %v2411_v54 = vld [vmem:[%s4889_s3 + $0x6b] ss:$0 sm:$0xff] }
 0x121   :  { %2731 = vmatprep.subr.mxu0 %v5014_v8  ;;  %v1639_v10 = vmul.f32 %v2407_v7, %v3690_v41  ;;  %v1708_v19 = vmul.f32 %v2411_v54, %v5044_v1 }
 0x122   :  { %2732 = vmatpush3.msra.mxu0 %v811_v12  ;;  %v1573_v12 = vmul.f32 %v2403_v18, %v3534_v40  ;;  %v1586_v18 = vmul.f32 %v2404_v17, %v3465_v30  ;;  %v5042_v17 = vld [vmem:[#allocation37_spill] sm:$0xff] }
 0x123   :  { %2733 = vmatprep.subr.mxu0 %v5014_v8 }
 0x124   :  { %2734 = vmatpush3.msra.mxu0 %v810_v22  ;;  %v2409_v22 = vld [vmem:[%s4889_s3 + $0x69] ss:$0 sm:$0xff]  ;;  %v1590_v53 = vadd.f32 %v1586_v18, %v1573_v12 }
 0x125   :  { %2735 = vmatprep.subr.mxu0 %v5014_v8  ;;  %v1674_v35 = vmul.f32 %v2409_v22, %v5039_v9  ;;  %v1673_v37 = vmul.f32 %v2409_v22, %v5042_v17  ;;  %v1672_v45 = vmul.f32 %v2409_v22, %v5047_v26 }
 0x126   :  { %2736 = vmatpush3.msra.mxu0 %v809_v29  ;;  %v1626_v29 = vadd.f32 %v1622_v50, %v1609_v48  ;;  %v5041_v50 = vld [vmem:[#allocation21_spill] sm:$0xff] }
 0x127   :  { %2738 = vmatmul.mubr.f32.vlgmr.msra.gmra.mxu0 %v5034_v14  ;;  %2775 = vmatprep.subr.mxu0 %v5014_v8  ;;  %v1678_v48 = vadd.f32 %v1674_v35, %v1661_v28  ;;  %v1691_v51 = vmul.f32 %v2410_v13, %v5041_v50  ;;  %v5045_v28 = vld [vmem:[#allocation47_spill] sm:$0xff]  ;;  %v1620_v35 = vmul.f32 %v2406_v38, %v3382_v20 }
 0x128   :  { %2807 = vmatprep.mubr.msk.f32.mxu0 %vm2890_vm0, %v5014_v8  ;;  %v1643_v42 = vadd.f32 %v1639_v10, %v1626_v29  ;;  %v3719_v29 = vld [vmem:[%s4888_s1 + $0x1] sm:$0xff]  ;;  %v1603_v12 = vmul.f32 %v2405_v56, %v5045_v28 }
 0x129   :  { %v1695_v10 = vadd.f32 %v1691_v51, %v1678_v48  ;;  %v1637_v55 = vmul.f32 %v2407_v7, %v3719_v29  ;;  %v5049_v51 = vld [vmem:[#allocation27_spill] sm:$0xff] }
 0x12a   :  { %v1660_v32 = vadd.f32 %v1656_v44, %v1643_v42  ;;  %v1690_v42 = vmul.f32 %v2410_v13, %v5046_v43  ;;  %v1659_v44 = vadd.f32 %v1655_v59, %v1642_v34  ;;  %v1607_v58 = vadd.f32 %v1603_v12, %v1590_v53  ;;  %v5050_v34 = vld [vmem:[#allocation28_spill] sm:$0xff]  ;;  %v3743_v7 = vld [vmem:[%s4889_s3 + $0x5b] ss:$0 sm:$0xff]  ;;  %v3748_v53 = vld [vmem:[%s4889_s3 + $0x5c] ss:$0 sm:$0xff] }
 0x12b   :  { %v3728_v62 = vadd.f32 %v1708_v19, %v1695_v10  ;;  %v1707_v36 = vmul.f32 %v2411_v54, %v5049_v51  ;;  %v1689_v59 = vmul.f32 %v2410_v13, %v5050_v34  ;;  %v5053_v12 = vld [vmem:[#allocation30_spill] sm:$0xff]  ;;  %v3774_v51 = vld [vmem:[%s4889_s3 + $0x5e] ss:$0 sm:$0xff] }
 0x12c   :  { %v1677_v18 = vadd.f32 %v1673_v37, %v1660_v32  ;;  %v1676_v25 = vadd.f32 %v1672_v45, %v1659_v44  ;;  %v3735_v37 = vld [vmem:[%s4889_s3 + $0x5a] ss:$0 sm:$0xff]  ;;  %v1624_v38 = vadd.f32 %v1620_v35, %v1607_v58  ;;  %v5051_v32 = vld [vmem:[#allocation29_spill] sm:$0xff]  ;;  %v5054_v35 = vld [vmem:[#allocation42_spill] sm:$0xff]  ;;  %v1453_v45 = vmul.f32 %v3748_v53, %v3411_v4 }
 0x12d   :  { %5048 = vst [vmem:[#allocation36_spill] sm:$0xff] %v3728_v62  ;;  %2776 = vmatpush3.msra.mxu0 %v3728_v62  ;;  %v1654_v10 = vmul.f32 %v2408_v47, %v5051_v32  ;;  %v1671_v47 = vmul.f32 %v2409_v22, %v5054_v35  ;;  %v3760_v44 = vld [vmem:[%s4889_s3 + $0x5d] ss:$0 sm:$0xff]  ;;  %v5057_v32 = vld [vmem:[#allocation33_spill] sm:$0xff] }
 0x12e   :  { %v1694_v48 = vadd.f32 %v1690_v42, %v1677_v18  ;;  %2777 = vmatprep.subr.mxu0 %v5014_v8  ;;  %v1706_v18 = vmul.f32 %v2411_v54, %v5053_v12  ;;  %v1693_v43 = vadd.f32 %v1689_v59, %v1676_v25  ;;  %v1641_v58 = vadd.f32 %v1637_v55, %v1624_v38  ;;  %v5056_v22 = vld [vmem:[#allocation31_spill] sm:$0xff]  ;;  %v3786_v38 = vld [vmem:[%s4889_s3 + $0x60] ss:$0 sm:$0xff]  ;;  %v3793_v12 = vld [vmem:[%s4889_s3 + $0x61] ss:$0 sm:$0xff] }
 0x12f   :  { %v1423_v42 = vmul.f32 %v3735_v37, %v3483_v61  ;;  %v1470_v34 = vmul.f32 %v3760_v44, %v3311_v33  ;;  %v3781_v59 = vld [vmem:[%s4889_s3 + $0x5f] ss:$0 sm:$0xff]  ;;  %v1422_v33 = vmul.f32 %v3735_v37, %v3505_v31 }
 0x130   :  { %v3751_v19 = vadd.f32 %v1707_v36, %v1694_v48  ;;  %v1436_v36 = vmul.f32 %v3743_v7, %v3399_v23  ;;  %v3768_v55 = vadd.f32 %v1706_v18, %v1693_v43  ;;  %v1658_v25 = vadd.f32 %v1654_v10, %v1641_v58 }
 0x131   :  { %v1688_v48 = vmul.f32 %v2410_v13, %v5056_v22  ;;  %v1705_v10 = vmul.f32 %v2411_v54, %v5057_v32  ;;  %v1487_v43 = vmul.f32 %v3774_v51, %v3672_v5  ;;  %v1435_v58 = vmul.f32 %v3743_v7, %v3426_v11 }
 0x132   :  { %5052 = vst [vmem:[#allocation45_spill] sm:$0xff] %v3751_v19  ;;  %2778 = vmatpush3.msra.mxu0 %v3751_v19  ;;  %5055 = vst [vmem:[#allocation20_spill] sm:$0xff] %v3768_v55  ;;  %v1675_v13 = vadd.f32 %v1671_v47, %v1658_v25  ;;  %v1452_v54 = vmul.f32 %v3748_v53, %v3431_v0  ;;  %v1538_v22 = vmul.f32 %v3793_v12, %v5041_v50 }
 0x133   :  { %2779 = vmatprep.subr.mxu0 %v5014_v8  ;;  %v1469_v32 = vmul.f32 %v3760_v44, %v5035_v49  ;;  %v1434_v50 = vmul.f32 %v3743_v7, %v3447_v16  ;;  %v1451_v49 = vmul.f32 %v3748_v53, %v5036_v52  ;;  %v3847_v16 = vld [vmem:[%s4891_s2 + $0x1a] sm:$0xff] }
 0x134   :  { %2780 = vmatpush3.msra.mxu0 %v3768_v55  ;;  %v1692_v47 = vadd.f32 %v1688_v48, %v1675_v13 }
 0x135   :  { %2781 = vmatprep.subr.mxu0 %v5014_v8 }
 0x136   :  { %v3822_v48 = vadd.f32 %v1705_v10, %v1692_v47  ;;  %v1520_v47 = vmul.f32 %v3786_v38, %v5042_v17 }
 0x138   :  { %5058 = vst [vmem:[#allocation38_spill] sm:$0xff] %v3822_v48  ;;  %2782 = vmatpush3.msra.mxu0 %v3822_v48  ;;  %v1120_v48 = vld [vmem:[%s4888_s1 + $0x18] sm:$0xff] }
 0x139   :  { %2783 = vmatprep.subr.mxu0 %v5014_v8 }
 0x141   :  { %v3726_v46 = vpop.f32.mrf.mxu1 }
 0x143   :  { %v2704_v56 = vpop.f32.mrf.mxu1 }
 0x144   :  { %v1440_v56 = vadd.f32 %v1436_v36, %v1423_v42  ;;  %v1504_v42 = vmul.f32 %v3781_v59, %v5037_v60  ;;  %v1521_v36 = vmul.f32 %v3786_v38, %v5039_v9  ;;  %v3820_v60 = vld [vmem:[%s4891_s2 + $0x19] sm:$0xff] }
 0x145   :  { %v3827_v9 = vld [vmem:[%s4888_s1 + $0x1a] sm:$0xff] }
 0x146   :  { %v1457_v18 = vadd.f32 %v1453_v45, %v1440_v56  ;;  %v3811_v45 = vld [vmem:[%s4889_s3 + $0x62] ss:$0 sm:$0xff]  ;;  %v1439_v56 = vadd.f32 %v1435_v58, %v1422_v33  ;;  %v1503_v58 = vmul.f32 %v3781_v59, %v3820_v60  ;;  %v1537_v17 = vmul.f32 %v3793_v12, %v3827_v9 }
 0x147   :  { %v1555_v33 = vmul.f32 %v3811_v45, %v5044_v1  ;;  %v1468_v1 = vmul.f32 %v3760_v44, %v5038_v63  ;;  %v3864_v63 = vld [vmem:[%s4888_s1 + $0xa] sm:$0xff] }
 0x148   :  { %v1474_v25 = vadd.f32 %v1470_v34, %v1457_v18  ;;  %v1421_v34 = vmul.f32 %v3735_v37, %v3521_v39  ;;  %v1456_v10 = vadd.f32 %v1452_v54, %v1439_v56  ;;  %v1486_v18 = vmul.f32 %v3774_v51, %v3690_v41 }
 0x149   :  { %v1485_v56 = vmul.f32 %v3774_v51, %v3702_v57 }
 0x14a   :  { %v1491_v13 = vadd.f32 %v1487_v43, %v1474_v25  ;;  %v1438_v52 = vadd.f32 %v1434_v50, %v1421_v34  ;;  %v3854_v43 = vld [vmem:[%s4891_s2 + $0x9] sm:$0xff]  ;;  %v1473_v25 = vadd.f32 %v1469_v32, %v1456_v10  ;;  %v1420_v34 = vmul.f32 %v3735_v37, %v3534_v40 }
 0x14b   :  { %v1433_v50 = vmul.f32 %v3743_v7, %v3465_v30  ;;  %v1554_v10 = vmul.f32 %v3811_v45, %v3847_v16  ;;  %v3884_v30 = vld [vmem:[%s4889_s3 + $0x52] ss:$0 sm:$0xff] }
 0x14c   :  { %v1508_v54 = vadd.f32 %v1504_v42, %v1491_v13  ;;  %v1455_v15 = vadd.f32 %v1451_v49, %v1438_v52  ;;  %v1450_v42 = vmul.f32 %v3748_v53, %v5045_v28  ;;  %v1490_v13 = vadd.f32 %v1486_v18, %v1473_v25  ;;  %v3879_v52 = vld [vmem:[%s4889_s3 + $0x51] ss:$0 sm:$0xff]  ;;  %v3898_v18 = vld [vmem:[%s4889_s3 + $0x53] ss:$0 sm:$0xff] }
 0x14d   :  { %v1502_v49 = vmul.f32 %v3781_v59, %v3854_v43  ;;  %v1519_v28 = vmul.f32 %v3786_v38, %v5047_v26  ;;  %v1437_v7 = vadd.f32 %v1433_v50, %v1420_v34  ;;  %v1467_v53 = vmul.f32 %v3760_v44, %v3382_v20  ;;  %v3907_v20 = vld [vmem:[%s4892_s0 + $0x21] sm:$0xff]  ;;  %v3912_v44 = vld [vmem:[%s4889_s3 + $0x54] ss:$0 sm:$0xff] }
 0x14e   :  { %v1525_v32 = vadd.f32 %v1521_v36, %v1508_v54  ;;  %v1472_v37 = vadd.f32 %v1468_v1, %v1455_v15  ;;  %v3893_v36 = vld [vmem:[%s4891_s2 + $0x1] sm:$0xff]  ;;  %v1507_v25 = vadd.f32 %v1503_v58, %v1490_v13  ;;  %v1536_v15 = vmul.f32 %v3793_v12, %v3864_v63 }
 0x14f   :  { %v1484_v26 = vmul.f32 %v3774_v51, %v3719_v29  ;;  %v1454_v58 = vadd.f32 %v1450_v42, %v1437_v7  ;;  %v3922_v51 = vld [vmem:[%s4888_s1 + $0x2] sm:$0xff]  ;;  %v1270_v34 = vmul.f32 %v3879_v52, %v3483_v61  ;;  %v1283_v50 = vmul.f32 %v3884_v30, %v3399_v23 }
 0x150   :  { %v1542_v54 = vadd.f32 %v1538_v22, %v1525_v32  ;;  %v1489_v1 = vadd.f32 %v1485_v56, %v1472_v37  ;;  %v3917_v22 = vld [vmem:[%s4891_s2 + $0xa] sm:$0xff]  ;;  %v1524_v56 = vadd.f32 %v1520_v47, %v1507_v25  ;;  %v1501_v13 = vmul.f32 %v3781_v59, %v3893_v36  ;;  %v3937_v37 = vld [vmem:[%s4889_s3 + $0x55] ss:$0 sm:$0xff] }
 0x151   :  { %v1300_v42 = vmul.f32 %v3898_v18, %v3411_v4  ;;  %v1471_v21 = vadd.f32 %v1467_v53, %v1454_v58  ;;  %v1287_v61 = vadd.f32 %v1283_v50, %v1270_v34  ;;  %v1317_v23 = vmul.f32 %v3912_v44, %v3907_v20  ;;  %v3949_v4 = vld [vmem:[%s4889_s3 + $0x56] ss:$0 sm:$0xff] }
 0x152   :  { %v3928_v32 = vadd.f32 %v1555_v33, %v1542_v54  ;;  %v1506_v7 = vadd.f32 %v1502_v49, %v1489_v1  ;;  %v3944_v33 = vld [vmem:[%s4891_s2 + $0x21] sm:$0xff]  ;;  %v1541_v59 = vadd.f32 %v1537_v17, %v1524_v56  ;;  %v1553_v47 = vmul.f32 %v3811_v45, %v3917_v22 }
 0x153   :  { %v1518_v49 = vmul.f32 %v3786_v38, %v5054_v35  ;;  %v1535_v53 = vmul.f32 %v3793_v12, %v3922_v51  ;;  %v1488_v25 = vadd.f32 %v1484_v26, %v1471_v21  ;;  %v3962_v1 = vld [vmem:[%s4891_s2 + $0x2] sm:$0xff]  ;;  %v1304_v58 = vadd.f32 %v1300_v42, %v1287_v61  ;;  %v3969_v35 = vld [vmem:[%s4892_s0 + $0x19] sm:$0xff] }
 0x154   :  { %5059 = vst [vmem:[#allocation34_spill] sm:$0xff] %v3928_v32  ;;  %2784 = vmatpush3.msra.mxu0 %v3928_v32  ;;  %v1523_v54 = vadd.f32 %v1519_v28, %v1506_v7  ;;  %v1334_v17 = vmul.f32 %v3937_v37, %v3672_v5  ;;  %v3971_v38 = vadd.f32 %v1554_v10, %v1541_v59  ;;  %v3978_v21 = vld [vmem:[%s4892_s0 + $0x22] sm:$0xff]  ;;  %v3983_v28 = vld [vmem:[%s4889_s3 + $0x57] ss:$0 sm:$0xff]  ;;  %v1107_v32 = vld [vmem:[%s4892_s0 + $0x18] sm:$0xff] }
 0x155   :  { %2785 = vmatprep.subr.mxu0 %v5014_v8  ;;  %v1351_v12 = vmul.f32 %v3949_v4, %v3944_v33  ;;  %v1269_v26 = vmul.f32 %v3879_v52, %v3505_v31  ;;  %v1282_v10 = vmul.f32 %v3884_v30, %v3426_v11  ;;  %v1505_v50 = vadd.f32 %v1501_v13, %v1488_v25  ;;  %v3997_v61 = vld [vmem:[%s4888_s1 + $0x22] sm:$0xff]  ;;  %v4002_v31 = vld [vmem:[%s4889_s3 + $0x58] ss:$0 sm:$0xff] }
 0x156   :  { %5060 = vst [vmem:[#allocation22_spill] sm:$0xff] %v3971_v38  ;;  %v1540_v34 = vadd.f32 %v1536_v15, %v1523_v54  ;;  %v1321_v56 = vadd.f32 %v1317_v23, %v1304_v58  ;;  %v1299_v42 = vmul.f32 %v3898_v18, %v3431_v0  ;;  %2786 = vmatpush3.msra.mxu0 %v3971_v38  ;;  %v4014_v59 = vld [vmem:[%s4888_s1 + $0x8] sm:$0xff] }
 0x157   :  { %v1552_v7 = vmul.f32 %v3811_v45, %v3962_v1  ;;  %v1286_v11 = vadd.f32 %v1282_v10, %v1269_v26  ;;  %v1316_v15 = vmul.f32 %v3912_v44, %v3969_v35  ;;  %2787 = vmatprep.subr.mxu0 %v5014_v8  ;;  %v1522_v13 = vadd.f32 %v1518_v49, %v1505_v50  ;;  %v4019_v54 = vld [vmem:[%s4891_s2 + $0x8] sm:$0xff]  ;;  %v4029_v49 = vld [vmem:[%s4889_s3 + $0x59] ss:$0 sm:$0xff] }
 0x158   :  { %v4007_v0 = vadd.f32 %v1553_v47, %v1540_v34  ;;  %v1338_v45 = vadd.f32 %v1334_v17, %v1321_v56  ;;  %v1368_v23 = vmul.f32 %v3983_v28, %v3978_v21  ;;  %v4024_v47 = vld [vmem:[%s4891_s2 + $0x22] sm:$0xff]  ;;  %v1333_v58 = vmul.f32 %v3937_v37, %v3690_v41  ;;  %v4039_v34 = vld [vmem:[%s4892_s0 + $0x1a] sm:$0xff]  ;;  %v4130_v38 = vld [vmem:[%s4889_s3 + $0x4b] ss:$0 sm:$0xff] }
 0x159   :  { %v1303_v25 = vadd.f32 %v1299_v42, %v1286_v11  ;;  %v1539_v17 = vadd.f32 %v1535_v53, %v1522_v13  ;;  %v1385_v10 = vmul.f32 %v4002_v31, %v3997_v61  ;;  %v1268_v50 = vmul.f32 %v3879_v52, %v3521_v39  ;;  %v4046_v56 = vld [vmem:[%s4892_s0 + $0x9] sm:$0xff] }
 0x15a   :  { %5061 = vst [vmem:[#allocation21_spill] sm:$0xff] %v4007_v0  ;;  %2788 = vmatpush3.msra.mxu0 %v4007_v0  ;;  %v1355_v26 = vadd.f32 %v1351_v12, %v1338_v45  ;;  %v1350_v12 = vmul.f32 %v3949_v4, %v3820_v60  ;;  %v1281_v42 = vmul.f32 %v3884_v30, %v4014_v59  ;;  %v4125_v0 = vld [vmem:[%s4889_s3 + $0x4a] ss:$0 sm:$0xff] }
 0x15b   :  { %2789 = vmatprep.subr.mxu0 %v5014_v8  ;;  %v1320_v53 = vadd.f32 %v1316_v15, %v1303_v25  ;;  %v1298_v11 = vmul.f32 %v3898_v18, %v4019_v54  ;;  %v4055_v13 = vadd.f32 %v1552_v7, %v1539_v17  ;;  %v1402_v45 = vmul.f32 %v4029_v49, %v4024_v47  ;;  %v4067_v15 = vld [vmem:[%s4891_s2] sm:$0xff] }
 0x15c   :  { %v1372_v39 = vadd.f32 %v1368_v23, %v1355_v26  ;;  %v1367_v2 = vmul.f32 %v3983_v28, %v4039_v34  ;;  %v1285_v7 = vadd.f32 %v1281_v42, %v1268_v50  ;;  %v1315_v23 = vmul.f32 %v3912_v44, %v4046_v56 }
 0x15d   :  { %5062 = vst [vmem:[#allocation37_spill] sm:$0xff] %v4055_v13  ;;  %v1337_v25 = vadd.f32 %v1333_v58, %v1320_v53  ;;  %2790 = vmatpush3.msra.mxu0 %v4055_v13  ;;  %v1384_v26 = vmul.f32 %v4002_v31, %v3827_v9  ;;  %v1332_v3 = vmul.f32 %v3937_v37, %v3702_v57  ;;  %v4083_v58 = vld [vmem:[%s4892_s0 + $0x1] sm:$0xff] }
 0x15e   :  { %v1389_v17 = vadd.f32 %v1385_v10, %v1372_v39  ;;  %v1267_v27 = vmul.f32 %v3879_v52, %v3534_v40  ;;  %2791 = vmatprep.subr.mxu0 %v5014_v8  ;;  %v1302_v53 = vadd.f32 %v1298_v11, %v1285_v7  ;;  %v4089_v10 = vld [vmem:[%s4892_s0 + $0xa] sm:$0xff]  ;;  %v1280_v42 = vmul.f32 %v3884_v30, %v4062_v24  ;;  %v1108_v52 = vld [vmem:[%s4892_s0 + $0x20] sm:$0xff] }
 0x15f   :  { %v1354_v50 = vadd.f32 %v1350_v12, %v1337_v25  ;;  %v1297_v40 = vmul.f32 %v3898_v18, %v4067_v15  ;;  %v4101_v12 = vld [vmem:[%s4889_s3 + $0x48] ss:$0 sm:$0xff]  ;;  %v1401_v39 = vmul.f32 %v4029_v49, %v3847_v16  ;;  %v1349_v30 = vmul.f32 %v3949_v4, %v3854_v43  ;;  %v1121_v18 = vld [vmem:[%s4888_s1 + $0x20] sm:$0xff]  ;;  %v4115_v25 = vld [vmem:[%s4889_s3 + $0x49] ss:$0 sm:$0xff] }
 0x160   :  { %v4103_v11 = vadd.f32 %v1402_v45, %v1389_v17  ;;  %v1319_v6 = vadd.f32 %v1315_v23, %v1302_v53  ;;  %v1284_v13 = vadd.f32 %v1280_v42, %v1267_v27  ;;  %v1314_v45 = vmul.f32 %v3912_v44, %v4083_v58  ;;  %v1138_v17 = vld [vmem:[%s4891_s2 + $0x20] sm:$0xff] }
 0x161   :  { %v1371_v7 = vadd.f32 %v1367_v2, %v1354_v50  ;;  %v1366_v2 = vmul.f32 %v3983_v28, %v4089_v10  ;;  %v1331_v27 = vmul.f32 %v3937_v37, %v3719_v29  ;;  %v1117_v44 = vmul.f32 %v4101_v12, %v1108_v52  ;;  %v4142_v42 = vld [vmem:[%s4892_s0 + $0x2] sm:$0xff] }
 0x162   :  { %5063 = vst [vmem:[#allocation25_spill] sm:$0xff] %v4103_v11  ;;  %2792 = vmatpush3.msra.mxu0 %v4103_v11  ;;  %v1336_v50 = vadd.f32 %v1332_v3, %v1319_v6  ;;  %v1301_v53 = vadd.f32 %v1297_v40, %v1284_v13  ;;  %v1130_v11 = vmul.f32 %v4115_v25, %v1121_v18  ;;  %v4158_v13 = vld [vmem:[%s4889_s3 + $0x4c] ss:$0 sm:$0xff] }
 0x163   :  { %2793 = vmatprep.subr.mxu0 %v5014_v8  ;;  %v1388_v23 = vadd.f32 %v1384_v26, %v1371_v7  ;;  %v1383_v37 = vmul.f32 %v4002_v31, %v3864_v63  ;;  %v1348_v52 = vmul.f32 %v3949_v4, %v3893_v36  ;;  %v1147_v3 = vmul.f32 %v4125_v0, %v1138_v17  ;;  %v1137_v4 = vld [vmem:[%s4891_s2 + $0x18] sm:$0xff] }
 0x164   :  { %v1164_v6 = vmul.f32 %v4130_v38, %v3907_v20  ;;  %v1353_v40 = vadd.f32 %v1349_v30, %v1336_v50  ;;  %v1318_v18 = vadd.f32 %v1314_v45, %v1301_v53  ;;  %v1134_v7 = vadd.f32 %v1130_v11, %v1117_v44  ;;  %v4184_v50 = vld [vmem:[%s4889_s3 + $0x4e] ss:$0 sm:$0xff] }
 0x165   :  { %v4160_v26 = vadd.f32 %v1401_v39, %v1388_v23  ;;  %v1400_v20 = vmul.f32 %v4029_v49, %v3917_v22  ;;  %v1365_v17 = vmul.f32 %v3983_v28, %v4142_v42  ;;  %v4175_v39 = vld [vmem:[%s4889_s3 + $0x4d] ss:$0 sm:$0xff]  ;;  %v1116_v11 = vmul.f32 %v4101_v12, %v1107_v32 }
 0x166   :  { %v1370_v30 = vadd.f32 %v1366_v2, %v1353_v40  ;;  %v1335_v45 = vadd.f32 %v1331_v27, %v1318_v18  ;;  %v1151_v44 = vadd.f32 %v1147_v3, %v1134_v7  ;;  %v1181_v23 = vmul.f32 %v4158_v13, %v3672_v5  ;;  %v1106_v2 = vld [vmem:[%s4892_s0 + $0x8] sm:$0xff] }
 0x167   :  { %2794 = vmatpush3.msra.mxu0 %v4160_v26  ;;  %v1382_v28 = vmul.f32 %v4002_v31, %v3922_v51  ;;  %v1129_v32 = vmul.f32 %v4115_v25, %v1120_v48  ;;  %v1146_v53 = vmul.f32 %v4125_v0, %v1137_v4  ;;  %v1198_v40 = vmul.f32 %v4175_v39, %v3944_v33  ;;  %v4203_v48 = vld [vmem:[%s4889_s3 + $0x4f] ss:$0 sm:$0xff] }
 0x168   :  { %2795 = vmatprep.subr.mxu0 %v5014_v8  ;;  %v1387_v27 = vadd.f32 %v1383_v37, %v1370_v30  ;;  %v1352_v5 = vadd.f32 %v1348_v52, %v1335_v45  ;;  %v1168_v3 = vadd.f32 %v1164_v6, %v1151_v44  ;;  %v1399_v18 = vmul.f32 %v4029_v49, %v3962_v1  ;;  %v4208_v37 = vld [vmem:[%s4889_s3 + $0x50] ss:$0 sm:$0xff] }
 0x169   :  { %v1215_v31 = vmul.f32 %v4184_v50, %v3978_v21  ;;  %v1133_v52 = vadd.f32 %v1129_v32, %v1116_v11  ;;  %v1163_v33 = vmul.f32 %v4130_v38, %v3969_v35  ;;  %v1115_v21 = vmul.f32 %v4101_v12, %v1106_v2 }
 0x16a   :  { %v4212_v6 = vadd.f32 %v1400_v20, %v1387_v27  ;;  %v1369_v49 = vadd.f32 %v1365_v17, %v1352_v5  ;;  %v1185_v7 = vadd.f32 %v1181_v23, %v1168_v3  ;;  %v1180_v30 = vmul.f32 %v4158_v13, %v3690_v41  ;;  %v1105_v41 = vld [vmem:[%s4892_s0] sm:$0xff] }
 0x16b   :  { %v1150_v4 = vadd.f32 %v1146_v53, %v1133_v52  ;;  %v1128_v45 = vmul.f32 %v4115_v25, %v4014_v59  ;;  %v1145_v44 = vmul.f32 %v4125_v0, %v4019_v54  ;;  %v1232_v20 = vmul.f32 %v4203_v48, %v3997_v61 }
 0x16c   :  { %2796 = vmatpush3.msra.mxu0 %v4212_v6  ;;  %v1386_v11 = vadd.f32 %v1382_v28, %v1369_v49  ;;  %v1202_v35 = vadd.f32 %v1198_v40, %v1185_v7  ;;  %v1249_v17 = vmul.f32 %v4208_v37, %v4024_v47  ;;  %v1197_v54 = vmul.f32 %v4175_v39, %v3820_v60 }
 0x16d   :  { %2797 = vmatprep.subr.mxu0 %v5014_v8  ;;  %v1167_v59 = vadd.f32 %v1163_v33, %v1150_v4  ;;  %v1132_v23 = vadd.f32 %v1128_v45, %v1115_v21  ;;  %v1162_v28 = vmul.f32 %v4130_v38, %v4046_v56  ;;  %v1214_v47 = vmul.f32 %v4184_v50, %v4039_v34 }
 0x16e   :  { %v4234_v32 = vadd.f32 %v1399_v18, %v1386_v11  ;;  %v1219_v61 = vadd.f32 %v1215_v31, %v1202_v35  ;;  %v1179_v53 = vmul.f32 %v4158_v13, %v3702_v57  ;;  %v1114_v5 = vmul.f32 %v4101_v12, %v1105_v41 }
 0x16f   :  { %v1184_v2 = vadd.f32 %v1180_v30, %v1167_v59  ;;  %v1149_v27 = vadd.f32 %v1145_v44, %v1132_v23  ;;  %v1127_v60 = vmul.f32 %v4115_v25, %v4062_v24  ;;  %v1231_v56 = vmul.f32 %v4203_v48, %v3827_v9 }
 0x170   :  { %2798 = vmatpush3.msra.mxu0 %v4234_v32  ;;  %v1236_v3 = vadd.f32 %v1232_v20, %v1219_v61  ;;  %v1196_v40 = vmul.f32 %v4175_v39, %v3854_v43  ;;  %v1144_v34 = vmul.f32 %v4125_v0, %v4067_v15  ;;  %v1161_v24 = vmul.f32 %v4130_v38, %v4083_v58 }
 0x171   :  { %2799 = vmatprep.subr.mxu0 %v5014_v8  ;;  %v1201_v57 = vadd.f32 %v1197_v54, %v1184_v2  ;;  %v1166_v18 = vadd.f32 %v1162_v28, %v1149_v27  ;;  %v1131_v12 = vadd.f32 %v1127_v60, %v1114_v5  ;;  %v1248_v31 = vmul.f32 %v4208_v37, %v3847_v16  ;;  %v5066_v54 = vld [vmem:[#allocation22_spill] sm:$0xff]  ;;  %v5067_v28 = vld [vmem:[#allocation21_spill] sm:$0xff] }
 0x172   :  { %v4253_v25 = vadd.f32 %v1249_v17, %v1236_v3  ;;  %v1213_v9 = vmul.f32 %v4184_v50, %v4089_v10  ;;  %v1178_v0 = vmul.f32 %v4158_v13, %v3719_v29  ;;  %v1230_v15 = vmul.f32 %v4203_v48, %v3864_v63  ;;  %v5064_v17 = vld [vmem:[#allocation38_spill] sm:$0xff]  ;;  %v5069_v2 = vld [vmem:[#allocation25_spill] sm:$0xff] }
 0x173   :  { %v1218_v43 = vadd.f32 %v1214_v47, %v1201_v57  ;;  %v1183_v52 = vadd.f32 %v1179_v53, %v1166_v18  ;;  %v1148_v33 = vadd.f32 %v1144_v34, %v1131_v12  ;;  %v1195_v16 = vmul.f32 %v4175_v39, %v3893_v36  ;;  %v5068_v47 = vld [vmem:[#allocation37_spill] sm:$0xff]  ;;  %v1908_v18 = vld [vmem:[%s4890_s6 + $0x78] sm:$0xff]  ;;  %v1907_v12 = vld [vmem:[%s4890_s6 + $0x70] sm:$0xff] }
 0x174   :  { %2800 = vmatpush3.msra.mxu0 %v4253_v25  ;;  %v1247_v10 = vmul.f32 %v4208_v37, %v3917_v22  ;;  %v1212_v13 = vmul.f32 %v4184_v50, %v4142_v42  ;;  %v1229_v30 = vmul.f32 %v4203_v48, %v3922_v51  ;;  %v1246_v22 = vmul.f32 %v4208_v37, %v3962_v1 }
 0x175   :  { %2801 = vmatprep.subr.mxu0 %v5014_v8  ;;  %v1235_v38 = vadd.f32 %v1231_v56, %v1218_v43  ;;  %v1200_v58 = vadd.f32 %v1196_v40, %v1183_v52  ;;  %v1165_v49 = vadd.f32 %v1161_v24, %v1148_v33  ;;  %v1818_v37 = vmul.f32 %v3728_v62, %v3728_v62  ;;  %v1905_v24 = vld [vmem:[%s4890_s6 + $0x60] sm:$0xff]  ;;  %v1902_v43 = vld [vmem:[%s4890_s6 + $0x48] sm:$0xff]  ;;  %v1900_v33 = vld [vmem:[%s4890_s6 + $0x38] sm:$0xff] }
 0x176   :  { %v1817_v35 = vmul.f32 %v3751_v19, %v3751_v19  ;;  %v1816_v20 = vmul.f32 %v3768_v55, %v3768_v55  ;;  %v1815_v41 = vmul.f32 %v5064_v17, %v5064_v17  ;;  %v1813_v23 = vmul.f32 %v5066_v54, %v5066_v54  ;;  %v1901_v52 = vld [vmem:[%s4890_s6 + $0x40] sm:$0xff] }
 0x177   :  { %v4269_v7 = vadd.f32 %v1248_v31, %v1235_v38  ;;  %v1217_v21 = vadd.f32 %v1213_v9, %v1200_v58  ;;  %v1182_v29 = vadd.f32 %v1178_v0, %v1165_v49  ;;  %v1812_v61 = vmul.f32 %v5067_v28, %v5067_v28  ;;  %v1904_v31 = vld [vmem:[%s4890_s6 + $0x58] sm:$0xff]  ;;  %v1903_v9 = vld [vmem:[%s4890_s6 + $0x50] sm:$0xff]  ;;  %v1897_v38 = vld [vmem:[%s4890_s6 + $0x20] sm:$0xff] }
 0x178   :  { %v1811_v53 = vmul.f32 %v5068_v47, %v5068_v47  ;;  %v1810_v27 = vmul.f32 %v5069_v2, %v5069_v2  ;;  %v1809_v5 = vmul.f32 %v4160_v26, %v4160_v26  ;;  %v1808_v60 = vmul.f32 %v4212_v6, %v4212_v6  ;;  %v1899_v0 = vld [vmem:[%s4890_s6 + $0x30] sm:$0xff]  ;;  %v1896_v58 = vld [vmem:[%s4890_s6 + $0x18] sm:$0xff] }
 0x179   :  { %2802 = vmatpush3.msra.mxu0 %v4269_v7  ;;  %v1234_v63 = vadd.f32 %v1230_v15, %v1217_v21  ;;  %v1199_v4 = vadd.f32 %v1195_v16, %v1182_v29  ;;  %v1807_v3 = vmul.f32 %v4234_v32, %v4234_v32  ;;  %v1806_v56 = vmul.f32 %v4253_v25, %v4253_v25  ;;  %v1898_v15 = vld [vmem:[%s4890_s6 + $0x28] sm:$0xff]  ;;  %v1895_v49 = vld [vmem:[%s4890_s6 + $0x10] sm:$0xff] }
 0x17a   :  { %2803 = vmatprep.subr.mxu0 %v5014_v8  ;;  %v1805_v40 = vmul.f32 %v4269_v7, %v4269_v7  ;;  %v1894_v16 = vld [vmem:[%s4890_s6 + $0x8] sm:$0xff] }
 0x17b   :  { %v4277_v36 = vadd.f32 %v1247_v10, %v1234_v63  ;;  %v1216_v39 = vadd.f32 %v1212_v13, %v1199_v4  ;;  %v1893_v10 = vld [vmem:[%s4890_s6] sm:$0xff] }
 0x17d   :  { %2804 = vmatpush3.msra.mxu0 %v4277_v36  ;;  %v1233_v45 = vadd.f32 %v1229_v30, %v1216_v39  ;;  %v1804_v34 = vmul.f32 %v4277_v36, %v4277_v36 }
 0x17e   :  { %2805 = vmatprep.subr.mxu0 %v5014_v8 }
 0x17f   :  { %v4283_v42 = vadd.f32 %v1246_v22, %v1233_v45 }
 0x181   :  { %2806 = vmatpush3.msra.mxu0 %v4283_v42  ;;  %v1803_v57 = vmul.f32 %v4283_v42, %v4283_v42 }
 0x182   :  { %2808 = vmatmul.mubr.f32.vlgmr.msra.gmra.mxu0 %v5034_v14  ;;  %2845 = vmatprep.subr.mxu0 %v5014_v8 }
 0x183   :  { %2877 = vmatprep.mubr.msk.f32.mxu0 %vm2890_vm0, %v5014_v8  ;;  %2846 = vmatpush3.msra.mxu0 %v1908_v18 }
 0x184   :  { %2847 = vmatprep.subr.mxu0 %v5014_v8 }
 0x185   :  { %2848 = vmatpush3.msra.mxu0 %v1907_v12 }
 0x186   :  { %2849 = vmatprep.subr.mxu0 %v5014_v8 }
 0x1c7   :  { %v4290_v51 = vpop.f32.mrf.mxu0 }
 0x1c8   :  { %v363_v13 = vmul.f32 0.00048828125, %v4290_v51 }
 0x1c9   :  { %v2669_v50 = vpop.f32.mrf.mxu0 }
 0x1ca   :  { %v364_v63 = vmul.f32 %v363_v13, %v363_v13  ;;  %v369_v50 = vld [vmem:[%s4893_s4] sm:$0x1] }
 0x1cc   :  { %v366_v4 = vrot.slane %v364_v63, 7  ;;  %v5081_v63 = vld [vmem:[#allocation9_spill] sm:$0xff] }
 0x1ce   :  { %v368_v30 = vsub.f32 %v363_v13, %v366_v4 }
 0x1d0   :  { %v370_v39 = vadd.f32 1e-05, %v368_v30  ;;  %v5082_v30 = vld [vmem:[#allocation8_spill] sm:$0xff] }
 0x1d2   :  { %2883 = vrsqrt.f32 %v370_v39 }
 0x1df   :  { %v2884_v22 = vpop.eup %2883 }
 0x1e0   :  { %v373_v45 = vrot.slane %v2884_v22, 1 }
 0x1e7   :  { %v891_v1 = vpop.f32.mrf.mxu0 }
 0x1e8   :  { %v896_v48 = vrot.slane %v891_v1, 7 }
 0x1e9   :  { %v2739_v44 = vpop.f32.mrf.mxu0 }
 0x1ea   :  { %v898_v11 = vsel %vm275_vm1, %v3726_v46, %v896_v48  ;;  %v5065_v46 = vld [vmem:[#allocation34_spill] sm:$0xff]  ;;  %v379_v48 = vlaneseq }
 0x1eb   :  { %2773 = vmatmul.mubr.f32.vlgmr.msra.gmra.mxu1 %v898_v11  ;;  %v1814_v59 = vmul.f32 %v5065_v46, %v5065_v46  ;;  %v375_v11 = vmul.f32 %v373_v45, %v369_v50 }
 0x1ec   :  { %2811 = vmatpush3.msra.mxu1 %v1818_v37  ;;  %2842 = vmatprep.mubr.msk.f32.mxu1 %vm2890_vm0, %v5014_v8 }
 0x1ed   :  { %2812 = vmatprep.subr.mxu1 %v5014_v8 }
 0x1ee   :  { %2813 = vmatpush3.msra.mxu1 %v1817_v35 }
 0x1ef   :  { %2814 = vmatprep.subr.mxu1 %v5014_v8 }
 0x1f0   :  { %2815 = vmatpush3.msra.mxu1 %v1816_v20  ;;  %v4414_v20 = vshrl.u32 %v379_v48, 7 }
 0x1f1   :  { %2816 = vmatprep.subr.mxu1 %v5014_v8 }
 0x1f2   :  { %2817 = vmatpush3.msra.mxu1 %v1815_v41  ;;  %5070 = vst [vmem:[#allocation23_spill] sm:$0xff] %v4414_v20  ;;  %v377_v41 = vmul.f32 %v375_v11, %v363_v13 }
 0x1f3   :  { %2818 = vmatprep.subr.mxu1 %v5014_v8 }
 0x1f4   :  { %2819 = vmatpush3.msra.mxu1 %v1814_v59 }
 0x1f5   :  { %2820 = vmatprep.subr.mxu1 %v5014_v8 }
 0x1f6   :  { %2821 = vmatpush3.msra.mxu1 %v1813_v23  ;;  %v376_v23 = vld [vmem:[%s4894_s5] sm:$0x1] }
 0x1f7   :  { %2822 = vmatprep.subr.mxu1 %v5014_v8 }
 0x1f8   :  { %2823 = vmatpush3.msra.mxu1 %v1812_v61  ;;  %v4420_v61 = vsub.s32 0, %v4414_v20 }
 0x1f9   :  { %2824 = vmatprep.subr.mxu1 %v5014_v8 }
 0x1fa   :  { %2825 = vmatpush3.msra.mxu1 %v1811_v53 }
 0x1fb   :  { %2826 = vmatprep.subr.mxu1 %v5014_v8 }
 0x1fc   :  { %2827 = vmatpush3.msra.mxu1 %v1810_v27  ;;  %v378_v27 = vsub.f32 %v376_v23, %v377_v41 }
 0x1fd   :  { %2828 = vmatprep.subr.mxu1 %v5014_v8 }
 0x1fe   :  { %2829 = vmatpush3.msra.mxu1 %v1809_v5  ;;  %v382_v5 = vrot.slane %v375_v11, %v4420_v61  ;;  %v5099_v11 = vld [vmem:[#allocation39_spill] sm:$0xff] }
 0x1ff   :  { %2830 = vmatprep.subr.mxu1 %v5014_v8 }
 0x200   :  { %2831 = vmatpush3.msra.mxu1 %v1808_v60  ;;  %v402_v60 = vrot.slane %v378_v27, %v4420_v61  ;;  %v393_v4 = vmul.f32 %v382_v5, %v5081_v63  ;;  %v394_v39 = vmul.f32 %v382_v5, %v5082_v30  ;;  %v5084_v27 = vld [vmem:[#allocation6_spill] sm:$0xff] }
 0x201   :  { %2832 = vmatprep.subr.mxu1 %v5014_v8 }
 0x202   :  { %2833 = vmatpush3.msra.mxu1 %v1807_v3  ;;  %v5071_v3 = vld [vmem:[#allocation19_spill] sm:$0xff] }
 0x203   :  { %2834 = vmatprep.subr.mxu1 %v5014_v8 }
 0x204   :  { %2835 = vmatpush3.msra.mxu1 %v1806_v56  ;;  %v383_v56 = vmul.f32 %v382_v5, %v5071_v3  ;;  %v396_v3 = vmul.f32 %v382_v5, %v5084_v27 }
 0x205   :  { %2836 = vmatprep.subr.mxu1 %v5014_v8 }
 0x206   :  { %2837 = vmatpush3.msra.mxu1 %v1805_v40  ;;  %v5072_v40 = vld [vmem:[#allocation18_spill] sm:$0xff]  ;;  %v4427_v12 = vadd.f32 %v402_v60, %v383_v56  ;;  %v5085_v56 = vld [vmem:[#allocation5_spill] sm:$0xff] }
 0x207   :  { %2838 = vmatprep.subr.mxu1 %v5014_v8 }
 0x208   :  { %2839 = vmatpush3.msra.mxu1 %v1804_v34  ;;  %v384_v34 = vmul.f32 %v382_v5, %v5072_v40  ;;  %v397_v40 = vmul.f32 %v382_v5, %v5085_v56 }
 0x209   :  { %2840 = vmatprep.subr.mxu1 %v5014_v8 }
 0x20a   :  { %2841 = vmatpush3.msra.mxu1 %v1803_v57  ;;  %v5073_v57 = vld [vmem:[#allocation17_spill] sm:$0xff] }
 0x20b   :  { %2843 = vmatmul.mubr.f32.vlgmr.msra.gmra.mxu1 %v5034_v14  ;;  %v1906_v14 = vld [vmem:[%s4890_s6 + $0x68] sm:$0xff]  ;;  %v385_v18 = vmul.f32 %v382_v5, %v5073_v57 }
 0x20c   :  { %2223 = vmatprep.mubr.f32.mxu1 %v5014_v8  ;;  %2850 = vmatpush3.msra.mxu0 %v1906_v14  ;;  %v4429_v14 = vadd.f32 %v402_v60, %v384_v34 }
 0x20d   :  { %2851 = vmatprep.subr.mxu0 %v5014_v8 }
 0x20e   :  { %2852 = vmatpush3.msra.mxu0 %v1905_v24  ;;  %v5074_v24 = vld [vmem:[#allocation16_spill] sm:$0xff] }
 0x20f   :  { %2853 = vmatprep.subr.mxu0 %v5014_v8 }
 0x210   :  { %2854 = vmatpush3.msra.mxu0 %v1904_v31  ;;  %v386_v31 = vmul.f32 %v382_v5, %v5074_v24  ;;  %v4467_v24 = vadd.f32 %v402_v60, %v394_v39 }
 0x211   :  { %2855 = vmatprep.subr.mxu0 %v5014_v8 }
 0x212   :  { %2856 = vmatpush3.msra.mxu0 %v1903_v9  ;;  %v5075_v9 = vld [vmem:[#allocation15_spill] sm:$0xff]  ;;  %v4442_v22 = vadd.f32 %v402_v60, %v386_v31 }
 0x213   :  { %2857 = vmatprep.subr.mxu0 %v5014_v8 }
 0x214   :  { %2858 = vmatpush3.msra.mxu0 %v1902_v43  ;;  %v387_v43 = vmul.f32 %v382_v5, %v5075_v9  ;;  %v422_v31 = vmax.f32 %v4442_v22, 0.0  ;;  %v5093_v22 = vld [vmem:[#allocation49_spill] sm:$0xff] }
 0x215   :  { %2859 = vmatprep.subr.mxu0 %v5014_v8 }
 0x216   :  { %2860 = vmatpush3.msra.mxu0 %v1901_v52  ;;  %v5076_v52 = vld [vmem:[#allocation14_spill] sm:$0xff]  ;;  %v4444_v45 = vadd.f32 %v402_v60, %v387_v43  ;;  %v4472_v43 = vadd.f32 %v402_v60, %v396_v3  ;;  %v5090_v3 = vld [vmem:[#allocation52_spill] sm:$0xff] }
 0x217   :  { %2861 = vmatprep.subr.mxu0 %v5014_v8 }
 0x218   :  { %2862 = vmatpush3.msra.mxu0 %v1900_v33  ;;  %v388_v33 = vmul.f32 %v382_v5, %v5076_v52  ;;  %v4474_v52 = vadd.f32 %v402_v60, %v397_v40  ;;  %v5091_v40 = vld [vmem:[#allocation51_spill] sm:$0xff] }
 0x219   :  { %2863 = vmatprep.subr.mxu0 %v5014_v8 }
 0x21a   :  { %2864 = vmatpush3.msra.mxu0 %v1899_v0  ;;  %v5077_v0 = vld [vmem:[#allocation13_spill] sm:$0xff]  ;;  %v4446_v50 = vadd.f32 %v402_v60, %v388_v33 }
 0x21b   :  { %2865 = vmatprep.subr.mxu0 %v5014_v8 }
 0x21c   :  { %2866 = vmatpush3.msra.mxu0 %v1898_v15  ;;  %v389_v15 = vmul.f32 %v382_v5, %v5077_v0  ;;  %v423_v0 = vmax.f32 %v4444_v45, 0.0 }
 0x21d   :  { %2867 = vmatprep.subr.mxu0 %v5014_v8 }
 0x21e   :  { %2868 = vmatpush3.msra.mxu0 %v1897_v38  ;;  %v5078_v38 = vld [vmem:[#allocation12_spill] sm:$0xff] }
 0x21f   :  { %2869 = vmatprep.subr.mxu0 %v5014_v8 }
 0x220   :  { %2870 = vmatpush3.msra.mxu0 %v1896_v58  ;;  %v390_v58 = vmul.f32 %v382_v5, %v5078_v38 }
 0x221   :  { %2871 = vmatprep.subr.mxu0 %v5014_v8 }
 0x222   :  { %2872 = vmatpush3.msra.mxu0 %v1895_v49  ;;  %v5079_v49 = vld [vmem:[#allocation11_spill] sm:$0xff] }
 0x223   :  { %2873 = vmatprep.subr.mxu0 %v5014_v8 }
 0x224   :  { %2874 = vmatpush3.msra.mxu0 %v1894_v16  ;;  %v391_v16 = vmul.f32 %v382_v5, %v5079_v49 }
 0x225   :  { %2875 = vmatprep.subr.mxu0 %v5014_v8 }
 0x226   :  { %2876 = vmatpush3.msra.mxu0 %v1893_v10  ;;  %v4437_v10 = vadd.f32 %v402_v60, %v385_v18  ;;  %v4458_v23 = vadd.f32 %v402_v60, %v391_v16  ;;  %v4465_v18 = vadd.f32 %v402_v60, %v393_v4  ;;  %v5098_v16 = vld [vmem:[#allocation41_spill] sm:$0xff] }
 0x228   :  { %v421_v57 = vmax.f32 %v4437_v10, 0.0 }
 0x242   :  { %v4408_v21 = vpop.f32.mrf.mxu0 }
 0x244   :  { %v2809_v29 = vpop.f32.mrf.mxu0 }
 0x245   :  { %v5080_v29 = vld [vmem:[#allocation10_spill] sm:$0xff] }
 0x246   :  { %v392_v13 = vmul.f32 %v382_v5, %v5080_v29  ;;  %v5086_v29 = vld [vmem:[#allocation4_spill] sm:$0xff] }
 0x2ab   :  { %v981_v1 = vpop.f32.mrf.mxu1 }
 0x2ac   :  { %v985_v37 = vmul.f32 0.00048828125, %v981_v1  ;;  %v5083_v1 = vld [vmem:[#allocation7_spill] sm:$0xff] }
 0x2ad   :  { %v2774_v44 = vpop.f32.mrf.mxu1  ;;  %v395_v48 = vmul.f32 %v382_v5, %v5083_v1 }
 0x2ae   :  { %v986_v35 = vmul.f32 %v985_v37, %v985_v37 }
 0x2af   :  { %v4470_v9 = vadd.f32 %v402_v60, %v395_v48 }
 0x2b0   :  { %v988_v51 = vrot.slane %v986_v35, 7  ;;  %v4451_v35 = vadd.f32 %v402_v60, %v389_v15  ;;  %v424_v15 = vmax.f32 %v4446_v50, 0.0 }
 0x2b2   :  { %v990_v59 = vsub.f32 %v985_v37, %v988_v51  ;;  %v4453_v51 = vadd.f32 %v402_v60, %v390_v58  ;;  %v425_v38 = vmax.f32 %v4451_v35, 0.0  ;;  %v998_v58 = vld [vmem:[%s4894_s5 + $0x1] sm:$0x1]  ;;  %v5087_v35 = vld [vmem:[#allocation55_spill] sm:$0xff] }
 0x2b4   :  { %v992_v53 = vadd.f32 1e-05, %v990_v59  ;;  %v991_v59 = vld [vmem:[%s4893_s4 + $0x1] sm:$0x1]  ;;  %v426_v49 = vmax.f32 %v4453_v51, 0.0 }
 0x2b6   :  { %2885 = vrsqrt.f32 %v992_v53  ;;  %v4460_v53 = vadd.f32 %v402_v60, %v392_v13  ;;  %v398_v13 = vmul.f32 %v382_v5, %v5086_v29 }
 0x2b8   :  { %v4492_v1 = vadd.f32 %v402_v60, %v398_v13  ;;  %v5094_v13 = vld [vmem:[#allocation48_spill] sm:$0xff] }
 0x2c3   :  { %v2886_v41 = vpop.eup %2885 }
 0x2c4   :  { %v995_v34 = vrot.slane %v2886_v41, 1  ;;  %v5088_v41 = vld [vmem:[#allocation54_spill] sm:$0xff] }
 0x2c6   :  { %v997_v33 = vmul.f32 %v995_v34, %v991_v59 }
 0x2c8   :  { %v999_v63 = vmul.f32 %v997_v33, %v985_v37  ;;  %v1004_v4 = vrot.slane %v997_v33, %v4420_v61  ;;  %v5089_v37 = vld [vmem:[#allocation53_spill] sm:$0xff]  ;;  %v5092_v33 = vld [vmem:[#allocation50_spill] sm:$0xff] }
 0x2ca   :  { %v1000_v48 = vsub.f32 %v998_v58, %v999_v63  ;;  %v1005_v51 = vmul.f32 %v1004_v4, %v5087_v35  ;;  %v1006_v5 = vmul.f32 %v1004_v4, %v5088_v41  ;;  %v1007_v59 = vmul.f32 %v1004_v4, %v5089_v37  ;;  %v5095_v63 = vld [vmem:[#allocation46_spill] sm:$0xff]  ;;  %v5096_v41 = vld [vmem:[#allocation44_spill] sm:$0xff]  ;;  %v5097_v37 = vld [vmem:[#allocation43_spill] sm:$0xff] }
 0x2cb   :  { %v1885_v27 = vpop.f32.mrf.mxu1  ;;  %v1008_v56 = vmul.f32 %v1004_v4, %v5090_v3  ;;  %v1009_v34 = vmul.f32 %v1004_v4, %v5091_v40  ;;  %v1010_v29 = vmul.f32 %v1004_v4, %v5092_v33  ;;  %v1011_v45 = vmul.f32 %v1004_v4, %v5093_v22 }
 0x2cc   :  { %v1024_v50 = vrot.slane %v1000_v48, %v4420_v61  ;;  %v1890_v60 = vrot.slane %v1885_v27, 7  ;;  %v1012_v58 = vmul.f32 %v1004_v4, %v5094_v13  ;;  %v1013_v35 = vmul.f32 %v1004_v4, %v5095_v63 }
 0x2cd   :  { %v2844_v39 = vpop.f32.mrf.mxu1  ;;  %v1014_v30 = vmul.f32 %v1004_v4, %v5096_v41  ;;  %v1015_v10 = vmul.f32 %v1004_v4, %v5097_v37  ;;  %v1016_v3 = vmul.f32 %v1004_v4, %v5098_v16  ;;  %v1017_v40 = vmul.f32 %v1004_v4, %v5099_v11 }
 0x2ce   :  { %v1892_v33 = vsel %vm275_vm1, %v4408_v21, %v1890_v60  ;;  %v1025_v22 = vadd.f32 %v1024_v50, %v1005_v51  ;;  %v1026_v44 = vadd.f32 %v1024_v50, %v1006_v5  ;;  %v1027_v48 = vadd.f32 %v1024_v50, %v1007_v59 }
 0x2cf   :  { %2878 = vmatmul.mubr.f32.vlgmr.msra.gmra.mxu0 %v1892_v33  ;;  %v1028_v27 = vadd.f32 %v1024_v50, %v1008_v56  ;;  %v1029_v13 = vadd.f32 %v1024_v50, %v1009_v34  ;;  %v1030_v20 = vadd.f32 %v1024_v50, %v1010_v29  ;;  %v1031_v63 = vadd.f32 %v1024_v50, %v1011_v45 }
 0x2d0   :  { %v1041_v39 = vmax.f32 %v1025_v22, 0.0  ;;  %v1042_v62 = vmax.f32 %v1026_v44, 0.0  ;;  %v1043_v41 = vmax.f32 %v1027_v48, 0.0  ;;  %v1032_v19 = vadd.f32 %v1024_v50, %v1012_v58 }
 0x2d1   :  { %v1044_v37 = vmax.f32 %v1028_v27, 0.0  ;;  %v1045_v55 = vmax.f32 %v1029_v13, 0.0  ;;  %v1046_v16 = vmax.f32 %v1030_v20, 0.0  ;;  %v1047_v17 = vmax.f32 %v1031_v63, 0.0 }
 0x2d2   :  { %v5100_v11 = vmax.f32 %v4427_v12, 0.0  ;;  %v5101_v21 = vmax.f32 %v4429_v14, 0.0  ;;  %v4518_v5 = vmul.f32 %v1043_v41, %v421_v57  ;;  %v1048_v59 = vmax.f32 %v1032_v19, 0.0  ;;  %v5103_v57 = vld [vmem:[#allocation32_spill] sm:$0xff] }
 0x2d3   :  { %v4520_v45 = vmul.f32 %v1044_v37, %v422_v31  ;;  %v4522_v44 = vmul.f32 %v1045_v55, %v423_v0  ;;  %v4524_v56 = vmul.f32 %v1046_v16, %v424_v15  ;;  %v4526_v34 = vmul.f32 %v1047_v17, %v425_v38  ;;  %v5104_v55 = vld [vmem:[#allocation26_spill] sm:$0xff] }
 0x2d4   :  { %v4512_v46 = vmul.f32 %v1041_v39, %v5100_v11  ;;  %v4516_v51 = vmul.f32 %v1042_v62, %v5101_v21  ;;  %v4528_v20 = vmul.f32 %v1048_v59, %v426_v49  ;;  %v1033_v12 = vadd.f32 %v1024_v50, %v1013_v35  ;;  %v5102_v62 = vld [vmem:[#allocation35_spill] sm:$0xff] }
 0x2d5   :  { %v1034_v29 = vadd.f32 %v1024_v50, %v1014_v30  ;;  %v1035_v60 = vadd.f32 %v1024_v50, %v1015_v10  ;;  %v1036_v58 = vadd.f32 %v1024_v50, %v1016_v3  ;;  %v1037_v14 = vadd.f32 %v1024_v50, %v1017_v40  ;;  %v2142_v59 = vld [vmem:[%s4895_s7 + $0xd8] sm:$0xff] }
 0x2d6   :  { %v1018_v33 = vmul.f32 %v1004_v4, %v5102_v62  ;;  %v1019_v22 = vmul.f32 %v1004_v4, %v5103_v57  ;;  %v1049_v19 = vmax.f32 %v1033_v12, 0.0  ;;  %v1020_v0 = vmul.f32 %v1004_v4, %v5104_v55  ;;  %v2141_v12 = vld [vmem:[%s4895_s7 + $0xd0] sm:$0xff]  ;;  %v2136_v62 = vld [vmem:[%s4895_s7 + $0xa8] sm:$0xff]  ;;  %v2134_v57 = vld [vmem:[%s4895_s7 + $0x98] sm:$0xff] }
 0x2d7   :  { %v1050_v31 = vmax.f32 %v1034_v29, 0.0  ;;  %v1051_v48 = vmax.f32 %v1035_v60, 0.0  ;;  %v1052_v15 = vmax.f32 %v1036_v58, 0.0  ;;  %v1053_v27 = vmax.f32 %v1037_v14, 0.0  ;;  %v2140_v29 = vld [vmem:[%s4895_s7 + $0xc8] sm:$0xff]  ;;  %v2139_v60 = vld [vmem:[%s4895_s7 + $0xc0] sm:$0xff] }
 0x2d8   :  { %v1038_v17 = vadd.f32 %v1024_v50, %v1018_v33  ;;  %v1039_v38 = vadd.f32 %v1024_v50, %v1019_v22  ;;  %v5105_v49 = vmax.f32 %v4458_v23, 0.0  ;;  %v5106_v10 = vmax.f32 %v4460_v53, 0.0  ;;  %v2138_v58 = vld [vmem:[%s4895_s7 + $0xb8] sm:$0xff]  ;;  %v2137_v14 = vld [vmem:[%s4895_s7 + $0xb0] sm:$0xff]  ;;  %v2135_v33 = vld [vmem:[%s4895_s7 + $0xa0] sm:$0xff] }
 0x2d9   :  { %v5107_v3 = vmax.f32 %v4465_v18, 0.0  ;;  %v1040_v13 = vadd.f32 %v1024_v50, %v1020_v0  ;;  %v5108_v63 = vmax.f32 %v4467_v24, 0.0  ;;  %v5109_v39 = vmax.f32 %v4470_v9, 0.0  ;;  %v2146_v9 = vld [vmem:[%s4895_s7 + $0xf8] sm:$0xff]  ;;  %v2133_v22 = vld [vmem:[%s4895_s7 + $0x90] sm:$0xff]  ;;  %v2128_v0 = vld [vmem:[%s4895_s7 + $0x68] sm:$0xff] }
 0x2da   :  { %v4535_v35 = vmul.f32 %v1049_v19, %v5105_v49  ;;  %v4539_v30 = vmul.f32 %v1050_v31, %v5106_v10  ;;  %v1054_v23 = vmax.f32 %v1038_v17, 0.0  ;;  %v1055_v37 = vmax.f32 %v1039_v38, 0.0  ;;  %2159 = vmatprep.subr.mxu1 %v2146_v9  ;;  %v2132_v19 = vld [vmem:[%s4895_s7 + $0x88] sm:$0xff]  ;;  %v2131_v31 = vld [vmem:[%s4895_s7 + $0x80] sm:$0xff]  ;;  %v2129_v55 = vld [vmem:[%s4895_s7 + $0x70] sm:$0xff] }
 0x2db   :  { %v4543_v40 = vmul.f32 %v1051_v48, %v5107_v3  ;;  %v4547_v4 = vmul.f32 %v1052_v15, %v5108_v63  ;;  %v4551_v41 = vmul.f32 %v1053_v27, %v5109_v39  ;;  %v434_v16 = vmax.f32 %v4492_v1, 0.0  ;;  %v2145_v1 = vld [vmem:[%s4895_s7 + $0xf0] sm:$0xff]  ;;  %v2130_v48 = vld [vmem:[%s4895_s7 + $0x78] sm:$0xff]  ;;  %v2127_v15 = vld [vmem:[%s4895_s7 + $0x60] sm:$0xff] }
 0x2dc   :  { %v1056_v53 = vmax.f32 %v1040_v13, 0.0  ;;  %v5110_v11 = vmax.f32 %v4472_v43, 0.0  ;;  %v5111_v18 = vmax.f32 %v4474_v52, 0.0  ;;  %2160 = vmatpush1.msra.mxu1 %v2145_v1  ;;  %v2144_v43 = vld [vmem:[%s4895_s7 + $0xe8] sm:$0xff]  ;;  %v2143_v52 = vld [vmem:[%s4895_s7 + $0xe0] sm:$0xff]  ;;  %v2126_v27 = vld [vmem:[%s4895_s7 + $0x58] sm:$0xff] }
 0x2dd   :  { %2161 = vmatprep.subr.mxu1 %v2144_v43  ;;  %v2125_v17 = vld [vmem:[%s4895_s7 + $0x50] sm:$0xff]  ;;  %v2124_v38 = vld [vmem:[%s4895_s7 + $0x48] sm:$0xff]  ;;  %v2123_v49 = vld [vmem:[%s4895_s7 + $0x40] sm:$0xff] }
 0x2de   :  { %v4556_v21 = vmul.f32 %v1054_v23, %v5110_v11  ;;  %v4560_v50 = vmul.f32 %v1055_v37, %v5111_v18  ;;  %v4562_v24 = vmul.f32 %v1056_v53, %v434_v16  ;;  %2162 = vmatpush1.msra.mxu1 %v2143_v52  ;;  %v2122_v10 = vld [vmem:[%s4895_s7 + $0x38] sm:$0xff]  ;;  %v2121_v3 = vld [vmem:[%s4895_s7 + $0x30] sm:$0xff]  ;;  %v2120_v13 = vld [vmem:[%s4895_s7 + $0x28] sm:$0xff] }
 0x2df   :  { %2163 = vmatprep.subr.mxu1 %v2142_v59  ;;  %v2119_v63 = vld [vmem:[%s4895_s7 + $0x20] sm:$0xff]  ;;  %v2118_v39 = vld [vmem:[%s4895_s7 + $0x18] sm:$0xff]  ;;  %v2117_v23 = vld [vmem:[%s4895_s7 + $0x10] sm:$0xff] }
 0x2e0   :  { %2164 = vmatpush1.msra.mxu1 %v2141_v12  ;;  %v2116_v37 = vld [vmem:[%s4895_s7 + $0x8] sm:$0xff]  ;;  %v2115_v16 = vld [vmem:[%s4895_s7] sm:$0xff] }
 0x2e1   :  { %2165 = vmatprep.subr.mxu1 %v2140_v29  ;;  %v1985_v12 = vld [vmem:[%s4893_s4 + $0x2] sm:$0x1] }
 0x2e2   :  { %2166 = vmatpush1.msra.mxu1 %v2139_v60 }
 0x2e3   :  { %2167 = vmatprep.subr.mxu1 %v2138_v58  ;;  %v1992_v58 = vld [vmem:[%s4894_s5 + $0x2] sm:$0x1] }
 0x2e4   :  { %2168 = vmatpush1.msra.mxu1 %v2137_v14 }
 0x2e5   :  { %2169 = vmatprep.subr.mxu1 %v2136_v62 }
 0x2e6   :  { %2170 = vmatpush1.msra.mxu1 %v2135_v33 }
 0x2e7   :  { %2171 = vmatprep.subr.mxu1 %v2134_v57 }
 0x2e8   :  { %2172 = vmatpush1.msra.mxu1 %v2133_v22 }
 0x2e9   :  { %2173 = vmatprep.subr.mxu1 %v2132_v19 }
 0x2ea   :  { %2174 = vmatpush1.msra.mxu1 %v2131_v31 }
 0x2eb   :  { %2175 = vmatprep.subr.mxu1 %v2130_v48 }
 0x2ec   :  { %2176 = vmatpush1.msra.mxu1 %v2129_v55 }
 0x2ed   :  { %2177 = vmatprep.subr.mxu1 %v2128_v0 }
 0x2ee   :  { %2178 = vmatpush1.msra.mxu1 %v2127_v15 }
 0x2ef   :  { %2179 = vmatprep.subr.mxu1 %v2126_v27 }
 0x2f0   :  { %2180 = vmatpush1.msra.mxu1 %v2125_v17 }
 0x2f1   :  { %2181 = vmatprep.subr.mxu1 %v2124_v38 }
 0x2f2   :  { %2182 = vmatpush1.msra.mxu1 %v2123_v49 }
 0x2f3   :  { %2183 = vmatprep.subr.mxu1 %v2122_v10 }
 0x2f4   :  { %2184 = vmatpush1.msra.mxu1 %v2121_v3 }
 0x2f5   :  { %2185 = vmatprep.subr.mxu1 %v2120_v13 }
 0x2f6   :  { %2186 = vmatpush1.msra.mxu1 %v2119_v63 }
 0x2f7   :  { %2187 = vmatprep.subr.mxu1 %v2118_v39 }
 0x2f8   :  { %2188 = vmatpush1.msra.mxu1 %v2117_v23 }
 0x2f9   :  { %2189 = vmatprep.subr.mxu1 %v2116_v37 }
 0x2fa   :  { %2190 = vmatpush1.msra.mxu1 %v2115_v16 }
 0x38f   :  { %v1975_v53 = vpop.f32.mrf.mxu0 }
 0x390   :  { %v1979_v11 = vmul.f32 0.00048828125, %v1975_v53 }
 0x391   :  { %v2879_v18 = vpop.f32.mrf.mxu0 }
 0x392   :  { %v1980_v9 = vmul.f32 %v1979_v11, %v1979_v11 }
 0x394   :  { %v1982_v1 = vrot.slane %v1980_v9, 7 }
 0x396   :  { %v1984_v43 = vsub.f32 %v1979_v11, %v1982_v1 }
 0x398   :  { %v1986_v52 = vadd.f32 1e-05, %v1984_v43 }
 0x39a   :  { %2887 = vrsqrt.f32 %v1986_v52 }
 0x3a7   :  { %v2888_v59 = vpop.eup %2887 }
 0x3a8   :  { %v1989_v29 = vrot.slane %v2888_v59, 1 }
 0x3aa   :  { %v1991_v60 = vmul.f32 %v1989_v29, %v1985_v12 }
 0x3ac   :  { %v1993_v14 = vmul.f32 %v1991_v60, %v1979_v11  ;;  %v4667_v62 = vrot.slane %v1991_v60, %v4420_v61 }
 0x3ae   :  { %v1994_v33 = vsub.f32 %v1992_v58, %v1993_v14  ;;  %v1999_v22 = vmul.f32 %v4667_v62, %v4283_v42  ;;  %v2000_v19 = vmul.f32 %v4667_v62, %v4277_v36  ;;  %v2001_v0 = vmul.f32 %v4667_v62, %v4269_v7  ;;  %v5114_v14 = vld [vmem:[#allocation20_spill] sm:$0xff] }
 0x3af   :  { %v2002_v42 = vmul.f32 %v4667_v62, %v4253_v25  ;;  %v2003_v7 = vmul.f32 %v4667_v62, %v4234_v32  ;;  %v2004_v25 = vmul.f32 %v4667_v62, %v4212_v6  ;;  %v2005_v32 = vmul.f32 %v4667_v62, %v4160_v26 }
 0x3b0   :  { %v4670_v57 = vrot.slane %v1994_v33, %v4420_v61  ;;  %v2006_v6 = vmul.f32 %v4667_v62, %v5069_v2  ;;  %v2007_v26 = vmul.f32 %v4667_v62, %v5068_v47  ;;  %v2008_v2 = vmul.f32 %v4667_v62, %v5067_v28  ;;  %v5112_v28 = vld [vmem:[#allocation34_spill] sm:$0xff] }
 0x3b1   :  { %v2009_v47 = vmul.f32 %v4667_v62, %v5066_v54  ;;  %v2010_v52 = vmul.f32 %v4667_v62, %v5112_v28  ;;  %v5113_v54 = vld [vmem:[#allocation38_spill] sm:$0xff]  ;;  %v2012_v33 = vmul.f32 %v4667_v62, %v5114_v14 }
 0x3b2   :  { %v2019_v31 = vadd.f32 %v4670_v57, %v1999_v22  ;;  %v2020_v48 = vadd.f32 %v4670_v57, %v2000_v19  ;;  %v2021_v17 = vadd.f32 %v4670_v57, %v2001_v0  ;;  %v2022_v49 = vadd.f32 %v4670_v57, %v2002_v42 }
 0x3b3   :  { %v2023_v3 = vadd.f32 %v4670_v57, %v2003_v7  ;;  %v2024_v63 = vadd.f32 %v4670_v57, %v2004_v25  ;;  %v2025_v23 = vadd.f32 %v4670_v57, %v2005_v32  ;;  %v2026_v16 = vadd.f32 %v4670_v57, %v2006_v6 }
 0x3b4   :  { %v2035_v55 = vmax.f32 %v2019_v31, 0.0  ;;  %v2036_v27 = vmax.f32 %v2020_v48, 0.0  ;;  %v2037_v38 = vmax.f32 %v2021_v17, 0.0  ;;  %v2038_v10 = vmax.f32 %v2022_v49, 0.0  ;;  %v5115_v31 = vld [vmem:[#allocation45_spill] sm:$0xff] }
 0x3b5   :  { %v2039_v13 = vmax.f32 %v2023_v3, 0.0  ;;  %v2040_v39 = vmax.f32 %v2024_v63, 0.0  ;;  %v2041_v37 = vmax.f32 %v2025_v23, 0.0  ;;  %v2042_v53 = vmax.f32 %v2026_v16, 0.0 }
 0x3b6   :  { %v2067_v15 = vmul.f32 %v2035_v55, %v4512_v46  ;;  %v2068_v36 = vmul.f32 %v2036_v27, %v4516_v51  ;;  %v2069_v46 = vmul.f32 %v2037_v38, %v4518_v5  ;;  %v2070_v51 = vmul.f32 %v2038_v10, %v4520_v45 }
 0x3b7   :  { %v2071_v5 = vmul.f32 %v2039_v13, %v4522_v44  ;;  %v2072_v45 = vmul.f32 %v2040_v39, %v4524_v56  ;;  %v2073_v44 = vmul.f32 %v2041_v37, %v4526_v34  ;;  %v2027_v11 = vadd.f32 %v4670_v57, %v2007_v26 }
 0x3b8   :  { %2224 = vmatmul.mubr.f32.vlgmr.msra.gmra.mxu1 %v2067_v15  ;;  %v2074_v56 = vmul.f32 %v2042_v53, %v4528_v20  ;;  %v2028_v9 = vadd.f32 %v4670_v57, %v2008_v2  ;;  %v2029_v43 = vadd.f32 %v4670_v57, %v2009_v47  ;;  %v2030_v12 = vadd.f32 %v4670_v57, %v2010_v52  ;;  %v5116_v15 = vld [vmem:[#allocation36_spill] sm:$0xff] }
 0x3b9   :  { %2229 = vmatprep.mubr.f32.mxu1 %v5014_v8  ;;  %v2043_v18 = vmax.f32 %v2027_v11, 0.0  ;;  %v2011_v29 = vmul.f32 %v4667_v62, %v5113_v54  ;;  %v2032_v19 = vadd.f32 %v4670_v57, %v2012_v33  ;;  %v2013_v48 = vmul.f32 %v4667_v62, %v5115_v31 }
 0x3ba   :  { %v2044_v1 = vmax.f32 %v2028_v9, 0.0  ;;  %v2045_v59 = vmax.f32 %v2029_v43, 0.0  ;;  %v2046_v60 = vmax.f32 %v2030_v12, 0.0  ;;  %v2014_v27 = vmul.f32 %v4667_v62, %v5116_v15  ;;  %v2147_v62 = vld [vmem:[%s4896_s8] sm:$0x3] }
 0x3bb   :  { %v2075_v34 = vmul.f32 %v2043_v18, %v4535_v35  ;;  %v2031_v58 = vadd.f32 %v4670_v57, %v2011_v29  ;;  %v2048_v55 = vmax.f32 %v2032_v19, 0.0  ;;  %v2033_v0 = vadd.f32 %v4670_v57, %v2013_v48 }
 0x3bc   :  { %2230 = vmatmul.mubr.f32.gmra.mxu1 %v2068_v36  ;;  %v2076_v20 = vmul.f32 %v2044_v1, %v4539_v30  ;;  %v2077_v35 = vmul.f32 %v2045_v59, %v4543_v40  ;;  %v2078_v30 = vmul.f32 %v2046_v60, %v4547_v4  ;;  %v2034_v42 = vadd.f32 %v4670_v57, %v2014_v27 }
 0x3bd   :  { %2235 = vmatprep.mubr.f32.mxu1 %v5014_v8  ;;  %v2047_v22 = vmax.f32 %v2031_v58, 0.0  ;;  %v2080_v4 = vmul.f32 %v2048_v55, %v4556_v21  ;;  %v2049_v17 = vmax.f32 %v2033_v0, 0.0  ;;  %v5117_v21 = vld [vmem:[#allocation23_spill] sm:$0xff]  ;;  %v4756_v57 = vrot.slane %v2147_v62, %v4420_v61 }
 0x3be   :  { %v2155_v49 = vsub.s32 1, %v5117_v21 }
 0x3bf   :  { %v2079_v40 = vmul.f32 %v2047_v22, %v4551_v41  ;;  %v2081_v36 = vmul.f32 %v2049_v17, %v4560_v50  ;;  %v2050_v41 = vmax.f32 %v2034_v42, 0.0 }
 0x3c0   :  { %2236 = vmatmul.mubr.f32.gmra.mxu1 %v2069_v46  ;;  %v4758_v7 = vrot.slane %v2147_v62, %v2155_v49 }
 0x3c1   :  { %2241 = vmatprep.mubr.f32.mxu1 %v5014_v8  ;;  %v2082_v38 = vmul.f32 %v2050_v41, %v4562_v24 }
 0x3c4   :  { %2242 = vmatmul.mubr.f32.gmra.mxu1 %v2070_v51 }
 0x3c5   :  { %2247 = vmatprep.mubr.f32.mxu1 %v5014_v8 }
 0x3c8   :  { %2248 = vmatmul.mubr.f32.gmra.mxu1 %v2071_v5 }
 0x3c9   :  { %2253 = vmatprep.mubr.f32.mxu1 %v5014_v8 }
 0x3cc   :  { %2254 = vmatmul.mubr.f32.gmra.mxu1 %v2072_v45 }
 0x3cd   :  { %2259 = vmatprep.mubr.f32.mxu1 %v5014_v8 }
 0x3d0   :  { %2260 = vmatmul.mubr.f32.gmra.mxu1 %v2073_v44 }
 0x3d1   :  { %2265 = vmatprep.mubr.f32.mxu1 %v5014_v8 }
 0x3d4   :  { %2266 = vmatmul.mubr.f32.gmra.mxu1 %v2074_v56 }
 0x3d5   :  { %2271 = vmatprep.mubr.f32.mxu1 %v5014_v8 }
 0x3d8   :  { %2272 = vmatmul.mubr.f32.gmra.mxu1 %v2075_v34 }
 0x3d9   :  { %2277 = vmatprep.mubr.f32.mxu1 %v5014_v8 }
 0x3dc   :  { %2278 = vmatmul.mubr.f32.gmra.mxu1 %v2076_v20 }
 0x3dd   :  { %2283 = vmatprep.mubr.f32.mxu1 %v5014_v8 }
 0x3e0   :  { %2284 = vmatmul.mubr.f32.gmra.mxu1 %v2077_v35 }
 0x3e1   :  { %2289 = vmatprep.mubr.f32.mxu1 %v5014_v8 }
 0x3e4   :  { %2290 = vmatmul.mubr.f32.gmra.mxu1 %v2078_v30 }
 0x3e5   :  { %2295 = vmatprep.mubr.f32.mxu1 %v5014_v8 }
 0x3e8   :  { %2296 = vmatmul.mubr.f32.gmra.mxu1 %v2079_v40 }
 0x3e9   :  { %2301 = vmatprep.mubr.f32.mxu1 %v5014_v8 }
 0x3ec   :  { %2302 = vmatmul.mubr.f32.gmra.mxu1 %v2080_v4 }
 0x3ed   :  { %2307 = vmatprep.mubr.f32.mxu1 %v5014_v8 }
 0x3f0   :  { %2308 = vmatmul.mubr.f32.gmra.mxu1 %v2081_v36 }
 0x3f1   :  { %2313 = vmatprep.mubr.f32.mxu1 %v5014_v8 }
 0x3f4   :  { %2314 = vmatmul.mubr.f32.gmra.mxu1 %v2082_v38 }
 0x478   :  { %v2225_v46 = vpop.f32.mrf.mxu1 }
 0x479   :  { %v2226_v50 = vadd.f32 %v2225_v46, %v4756_v57 }
 0x47a   :  { %v2227_v10 = vpop.f32.mrf.mxu1 }
 0x47b   :  { %2320 = vst [vmem:[%s4897_s9] sm:$0xff] %v2226_v50  ;;  %v2228_v8 = vadd.f32 %v2227_v10, %v4758_v7 }
 0x47c   :  { %v2231_v24 = vpop.f32.mrf.mxu1 }
 0x47d   :  { %2321 = vst [vmem:[%s4897_s9 + $0x8] sm:$0xff] %v2228_v8  ;;  %v2232_v61 = vadd.f32 %v2231_v24, %v4756_v57 }
 0x47e   :  { %v2233_v3 = vpop.f32.mrf.mxu1 }
 0x47f   :  { %2322 = vst [vmem:[%s4897_s9 + $0x10] sm:$0xff] %v2232_v61  ;;  %v2234_v25 = vadd.f32 %v2233_v3, %v4758_v7 }
 0x480   :  { %v2237_v51 = vpop.f32.mrf.mxu1 }
 0x481   :  { %2323 = vst [vmem:[%s4897_s9 + $0x18] sm:$0xff] %v2234_v25  ;;  %v2238_v13 = vadd.f32 %v2237_v51, %v4756_v57 }
 0x482   :  { %v2239_v63 = vpop.f32.mrf.mxu1 }
 0x483   :  { %2324 = vst [vmem:[%s4897_s9 + $0x20] sm:$0xff] %v2238_v13  ;;  %v2240_v32 = vadd.f32 %v2239_v63, %v4758_v7 }
 0x484   :  { %v2243_v5 = vpop.f32.mrf.mxu1 }
 0x485   :  { %2325 = vst [vmem:[%s4897_s9 + $0x28] sm:$0xff] %v2240_v32  ;;  %v2244_v39 = vadd.f32 %v2243_v5, %v4756_v57 }
 0x486   :  { %v2245_v23 = vpop.f32.mrf.mxu1 }
 0x487   :  { %2326 = vst [vmem:[%s4897_s9 + $0x30] sm:$0xff] %v2244_v39  ;;  %v2246_v6 = vadd.f32 %v2245_v23, %v4758_v7 }
 0x488   :  { %v2249_v45 = vpop.f32.mrf.mxu1 }
 0x489   :  { %2327 = vst [vmem:[%s4897_s9 + $0x38] sm:$0xff] %v2246_v6  ;;  %v2250_v37 = vadd.f32 %v2249_v45, %v4756_v57 }
 0x48a   :  { %v2251_v16 = vpop.f32.mrf.mxu1 }
 0x48b   :  { %2328 = vst [vmem:[%s4897_s9 + $0x40] sm:$0xff] %v2250_v37  ;;  %v2252_v26 = vadd.f32 %v2251_v16, %v4758_v7 }
 0x48c   :  { %v2255_v44 = vpop.f32.mrf.mxu1 }
 0x48d   :  { %2329 = vst [vmem:[%s4897_s9 + $0x48] sm:$0xff] %v2252_v26  ;;  %v2256_v53 = vadd.f32 %v2255_v44, %v4756_v57 }
 0x48e   :  { %v2257_v11 = vpop.f32.mrf.mxu1 }
 0x48f   :  { %2330 = vst [vmem:[%s4897_s9 + $0x50] sm:$0xff] %v2256_v53  ;;  %v2258_v2 = vadd.f32 %v2257_v11, %v4758_v7 }
 0x490   :  { %v2261_v56 = vpop.f32.mrf.mxu1 }
 0x491   :  { %2331 = vst [vmem:[%s4897_s9 + $0x58] sm:$0xff] %v2258_v2  ;;  %v2262_v18 = vadd.f32 %v2261_v56, %v4756_v57 }
 0x492   :  { %v2263_v9 = vpop.f32.mrf.mxu1 }
 0x493   :  { %2332 = vst [vmem:[%s4897_s9 + $0x60] sm:$0xff] %v2262_v18  ;;  %v2264_v47 = vadd.f32 %v2263_v9, %v4758_v7 }
 0x494   :  { %v2267_v34 = vpop.f32.mrf.mxu1 }
 0x495   :  { %2333 = vst [vmem:[%s4897_s9 + $0x68] sm:$0xff] %v2264_v47  ;;  %v2268_v1 = vadd.f32 %v2267_v34, %v4756_v57 }
 0x496   :  { %v2269_v43 = vpop.f32.mrf.mxu1 }
 0x497   :  { %2334 = vst [vmem:[%s4897_s9 + $0x70] sm:$0xff] %v2268_v1  ;;  %v2270_v28 = vadd.f32 %v2269_v43, %v4758_v7 }
 0x498   :  { %v2273_v52 = vpop.f32.mrf.mxu1 }
 0x499   :  { %2335 = vst [vmem:[%s4897_s9 + $0x78] sm:$0xff] %v2270_v28  ;;  %v2274_v20 = vadd.f32 %v2273_v52, %v4756_v57 }
 0x49a   :  { %v2275_v59 = vpop.f32.mrf.mxu1 }
 0x49b   :  { %2336 = vst [vmem:[%s4897_s9 + $0x80] sm:$0xff] %v2274_v20  ;;  %v2276_v12 = vadd.f32 %v2275_v59, %v4758_v7 }
 0x49c   :  { %v2279_v54 = vpop.f32.mrf.mxu1 }
 0x49d   :  { %2337 = vst [vmem:[%s4897_s9 + $0x88] sm:$0xff] %v2276_v12  ;;  %v2280_v29 = vadd.f32 %v2279_v54, %v4756_v57 }
 0x49e   :  { %v2281_v35 = vpop.f32.mrf.mxu1 }
 0x49f   :  { %2338 = vst [vmem:[%s4897_s9 + $0x90] sm:$0xff] %v2280_v29  ;;  %v2282_v60 = vadd.f32 %v2281_v35, %v4758_v7 }
 0x4a0   :  { %v2285_v58 = vpop.f32.mrf.mxu1 }
 0x4a1   :  { %2339 = vst [vmem:[%s4897_s9 + $0x98] sm:$0xff] %v2282_v60  ;;  %v2286_v14 = vadd.f32 %v2285_v58, %v4756_v57 }
 0x4a2   :  { %v2287_v33 = vpop.f32.mrf.mxu1 }
 0x4a3   :  { %2340 = vst [vmem:[%s4897_s9 + $0xa0] sm:$0xff] %v2286_v14  ;;  %v2288_v30 = vadd.f32 %v2287_v33, %v4758_v7 }
 0x4a4   :  { %v2291_v22 = vpop.f32.mrf.mxu1 }
 0x4a5   :  { %2341 = vst [vmem:[%s4897_s9 + $0xa8] sm:$0xff] %v2288_v30  ;;  %v2292_v19 = vadd.f32 %v2291_v22, %v4756_v57 }
 0x4a6   :  { %v2293_v31 = vpop.f32.mrf.mxu1 }
 0x4a7   :  { %2342 = vst [vmem:[%s4897_s9 + $0xb0] sm:$0xff] %v2292_v19  ;;  %v2294_v48 = vadd.f32 %v2293_v31, %v4758_v7 }
 0x4a8   :  { %v2297_v40 = vpop.f32.mrf.mxu1 }
 0x4a9   :  { %2343 = vst [vmem:[%s4897_s9 + $0xb8] sm:$0xff] %v2294_v48  ;;  %v2298_v55 = vadd.f32 %v2297_v40, %v4756_v57 }
 0x4aa   :  { %v2299_v0 = vpop.f32.mrf.mxu1 }
 0x4ab   :  { %2344 = vst [vmem:[%s4897_s9 + $0xc0] sm:$0xff] %v2298_v55  ;;  %v2300_v15 = vadd.f32 %v2299_v0, %v4758_v7 }
 0x4ac   :  { %v2303_v27 = vpop.f32.mrf.mxu1 }
 0x4ad   :  { %2345 = vst [vmem:[%s4897_s9 + $0xc8] sm:$0xff] %v2300_v15  ;;  %v2304_v4 = vadd.f32 %v2303_v27, %v4756_v57 }
 0x4ae   :  { %v2305_v17 = vpop.f32.mrf.mxu1 }
 0x4af   :  { %2346 = vst [vmem:[%s4897_s9 + $0xd0] sm:$0xff] %v2304_v4  ;;  %v2306_v42 = vadd.f32 %v2305_v17, %v4758_v7 }
 0x4b0   :  { %v2309_v36 = vpop.f32.mrf.mxu1 }
 0x4b1   :  { %2347 = vst [vmem:[%s4897_s9 + $0xd8] sm:$0xff] %v2306_v42  ;;  %v2310_v41 = vadd.f32 %v2309_v36, %v4756_v57 }
 0x4b2   :  { %v2311_v38 = vpop.f32.mrf.mxu1 }
 0x4b3   :  { %2348 = vst [vmem:[%s4897_s9 + $0xe0] sm:$0xff] %v2310_v41  ;;  %v2312_v62 = vadd.f32 %v2311_v38, %v4758_v7 }
 0x4b4   :  { %v2315_v21 = vpop.f32.mrf.mxu1 }
 0x4b5   :  { %2349 = vst [vmem:[%s4897_s9 + $0xe8] sm:$0xff] %v2312_v62  ;;  %v2316_v49 = vadd.f32 %v2315_v21, %v4756_v57 }
 0x4b6   :  { %v2317_v46 = vpop.f32.mrf.mxu1 }
 0x4b7   :  { %2350 = vst [vmem:[%s4897_s9 + $0xf0] sm:$0xff] %v2316_v49  ;;  %v2318_v50 = vadd.f32 %v2317_v46, %v4758_v7 }
 0x4b9   :  { %2351 = vst [vmem:[%s4897_s9 + $0xf8] sm:$0xff] %v2318_v50 }

</bundles_post_ra>
